<compile_context>
chip_gen: v5e
topology: v5e:2x2
jax: 0.10.0
libtpu: 0.0.40
codegen_flags: <defaults>
</compile_context>

<pallas_src>
import functools

import jax
import jax.numpy as jnp
from jax import lax
from jax.experimental import pallas as pl
from jax.experimental.pallas import tpu as pltpu


# ----------------------------------------------------------------------------
# Kernel 1: fused bidirectional variational-masked LSTM.
#   grid = (time_blocks,)   [sequential -> "arbitrary"]
#   Per grid step the kernel advances K timesteps of the FORWARD direction on
#   time block t and K timesteps of the BACKWARD direction on time block
#   nT-1-t (reversed inside the block).  h/c for both directions persist in
#   VMEM scratch across the grid.  Input projections (X@Wih + b) are hoisted
#   to one big MXU matmul in the wrapper; only h@Whh stays in the recurrence.
# ----------------------------------------------------------------------------
def _bilstm_kernel(xg_f_ref, xg_b_ref, m_f_ref, m_b_ref, whh_ref,
                   out_f_ref, out_b_ref, hf_sc, cf_sc, hb_sc, cb_sc, *, K):
    t = pl.program_id(0)

    @pl.when(t == 0)
    def _():
        hf_sc[...] = jnp.zeros_like(hf_sc)
        cf_sc[...] = jnp.zeros_like(cf_sc)
        hb_sc[...] = jnp.zeros_like(hb_sc)
        cb_sc[...] = jnp.zeros_like(cb_sc)

    H = hf_sc.shape[-1]
    whh_f = whh_ref[0]                       # [H, 4H] bf16, resident
    whh_b = whh_ref[1]

    def cell(gates, c_prev):
        i = jax.nn.sigmoid(gates[:, 0:H])
        f = jax.nn.sigmoid(gates[:, H:2 * H])
        g = jnp.tanh(gates[:, 2 * H:3 * H])
        o = jax.nn.sigmoid(gates[:, 3 * H:4 * H])
        c_new = f * c_prev + i * g
        h_new = o * jnp.tanh(c_new)
        return h_new, c_new

    def step(k, carry):
        kb = K - 1 - k                       # reversed position for bwd direction
        # the two direction matmuls are independent -> they pipeline on the MXU
        gates_f = xg_f_ref[:, k, :] + jnp.dot(
            hf_sc[...].astype(whh_f.dtype), whh_f,
            preferred_element_type=jnp.float32)
        gates_b = xg_b_ref[:, kb, :] + jnp.dot(
            hb_sc[...].astype(whh_b.dtype), whh_b,
            preferred_element_type=jnp.float32)

        hf_new, cf_new = cell(gates_f, cf_sc[...])
        hb_new, cb_new = cell(gates_b, cb_sc[...])

        keep_f = m_f_ref[:, k, :] > 0.0      # [B, 1]: hold state where masked
        keep_b = m_b_ref[:, kb, :] > 0.0
        cf_sc[...] = jnp.where(keep_f, cf_new, cf_sc[...])
        hf_sc[...] = jnp.where(keep_f, hf_new, hf_sc[...])
        cb_sc[...] = jnp.where(keep_b, cb_new, cb_sc[...])
        hb_sc[...] = jnp.where(keep_b, hb_new, hb_sc[...])

        out_f_ref[:, k, :] = hf_sc[...]      # reference emits the held state
        out_b_ref[:, kb, :] = hb_sc[...]
        return carry

    lax.fori_loop(0, K, step, 0, unroll=True)


def bidirectional_masked_lstm(inp, masks, params, *, K=8):
    """inp: [bs, ls, D] f32, masks: [bs, ls].

    Returns (out_f, out_b): each [bs, Lp, H] f32 (batch-major), Lp = padded ls.
    Raise K to 16-32 in production (budget the double-buffered (B,K,4H) f32
    xg blocks + (B,K,H) out blocks against scoped VMEM: 16 MiB v5e,
    32 MiB v6e/v7x).
    """
    bs, ls, D = inp.shape
    H = params["whh_f"].shape[0]
    bf16 = jnp.bfloat16
    fourH = 4 * H

    Lp = ((ls + K - 1) // K) * K
    if Lp != ls:                              # zero-mask padding holds state
        inp = jnp.pad(inp, ((0, 0), (0, Lp - ls), (0, 0)))
        masks = jnp.pad(masks, ((0, 0), (0, Lp - ls)))
    nT = Lp // K
    B = bs

    inp_flat = inp.reshape(B * Lp, D).astype(bf16)

    if fourH % 128 == 0:
        # one fused [D, 8H] input projection; the kernel picks each direction's
        # 4H half via the lane-block index (no split / stack materialization).
        wih_cat = jnp.concatenate(
            [params["wih_f"], params["wih_b"]], axis=1).astype(bf16)   # [D, 8H]
        b_cat = jnp.concatenate([params["b_f"], params["b_b"]], axis=1)
        xg = (jnp.dot(inp_flat, wih_cat, preferred_element_type=jnp.float32)
              + b_cat).reshape(B, Lp, 2 * fourH)
        xg_args = (xg, xg)
        xg_specs = [
            pl.BlockSpec((B, K, fourH), lambda t: (0, t, 0)),
            pl.BlockSpec((B, K, fourH), lambda t: (0, nT - 1 - t, 1)),
        ]
    else:
        # TODO(synk): lane-tiling fallback for tiny H (4H not a multiple of
        # 128): two separate projections instead of the fused weight.
        xg_f = (jnp.dot(inp_flat, params["wih_f"].astype(bf16),
                        preferred_element_type=jnp.float32)
                + params["b_f"]).reshape(B, Lp, fourH)
        xg_b = (jnp.dot(inp_flat, params["wih_b"].astype(bf16),
                        preferred_element_type=jnp.float32)
                + params["b_b"]).reshape(B, Lp, fourH)
        xg_args = (xg_f, xg_b)
        xg_specs = [
            pl.BlockSpec((B, K, fourH), lambda t: (0, t, 0)),
            pl.BlockSpec((B, K, fourH), lambda t: (0, nT - 1 - t, 0)),
        ]

    m3 = masks.astype(jnp.float32)[:, :, None]                        # [B, Lp, 1]
    whh = jnp.stack([params["whh_f"], params["whh_b"]], axis=0).astype(bf16)

    out_f, out_b = pl.pallas_call(
        functools.partial(_bilstm_kernel, K=K),
        out_shape=(jax.ShapeDtypeStruct((B, Lp, H), jnp.float32),
                   jax.ShapeDtypeStruct((B, Lp, H), jnp.float32)),
        grid=(nT,),
        in_specs=xg_specs + [
            pl.BlockSpec((B, K, 1), lambda t: (0, t, 0)),
            pl.BlockSpec((B, K, 1), lambda t: (0, nT - 1 - t, 0)),
            pl.BlockSpec((2, H, fourH), lambda t: (0, 0, 0)),
        ],
        out_specs=(pl.BlockSpec((B, K, H), lambda t: (0, t, 0)),
                   pl.BlockSpec((B, K, H), lambda t: (0, nT - 1 - t, 0))),
        scratch_shapes=[pltpu.VMEM((B, H), jnp.float32) for _ in range(4)],
        compiler_params=pltpu.CompilerParams(
            dimension_semantics=("arbitrary",)),    # sequential recurrence
    )(*xg_args, m3, m3, whh)
    return out_f, out_b


# ----------------------------------------------------------------------------
# Kernel 2a: reinforce=True decoder (token-tiled).
#   pspots = log(softmax(ctx@W+b)+1e-12); Gumbel-max sampling over pspots is
#   implemented as an exponential race on e = exp(logits - max):
#     smp  = argmax(e / E),  E ~ Exp(1)   (== argmax(logits + Gumbel))
#     ctc  = argmax(logits)
#     psmp = log(softmax(logits)[smp] + 1e-12)
#   The exp pass is shared between the logsumexp and the race; the race
#   one-hot mask is reused to extract the sampled logit.
# ----------------------------------------------------------------------------
def _dec_sample_kernel(ctx_f_ref, ctx_b_ref, w_ref, b_ref, en_ref,
                       smp_ref, ctc_ref, psmp_ref):
    tt, H = ctx_f_ref.shape
    M = w_ref.shape[1]

    logits = (jnp.dot(ctx_f_ref[...], w_ref[0:H, :],
                      preferred_element_type=jnp.float32)
              + jnp.dot(ctx_b_ref[...], w_ref[H:2 * H, :],
                        preferred_element_type=jnp.float32)
              + b_ref[...])                                           # [tt, M]

    row_max = jnp.max(logits, axis=-1, keepdims=True)
    e = jnp.exp(logits - row_max)                  # shared: lse + race
    lse = row_max + jnp.log(jnp.sum(e, axis=-1, keepdims=True))

    en = jnp.maximum(en_ref[...], 1e-20)           # Exp(1) noise from wrapper
    race = e / en
    race_max = jnp.max(race, axis=-1, keepdims=True)
    smp_mask = race >= race_max

    iota = lax.broadcasted_iota(jnp.int32, (tt, M), 1)
    smp = jnp.min(jnp.where(smp_mask, iota, M), axis=-1, keepdims=True)
    ctc = jnp.min(jnp.where(logits >= row_max, iota, M),
                  axis=-1, keepdims=True)

    lsel = jnp.max(jnp.where(smp_mask, logits, -jnp.inf),
                   axis=-1, keepdims=True)         # logits[smp]
    psmp = jnp.log(jnp.exp(lsel - lse) + 1e-12)    # exact reference clamp

    # lane-dense (1, tt) stores: tokens on lanes
    smp_ref[...] = smp.reshape(1, tt)
    ctc_ref[...] = ctc.reshape(1, tt)
    psmp_ref[...] = psmp.reshape(1, tt)


# ----------------------------------------------------------------------------
# Kernel 2b: reinforce=False decoder (gumbel_softmax path).
#   sft = softmax((pspots + g)/t) == softmax((logits + g)/t)  (row shift by
#   -lse cancels; the +1e-12 clamp is a negligible approximation);
#   y = argmax, x_emb = sft @ word_emb_tgt.
# ----------------------------------------------------------------------------
def _dec_gumbel_softmax_kernel(ctx_f_ref, ctx_b_ref, w_ref, b_ref, g_ref,
                               temb_ref, y_ref, emb_ref, *, inv_t):
    tt, H = ctx_f_ref.shape
    M = w_ref.shape[1]

    logits = (jnp.dot(ctx_f_ref[...], w_ref[0:H, :],
                      preferred_element_type=jnp.float32)
              + jnp.dot(ctx_b_ref[...], w_ref[H:2 * H, :],
                        preferred_element_type=jnp.float32)
              + b_ref[...])                                           # [tt, M]

    z = (logits + g_ref[...]) * inv_t
    zmax = jnp.max(z, axis=-1, keepdims=True)
    ez = jnp.exp(z - zmax)
    sft = ez / jnp.sum(ez, axis=-1, keepdims=True)

    iota = lax.broadcasted_iota(jnp.int32, (tt, M), 1)
    y = jnp.min(jnp.where(z >= zmax, iota, M), axis=-1, keepdims=True)

    x_emb = jnp.dot(sft.astype(temb_ref.dtype), temb_ref[...],
                    preferred_element_type=jnp.float32)               # [tt, E]

    y_ref[...] = y.reshape(1, tt)
    emb_ref[...] = x_emb


# ----------------------------------------------------------------------------
# Forward wrapper (eval mode: dropouts = identity, temperature t = 1.0).
# ----------------------------------------------------------------------------
def seqall_forward(params, inp_word, inp_char, inp_pos, masks, rng,
                   reinforce=True, temperature=1.0,
                   lstm_block_steps=8, dec_token_tile=128):
    bs, ls = inp_word.shape
    bf16 = jnp.bfloat16

    # TODO(synk): InpEncoder internals are not in the source; using a
    # word/char-mean/pos embedding-concat encoder as JAX glue (inp_drop = id).
    w_e = params["word_emb"][inp_word]                       # [bs, ls, E]
    c_e = params["char_emb"][inp_char].mean(axis=2)          # [bs, ls, CE]
    p_e = params["pos_emb"][inp_pos]                         # [bs, ls, PE]
    inp = jnp.concatenate([w_e, c_e, p_e], axis=-1)          # [bs, ls, D]

    # bidirectional masked LSTM (ctx_rnn); ctx_drop = identity in eval mode
    out_f, out_b = bidirectional_masked_lstm(inp, masks, params,
                                             K=lstm_block_steps)
    B, Lp, H = out_f.shape

    # token-tiled decoder inputs (free reshapes: batch-major LSTM output)
    Tp = B * Lp
    tt = dec_token_tile                                      # 128 (use 64 on v7x)
    Tr = ((Tp + tt - 1) // tt) * tt
    ctx_f = out_f.reshape(Tp, H).astype(bf16)
    ctx_b = out_b.reshape(Tp, H).astype(bf16)
    if Tr != Tp:
        ctx_f = jnp.pad(ctx_f, ((0, Tr - Tp), (0, 0)))
        ctx_b = jnp.pad(ctx_b, ((0, Tr - Tp), (0, 0)))

    # TODO(synk): mlp_decoding (Linear-ReLU-Linear-Softmax) head not modeled;
    # a single Linear + softmax (folded into log-softmax identities) is used.
    dec_w = params["dec_w"].astype(bf16)                     # [2H, nwrd]
    dec_b = params["dec_b"]                                  # [1, nwrd] f32
    M = dec_w.shape[1]

    # TODO(synk): noise is generated host/XLA-side with jax.random because the
    # in-kernel HW PRNG (pltpu.prng_seed) has no interpret/CPU lowering.
    if reinforce:
        en = jax.random.exponential(rng, (Tr, M), jnp.float32)
        smp, ctc, psmp = pl.pallas_call(
            _dec_sample_kernel,
            out_shape=(jax.ShapeDtypeStruct((1, Tr), jnp.int32),
                       jax.ShapeDtypeStruct((1, Tr), jnp.int32),
                       jax.ShapeDtypeStruct((1, Tr), jnp.float32)),
            grid=(Tr // tt,),
            in_specs=[
                pl.BlockSpec((tt, H), lambda i: (i, 0)),
                pl.BlockSpec((tt, H), lambda i: (i, 0)),
                pl.BlockSpec((2 * H, M), lambda i: (0, 0)),   # resident weight
                pl.BlockSpec((1, M), lambda i: (0, 0)),
                pl.BlockSpec((tt, M), lambda i: (i, 0)),
            ],
            out_specs=(pl.BlockSpec((1, tt), lambda i: (0, i)),
                       pl.BlockSpec((1, tt), lambda i: (0, i)),
                       pl.BlockSpec((1, tt), lambda i: (0, i))),
            compiler_params=pltpu.CompilerParams(
                dimension_semantics=("parallel",)),
        )(ctx_f, ctx_b, dec_w, dec_b, en)

        smp_w = smp.reshape(Tr)[:Tp].reshape(B, Lp)[:, :ls]
        ctc_w = ctc.reshape(Tr)[:Tp].reshape(B, Lp)[:, :ls]
        plog = (psmp.reshape(Tr)[:Tp].reshape(B, Lp)[:, :ls]
                * masks.astype(jnp.float32))
        return {
            "obf_word": smp_w,
            "obf_char": params["lut"][smp_w],                # word_to_char glue
            "obf_pos": inp_pos,
            "ctc_word": ctc_w,
            "ctc_char": params["lut"][ctc_w],
            "ctc_pos": inp_pos,
            "plog": plog,
            "obf_mask": masks,
        }
    else:
        # TODO(synk): get_temperature annealing is training-only; eval t = 1.0.
        g = jax.random.gumbel(rng, (Tr, M), jnp.float32)
        temb = params["word_emb_tgt"].astype(bf16)           # [nwrd, E]
        E = temb.shape[1]
        y, x_emb = pl.pallas_call(
            functools.partial(_dec_gumbel_softmax_kernel,
                              inv_t=float(1.0 / temperature)),
            out_shape=(jax.ShapeDtypeStruct((1, Tr), jnp.int32),
                       jax.ShapeDtypeStruct((Tr, E), jnp.float32)),
            grid=(Tr // tt,),
            in_specs=[
                pl.BlockSpec((tt, H), lambda i: (i, 0)),
                pl.BlockSpec((tt, H), lambda i: (i, 0)),
                pl.BlockSpec((2 * H, M), lambda i: (0, 0)),
                pl.BlockSpec((1, M), lambda i: (0, 0)),
                pl.BlockSpec((tt, M), lambda i: (i, 0)),
                pl.BlockSpec((M, E), lambda i: (0, 0)),
            ],
            out_specs=(pl.BlockSpec((1, tt), lambda i: (0, i)),
                       pl.BlockSpec((tt, E), lambda i: (i, 0))),
            compiler_params=pltpu.CompilerParams(
                dimension_semantics=("parallel",)),
        )(ctx_f, ctx_b, dec_w, dec_b, g, temb)

        obf_word = y.reshape(Tr)[:Tp].reshape(B, Lp)[:, :ls]
        obf_word_emb = x_emb[:Tp].reshape(B, Lp, E)[:, :ls]
        return {
            "obf_word": obf_word,
            "obf_char": params["lut"][obf_word],
            "obf_pos": inp_pos,
            "obf_word_emb": obf_word_emb,
            "t": temperature,
            "obf_mask": masks,
        }


if __name__ == "__main__":
    # small, module-consistent shapes (H chosen so 4H is lane-aligned)
    bs, ls = 2, 8
    nwrd, E = 64, 16          # word vocab / word-emb dim
    nchar, CE, clen = 32, 8, 4
    npos, PE = 8, 8
    D = E + CE + PE           # inp_dim = 32
    H = 32                    # ctx_fs; bidirectional -> hs = 64
    HS = 2 * H

    key = jax.random.PRNGKey(0)
    ks = jax.random.split(key, 16)

    word_emb = jax.random.normal(ks[0], (nwrd, E), jnp.float32) * 0.1
    char_emb = jax.random.normal(ks[1], (nchar, CE), jnp.float32) * 0.1
    pos_emb = jax.random.normal(ks[2], (npos, PE), jnp.float32) * 0.1

    wih_f = jax.random.normal(ks[3], (D, 4 * H), jnp.float32) * 0.1
    whh_f = jax.random.normal(ks[4], (H, 4 * H), jnp.float32) * 0.1
    b_f = jnp.zeros((1, 4 * H), jnp.float32)
    wih_b = jax.random.normal(ks[5], (D, 4 * H), jnp.float32) * 0.1
    whh_b = jax.random.normal(ks[6], (H, 4 * H), jnp.float32) * 0.1
    b_b = jnp.zeros((1, 4 * H), jnp.float32)

    dec_w = jax.random.normal(ks[7], (HS, nwrd), jnp.float32) * 0.1
    dec_b = jnp.zeros((1, nwrd), jnp.float32)

    lut = jax.random.randint(ks[8], (nwrd, clen), 0, nchar, dtype=jnp.int32)

    params = dict(word_emb=word_emb, char_emb=char_emb, pos_emb=pos_emb,
                  wih_f=wih_f, whh_f=whh_f, b_f=b_f,
                  wih_b=wih_b, whh_b=whh_b, b_b=b_b,
                  dec_w=dec_w, dec_b=dec_b,
                  word_emb_tgt=word_emb, lut=lut)

    inp_word = jax.random.randint(ks[9], (bs, ls), 0, nwrd, dtype=jnp.int32)
    inp_char = jax.random.randint(ks[10], (bs, ls, clen), 0, nchar,
                                  dtype=jnp.int32)
    inp_pos = jax.random.randint(ks[11], (bs, ls), 0, npos, dtype=jnp.int32)
    masks = jnp.ones((bs, ls), jnp.float32).at[1, 6:].set(0.0)

    ret_reinforce = seqall_forward(params, inp_word, inp_char, inp_pos, masks,
                                   rng=ks[12], reinforce=True)
    ret_gumbel = seqall_forward(params, inp_word, inp_char, inp_pos, masks,
                                rng=ks[13], reinforce=False, temperature=1.0)

    for v in (jax.tree_util.tree_leaves(ret_reinforce)
              + jax.tree_util.tree_leaves(ret_gumbel)):
        if isinstance(v, jax.Array):
            jax.block_until_ready(v)
    print("KERNEL_OK")
</pallas_src>

<mosaic_0001>
module attributes {stable_mosaic.version = 11 : i64} {
  func.func @_bilstm_kernel(%arg0: i32, %arg1: memref<2x8x128xf32, #tpu.memory_space<vmem>>, %arg2: memref<2x8x128xf32, #tpu.memory_space<vmem>>, %arg3: memref<2x8x1xf32, #tpu.memory_space<vmem>>, %arg4: memref<2x8x1xf32, #tpu.memory_space<vmem>>, %arg5: memref<2x32x128xbf16, #tpu.memory_space<vmem>>, %arg6: memref<2x8x32xf32, #tpu.memory_space<vmem>>, %arg7: memref<2x8x32xf32, #tpu.memory_space<vmem>>, %arg8: memref<2x32xf32, #tpu.memory_space<vmem>>, %arg9: memref<2x32xf32, #tpu.memory_space<vmem>>, %arg10: memref<2x32xf32, #tpu.memory_space<vmem>>, %arg11: memref<2x32xf32, #tpu.memory_space<vmem>>) attributes {dimension_semantics = [#tpu.dimension_semantics<arbitrary>], iteration_bounds = array<i64: 1>, scalar_prefetch = 0 : i64, scratch_operands = 4 : i64, tpu.core_type = #tpu.core_type<tc>, window_params = [{transform_indices = @transform_0, window_bounds = array<i64: 2, 8, 128>}, {transform_indices = @transform_1, window_bounds = array<i64: 2, 8, 128>}, {transform_indices = @transform_2, window_bounds = array<i64: 2, 8, 1>}, {transform_indices = @transform_3, window_bounds = array<i64: 2, 8, 1>}, {pipeline_mode = #tpu.pipeline_mode<synchronous>, transform_indices = @transform_4, window_bounds = array<i64: 2, 32, 128>}, {transform_indices = @transform_5, window_bounds = array<i64: 2, 8, 32>}, {transform_indices = @transform_6, window_bounds = array<i64: 2, 8, 32>}]} {
    %c0_i32 = arith.constant 0 : i32
    %0 = arith.cmpi eq, %arg0, %c0_i32 : i32
    %1 = arith.extui %0 : i1 to i32
    %c0_i32_0 = arith.constant 0 : i32
    %2 = arith.cmpi ne, %1, %c0_i32_0 : i32
    scf.if %2 {
      %cst_413 = arith.constant 0.000000e+00 : f32
      %863 = vector.broadcast %cst_413 : f32 to vector<2x32xf32>
      %c0_414 = arith.constant 0 : index
      %c0_415 = arith.constant 0 : index
      %864 = vector.load %arg8[%c0_414, %c0_415] : memref<2x32xf32, #tpu.memory_space<vmem>>, vector<2x32xf32>
      tpu.vector_store %arg8[%c0_414, %c0_415], %863 {strides = array<i32>} : memref<2x32xf32, #tpu.memory_space<vmem>>, vector<2x32xf32>,
      %cst_416 = arith.constant 0.000000e+00 : f32
      %865 = vector.broadcast %cst_416 : f32 to vector<2x32xf32>
      %c0_417 = arith.constant 0 : index
      %c0_418 = arith.constant 0 : index
      %866 = vector.load %arg9[%c0_417, %c0_418] : memref<2x32xf32, #tpu.memory_space<vmem>>, vector<2x32xf32>
      tpu.vector_store %arg9[%c0_417, %c0_418], %865 {strides = array<i32>} : memref<2x32xf32, #tpu.memory_space<vmem>>, vector<2x32xf32>,
      %cst_419 = arith.constant 0.000000e+00 : f32
      %867 = vector.broadcast %cst_419 : f32 to vector<2x32xf32>
      %c0_420 = arith.constant 0 : index
      %c0_421 = arith.constant 0 : index
      %868 = vector.load %arg10[%c0_420, %c0_421] : memref<2x32xf32, #tpu.memory_space<vmem>>, vector<2x32xf32>
      tpu.vector_store %arg10[%c0_420, %c0_421], %867 {strides = array<i32>} : memref<2x32xf32, #tpu.memory_space<vmem>>, vector<2x32xf32>,
      %cst_422 = arith.constant 0.000000e+00 : f32
      %869 = vector.broadcast %cst_422 : f32 to vector<2x32xf32>
      %c0_423 = arith.constant 0 : index
      %c0_424 = arith.constant 0 : index
      %870 = vector.load %arg11[%c0_423, %c0_424] : memref<2x32xf32, #tpu.memory_space<vmem>>, vector<2x32xf32>
      tpu.vector_store %arg11[%c0_423, %c0_424], %869 {strides = array<i32>} : memref<2x32xf32, #tpu.memory_space<vmem>>, vector<2x32xf32>,
    } else {
    }
    %c0 = arith.constant 0 : index
    %c0_1 = arith.constant 0 : index
    %c0_2 = arith.constant 0 : index
    %3 = vector.load %arg5[%c0, %c0_1, %c0_2] : memref<2x32x128xbf16, #tpu.memory_space<vmem>>, vector<1x32x128xbf16>
    %4 = vector.shape_cast %3 : vector<1x32x128xbf16> to vector<32x128xbf16>
    %c1 = arith.constant 1 : index
    %c0_3 = arith.constant 0 : index
    %c0_4 = arith.constant 0 : index
    %5 = vector.load %arg5[%c1, %c0_3, %c0_4] : memref<2x32x128xbf16, #tpu.memory_space<vmem>>, vector<1x32x128xbf16>
    %6 = vector.shape_cast %5 : vector<1x32x128xbf16> to vector<32x128xbf16>
    %c0_i32_5 = arith.constant 0 : i32
    %c7_i32 = arith.constant 7 : i32
    %7 = arith.subi %c7_i32, %c0_i32_5 : i32
    %c0_6 = arith.constant 0 : index
    %8 = arith.index_cast %c0_i32_5 : i32 to index
    %c0_7 = arith.constant 0 : index
    %9 = vector.load %arg1[%c0_6, %8, %c0_7] : memref<2x8x128xf32, #tpu.memory_space<vmem>>, vector<2x1x128xf32>
    %10 = vector.shape_cast %9 : vector<2x1x128xf32> to vector<2x128xf32>
    %c0_8 = arith.constant 0 : index
    %c0_9 = arith.constant 0 : index
    %11 = vector.load %arg8[%c0_8, %c0_9] : memref<2x32xf32, #tpu.memory_space<vmem>>, vector<2x32xf32>
    %12 = arith.truncf %11 : vector<2x32xf32> to vector<2x32xbf16>
    %cst = arith.constant dense<0.000000e+00> : vector<2x128xf32>
    %13 = tpu.matmul %12, %4, %cst {dimension_numbers = #tpu.dot_dimension_numbers<[1], [0], [0], [1], [0, 0, 1, 1], [], []>} : vector<2x32xbf16>, vector<32x128xbf16>, vector<2x128xf32> -> vector<2x128xf32>
    %14 = arith.addf %10, %13 : vector<2x128xf32>
    %c0_10 = arith.constant 0 : index
    %15 = arith.index_cast %7 : i32 to index
    %c0_11 = arith.constant 0 : index
    %16 = vector.load %arg2[%c0_10, %15, %c0_11] : memref<2x8x128xf32, #tpu.memory_space<vmem>>, vector<2x1x128xf32>
    %17 = vector.shape_cast %16 : vector<2x1x128xf32> to vector<2x128xf32>
    %c0_12 = arith.constant 0 : index
    %c0_13 = arith.constant 0 : index
    %18 = vector.load %arg10[%c0_12, %c0_13] : memref<2x32xf32, #tpu.memory_space<vmem>>, vector<2x32xf32>
    %19 = arith.truncf %18 : vector<2x32xf32> to vector<2x32xbf16>
    %cst_14 = arith.constant dense<0.000000e+00> : vector<2x128xf32>
    %20 = tpu.matmul %19, %6, %cst_14 {dimension_numbers = #tpu.dot_dimension_numbers<[1], [0], [0], [1], [0, 0, 1, 1], [], []>} : vector<2x32xbf16>, vector<32x128xbf16>, vector<2x128xf32> -> vector<2x128xf32>
    %21 = arith.addf %17, %20 : vector<2x128xf32>
    %c0_15 = arith.constant 0 : index
    %c0_16 = arith.constant 0 : index
    %22 = vector.load %arg9[%c0_15, %c0_16] : memref<2x32xf32, #tpu.memory_space<vmem>>, vector<2x32xf32>
    %23 = vector.extract_strided_slice %14 {offsets = [0, 0], sizes = [2, 32], strides = [1, 1]} : vector<2x128xf32> to vector<2x32xf32>
    %24 = arith.negf %23 : vector<2x32xf32>
    %25 = math.exp %24 : vector<2x32xf32>
    %cst_17 = arith.constant 1.000000e+00 : f32
    %26 = vector.broadcast %cst_17 : f32 to vector<2x32xf32>
    %27 = arith.addf %26, %25 : vector<2x32xf32>
    %28 = arith.divf %26, %27 : vector<2x32xf32>
    %29 = vector.extract_strided_slice %14 {offsets = [0, 32], sizes = [2, 32], strides = [1, 1]} : vector<2x128xf32> to vector<2x32xf32>
    %30 = arith.negf %29 : vector<2x32xf32>
    %31 = math.exp %30 : vector<2x32xf32>
    %cst_18 = arith.constant 1.000000e+00 : f32
    %32 = vector.broadcast %cst_18 : f32 to vector<2x32xf32>
    %33 = arith.addf %32, %31 : vector<2x32xf32>
    %34 = arith.divf %32, %33 : vector<2x32xf32>
    %35 = vector.extract_strided_slice %14 {offsets = [0, 64], sizes = [2, 32], strides = [1, 1]} : vector<2x128xf32> to vector<2x32xf32>
    %36 = math.tanh %35 : vector<2x32xf32>
    %37 = vector.extract_strided_slice %14 {offsets = [0, 96], sizes = [2, 32], strides = [1, 1]} : vector<2x128xf32> to vector<2x32xf32>
    %38 = arith.negf %37 : vector<2x32xf32>
    %39 = math.exp %38 : vector<2x32xf32>
    %cst_19 = arith.constant 1.000000e+00 : f32
    %40 = vector.broadcast %cst_19 : f32 to vector<2x32xf32>
    %41 = arith.addf %40, %39 : vector<2x32xf32>
    %42 = arith.divf %40, %41 : vector<2x32xf32>
    %43 = arith.mulf %34, %22 : vector<2x32xf32>
    %44 = arith.mulf %28, %36 : vector<2x32xf32>
    %45 = arith.addf %43, %44 : vector<2x32xf32>
    %46 = math.tanh %45 : vector<2x32xf32>
    %47 = arith.mulf %42, %46 : vector<2x32xf32>
    %c0_20 = arith.constant 0 : index
    %c0_21 = arith.constant 0 : index
    %48 = vector.load %arg11[%c0_20, %c0_21] : memref<2x32xf32, #tpu.memory_space<vmem>>, vector<2x32xf32>
    %49 = vector.extract_strided_slice %21 {offsets = [0, 0], sizes = [2, 32], strides = [1, 1]} : vector<2x128xf32> to vector<2x32xf32>
    %50 = arith.negf %49 : vector<2x32xf32>
    %51 = math.exp %50 : vector<2x32xf32>
    %cst_22 = arith.constant 1.000000e+00 : f32
    %52 = vector.broadcast %cst_22 : f32 to vector<2x32xf32>
    %53 = arith.addf %52, %51 : vector<2x32xf32>
    %54 = arith.divf %52, %53 : vector<2x32xf32>
    %55 = vector.extract_strided_slice %21 {offsets = [0, 32], sizes = [2, 32], strides = [1, 1]} : vector<2x128xf32> to vector<2x32xf32>
    %56 = arith.negf %55 : vector<2x32xf32>
    %57 = math.exp %56 : vector<2x32xf32>
    %cst_23 = arith.constant 1.000000e+00 : f32
    %58 = vector.broadcast %cst_23 : f32 to vector<2x32xf32>
    %59 = arith.addf %58, %57 : vector<2x32xf32>
    %60 = arith.divf %58, %59 : vector<2x32xf32>
    %61 = vector.extract_strided_slice %21 {offsets = [0, 64], sizes = [2, 32], strides = [1, 1]} : vector<2x128xf32> to vector<2x32xf32>
    %62 = math.tanh %61 : vector<2x32xf32>
    %63 = vector.extract_strided_slice %21 {offsets = [0, 96], sizes = [2, 32], strides = [1, 1]} : vector<2x128xf32> to vector<2x32xf32>
    %64 = arith.negf %63 : vector<2x32xf32>
    %65 = math.exp %64 : vector<2x32xf32>
    %cst_24 = arith.constant 1.000000e+00 : f32
    %66 = vector.broadcast %cst_24 : f32 to vector<2x32xf32>
    %67 = arith.addf %66, %65 : vector<2x32xf32>
    %68 = arith.divf %66, %67 : vector<2x32xf32>
    %69 = arith.mulf %60, %48 : vector<2x32xf32>
    %70 = arith.mulf %54, %62 : vector<2x32xf32>
    %71 = arith.addf %69, %70 : vector<2x32xf32>
    %72 = math.tanh %71 : vector<2x32xf32>
    %73 = arith.mulf %68, %72 : vector<2x32xf32>
    %c0_25 = arith.constant 0 : index
    %74 = arith.index_cast %c0_i32_5 : i32 to index
    %c0_26 = arith.constant 0 : index
    %75 = vector.load %arg3[%c0_25, %74, %c0_26] : memref<2x8x1xf32, #tpu.memory_space<vmem>>, vector<2x1x1xf32>
    %76 = vector.shape_cast %75 : vector<2x1x1xf32> to vector<2x1xf32>
    %cst_27 = arith.constant 0.000000e+00 : f32
    %77 = vector.broadcast %cst_27 : f32 to vector<2x1xf32>
    %78 = arith.cmpf ogt, %76, %77 : vector<2x1xf32>
    %c0_28 = arith.constant 0 : index
    %79 = arith.index_cast %7 : i32 to index
    %c0_29 = arith.constant 0 : index
    %80 = vector.load %arg4[%c0_28, %79, %c0_29] : memref<2x8x1xf32, #tpu.memory_space<vmem>>, vector<2x1x1xf32>
    %81 = vector.shape_cast %80 : vector<2x1x1xf32> to vector<2x1xf32>
    %cst_30 = arith.constant 0.000000e+00 : f32
    %82 = vector.broadcast %cst_30 : f32 to vector<2x1xf32>
    %83 = arith.cmpf ogt, %81, %82 : vector<2x1xf32>
    %c0_31 = arith.constant 0 : index
    %c0_32 = arith.constant 0 : index
    %84 = vector.load %arg9[%c0_31, %c0_32] : memref<2x32xf32, #tpu.memory_space<vmem>>, vector<2x32xf32>
    %85 = vector.shape_cast %78 : vector<2x1xi1> to vector<2x1xi1>
    %86 = vector.broadcast %85 : vector<2x1xi1> to vector<2x32xi1>
    %87 = arith.select %86, %45, %84 : vector<2x32xi1>, vector<2x32xf32>
    %c0_33 = arith.constant 0 : index
    %c0_34 = arith.constant 0 : index
    %88 = vector.load %arg9[%c0_33, %c0_34] : memref<2x32xf32, #tpu.memory_space<vmem>>, vector<2x32xf32>
    tpu.vector_store %arg9[%c0_33, %c0_34], %87 {strides = array<i32>} : memref<2x32xf32, #tpu.memory_space<vmem>>, vector<2x32xf32>,
    %c0_35 = arith.constant 0 : index
    %c0_36 = arith.constant 0 : index
    %89 = vector.load %arg8[%c0_35, %c0_36] : memref<2x32xf32, #tpu.memory_space<vmem>>, vector<2x32xf32>
    %90 = vector.shape_cast %78 : vector<2x1xi1> to vector<2x1xi1>
    %91 = vector.broadcast %90 : vector<2x1xi1> to vector<2x32xi1>
    %92 = arith.select %91, %47, %89 : vector<2x32xi1>, vector<2x32xf32>
    %c0_37 = arith.constant 0 : index
    %c0_38 = arith.constant 0 : index
    %93 = vector.load %arg8[%c0_37, %c0_38] : memref<2x32xf32, #tpu.memory_space<vmem>>, vector<2x32xf32>
    tpu.vector_store %arg8[%c0_37, %c0_38], %92 {strides = array<i32>} : memref<2x32xf32, #tpu.memory_space<vmem>>, vector<2x32xf32>,
    %c0_39 = arith.constant 0 : index
    %c0_40 = arith.constant 0 : index
    %94 = vector.load %arg11[%c0_39, %c0_40] : memref<2x32xf32, #tpu.memory_space<vmem>>, vector<2x32xf32>
    %95 = vector.shape_cast %83 : vector<2x1xi1> to vector<2x1xi1>
    %96 = vector.broadcast %95 : vector<2x1xi1> to vector<2x32xi1>
    %97 = arith.select %96, %71, %94 : vector<2x32xi1>, vector<2x32xf32>
    %c0_41 = arith.constant 0 : index
    %c0_42 = arith.constant 0 : index
    %98 = vector.load %arg11[%c0_41, %c0_42] : memref<2x32xf32, #tpu.memory_space<vmem>>, vector<2x32xf32>
    tpu.vector_store %arg11[%c0_41, %c0_42], %97 {strides = array<i32>} : memref<2x32xf32, #tpu.memory_space<vmem>>, vector<2x32xf32>,
    %c0_43 = arith.constant 0 : index
    %c0_44 = arith.constant 0 : index
    %99 = vector.load %arg10[%c0_43, %c0_44] : memref<2x32xf32, #tpu.memory_space<vmem>>, vector<2x32xf32>
    %100 = vector.shape_cast %83 : vector<2x1xi1> to vector<2x1xi1>
    %101 = vector.broadcast %100 : vector<2x1xi1> to vector<2x32xi1>
    %102 = arith.select %101, %73, %99 : vector<2x32xi1>, vector<2x32xf32>
    %c0_45 = arith.constant 0 : index
    %c0_46 = arith.constant 0 : index
    %103 = vector.load %arg10[%c0_45, %c0_46] : memref<2x32xf32, #tpu.memory_space<vmem>>, vector<2x32xf32>
    tpu.vector_store %arg10[%c0_45, %c0_46], %102 {strides = array<i32>} : memref<2x32xf32, #tpu.memory_space<vmem>>, vector<2x32xf32>,
    %c0_47 = arith.constant 0 : index
    %c0_48 = arith.constant 0 : index
    %104 = vector.load %arg8[%c0_47, %c0_48] : memref<2x32xf32, #tpu.memory_space<vmem>>, vector<2x32xf32>
    %c0_49 = arith.constant 0 : index
    %105 = arith.index_cast %c0_i32_5 : i32 to index
    %c0_50 = arith.constant 0 : index
    %106 = vector.load %arg6[%c0_49, %105, %c0_50] : memref<2x8x32xf32, #tpu.memory_space<vmem>>, vector<2x1x32xf32>
    %107 = vector.shape_cast %106 : vector<2x1x32xf32> to vector<2x32xf32>
    %108 = vector.shape_cast %104 : vector<2x32xf32> to vector<2x1x32xf32>
    tpu.vector_store %arg6[%c0_49, %105, %c0_50], %108 {strides = array<i32>} : memref<2x8x32xf32, #tpu.memory_space<vmem>>, vector<2x1x32xf32>,
    %c0_51 = arith.constant 0 : index
    %c0_52 = arith.constant 0 : index
    %109 = vector.load %arg10[%c0_51, %c0_52] : memref<2x32xf32, #tpu.memory_space<vmem>>, vector<2x32xf32>
    %c0_53 = arith.constant 0 : index
    %110 = arith.index_cast %7 : i32 to index
    %c0_54 = arith.constant 0 : index
    %111 = vector.load %arg7[%c0_53, %110, %c0_54] : memref<2x8x32xf32, #tpu.memory_space<vmem>>, vector<2x1x32xf32>
    %112 = vector.shape_cast %111 : vector<2x1x32xf32> to vector<2x32xf32>
    %113 = vector.shape_cast %109 : vector<2x32xf32> to vector<2x1x32xf32>
    tpu.vector_store %arg7[%c0_53, %110, %c0_54], %113 {strides = array<i32>} : memref<2x8x32xf32, #tpu.memory_space<vmem>>, vector<2x1x32xf32>,
    %c1_i32 = arith.constant 1 : i32
    %c7_i32_55 = arith.constant 7 : i32
    %114 = arith.subi %c7_i32_55, %c1_i32 : i32
    %c0_56 = arith.constant 0 : index
    %115 = arith.index_cast %c1_i32 : i32 to index
    %c0_57 = arith.constant 0 : index
    %116 = vector.load %arg1[%c0_56, %115, %c0_57] : memref<2x8x128xf32, #tpu.memory_space<vmem>>, vector<2x1x128xf32>
    %117 = vector.shape_cast %116 : vector<2x1x128xf32> to vector<2x128xf32>
    %c0_58 = arith.constant 0 : index
    %c0_59 = arith.constant 0 : index
    %118 = vector.load %arg8[%c0_58, %c0_59] : memref<2x32xf32, #tpu.memory_space<vmem>>, vector<2x32xf32>
    %119 = arith.truncf %118 : vector<2x32xf32> to vector<2x32xbf16>
    %cst_60 = arith.constant dense<0.000000e+00> : vector<2x128xf32>
    %120 = tpu.matmul %119, %4, %cst_60 {dimension_numbers = #tpu.dot_dimension_numbers<[1], [0], [0], [1], [0, 0, 1, 1], [], []>} : vector<2x32xbf16>, vector<32x128xbf16>, vector<2x128xf32> -> vector<2x128xf32>
    %121 = arith.addf %117, %120 : vector<2x128xf32>
    %c0_61 = arith.constant 0 : index
    %122 = arith.index_cast %114 : i32 to index
    %c0_62 = arith.constant 0 : index
    %123 = vector.load %arg2[%c0_61, %122, %c0_62] : memref<2x8x128xf32, #tpu.memory_space<vmem>>, vector<2x1x128xf32>
    %124 = vector.shape_cast %123 : vector<2x1x128xf32> to vector<2x128xf32>
    %c0_63 = arith.constant 0 : index
    %c0_64 = arith.constant 0 : index
    %125 = vector.load %arg10[%c0_63, %c0_64] : memref<2x32xf32, #tpu.memory_space<vmem>>, vector<2x32xf32>
    %126 = arith.truncf %125 : vector<2x32xf32> to vector<2x32xbf16>
    %cst_65 = arith.constant dense<0.000000e+00> : vector<2x128xf32>
    %127 = tpu.matmul %126, %6, %cst_65 {dimension_numbers = #tpu.dot_dimension_numbers<[1], [0], [0], [1], [0, 0, 1, 1], [], []>} : vector<2x32xbf16>, vector<32x128xbf16>, vector<2x128xf32> -> vector<2x128xf32>
    %128 = arith.addf %124, %127 : vector<2x128xf32>
    %c0_66 = arith.constant 0 : index
    %c0_67 = arith.constant 0 : index
    %129 = vector.load %arg9[%c0_66, %c0_67] : memref<2x32xf32, #tpu.memory_space<vmem>>, vector<2x32xf32>
    %130 = vector.extract_strided_slice %121 {offsets = [0, 0], sizes = [2, 32], strides = [1, 1]} : vector<2x128xf32> to vector<2x32xf32>
    %131 = arith.negf %130 : vector<2x32xf32>
    %132 = math.exp %131 : vector<2x32xf32>
    %cst_68 = arith.constant 1.000000e+00 : f32
    %133 = vector.broadcast %cst_68 : f32 to vector<2x32xf32>
    %134 = arith.addf %133, %132 : vector<2x32xf32>
    %135 = arith.divf %133, %134 : vector<2x32xf32>
    %136 = vector.extract_strided_slice %121 {offsets = [0, 32], sizes = [2, 32], strides = [1, 1]} : vector<2x128xf32> to vector<2x32xf32>
    %137 = arith.negf %136 : vector<2x32xf32>
    %138 = math.exp %137 : vector<2x32xf32>
    %cst_69 = arith.constant 1.000000e+00 : f32
    %139 = vector.broadcast %cst_69 : f32 to vector<2x32xf32>
    %140 = arith.addf %139, %138 : vector<2x32xf32>
    %141 = arith.divf %139, %140 : vector<2x32xf32>
    %142 = vector.extract_strided_slice %121 {offsets = [0, 64], sizes = [2, 32], strides = [1, 1]} : vector<2x128xf32> to vector<2x32xf32>
    %143 = math.tanh %142 : vector<2x32xf32>
    %144 = vector.extract_strided_slice %121 {offsets = [0, 96], sizes = [2, 32], strides = [1, 1]} : vector<2x128xf32> to vector<2x32xf32>
    %145 = arith.negf %144 : vector<2x32xf32>
    %146 = math.exp %145 : vector<2x32xf32>
    %cst_70 = arith.constant 1.000000e+00 : f32
    %147 = vector.broadcast %cst_70 : f32 to vector<2x32xf32>
    %148 = arith.addf %147, %146 : vector<2x32xf32>
    %149 = arith.divf %147, %148 : vector<2x32xf32>
    %150 = arith.mulf %141, %129 : vector<2x32xf32>
    %151 = arith.mulf %135, %143 : vector<2x32xf32>
    %152 = arith.addf %150, %151 : vector<2x32xf32>
    %153 = math.tanh %152 : vector<2x32xf32>
    %154 = arith.mulf %149, %153 : vector<2x32xf32>
    %c0_71 = arith.constant 0 : index
    %c0_72 = arith.constant 0 : index
    %155 = vector.load %arg11[%c0_71, %c0_72] : memref<2x32xf32, #tpu.memory_space<vmem>>, vector<2x32xf32>
    %156 = vector.extract_strided_slice %128 {offsets = [0, 0], sizes = [2, 32], strides = [1, 1]} : vector<2x128xf32> to vector<2x32xf32>
    %157 = arith.negf %156 : vector<2x32xf32>
    %158 = math.exp %157 : vector<2x32xf32>
    %cst_73 = arith.constant 1.000000e+00 : f32
    %159 = vector.broadcast %cst_73 : f32 to vector<2x32xf32>
    %160 = arith.addf %159, %158 : vector<2x32xf32>
    %161 = arith.divf %159, %160 : vector<2x32xf32>
    %162 = vector.extract_strided_slice %128 {offsets = [0, 32], sizes = [2, 32], strides = [1, 1]} : vector<2x128xf32> to vector<2x32xf32>
    %163 = arith.negf %162 : vector<2x32xf32>
    %164 = math.exp %163 : vector<2x32xf32>
    %cst_74 = arith.constant 1.000000e+00 : f32
    %165 = vector.broadcast %cst_74 : f32 to vector<2x32xf32>
    %166 = arith.addf %165, %164 : vector<2x32xf32>
    %167 = arith.divf %165, %166 : vector<2x32xf32>
    %168 = vector.extract_strided_slice %128 {offsets = [0, 64], sizes = [2, 32], strides = [1, 1]} : vector<2x128xf32> to vector<2x32xf32>
    %169 = math.tanh %168 : vector<2x32xf32>
    %170 = vector.extract_strided_slice %128 {offsets = [0, 96], sizes = [2, 32], strides = [1, 1]} : vector<2x128xf32> to vector<2x32xf32>
    %171 = arith.negf %170 : vector<2x32xf32>
    %172 = math.exp %171 : vector<2x32xf32>
    %cst_75 = arith.constant 1.000000e+00 : f32
    %173 = vector.broadcast %cst_75 : f32 to vector<2x32xf32>
    %174 = arith.addf %173, %172 : vector<2x32xf32>
    %175 = arith.divf %173, %174 : vector<2x32xf32>
    %176 = arith.mulf %167, %155 : vector<2x32xf32>
    %177 = arith.mulf %161, %169 : vector<2x32xf32>
    %178 = arith.addf %176, %177 : vector<2x32xf32>
    %179 = math.tanh %178 : vector<2x32xf32>
    %180 = arith.mulf %175, %179 : vector<2x32xf32>
    %c0_76 = arith.constant 0 : index
    %181 = arith.index_cast %c1_i32 : i32 to index
    %c0_77 = arith.constant 0 : index
    %182 = vector.load %arg3[%c0_76, %181, %c0_77] : memref<2x8x1xf32, #tpu.memory_space<vmem>>, vector<2x1x1xf32>
    %183 = vector.shape_cast %182 : vector<2x1x1xf32> to vector<2x1xf32>
    %cst_78 = arith.constant 0.000000e+00 : f32
    %184 = vector.broadcast %cst_78 : f32 to vector<2x1xf32>
    %185 = arith.cmpf ogt, %183, %184 : vector<2x1xf32>
    %c0_79 = arith.constant 0 : index
    %186 = arith.index_cast %114 : i32 to index
    %c0_80 = arith.constant 0 : index
    %187 = vector.load %arg4[%c0_79, %186, %c0_80] : memref<2x8x1xf32, #tpu.memory_space<vmem>>, vector<2x1x1xf32>
    %188 = vector.shape_cast %187 : vector<2x1x1xf32> to vector<2x1xf32>
    %cst_81 = arith.constant 0.000000e+00 : f32
    %189 = vector.broadcast %cst_81 : f32 to vector<2x1xf32>
    %190 = arith.cmpf ogt, %188, %189 : vector<2x1xf32>
    %c0_82 = arith.constant 0 : index
    %c0_83 = arith.constant 0 : index
    %191 = vector.load %arg9[%c0_82, %c0_83] : memref<2x32xf32, #tpu.memory_space<vmem>>, vector<2x32xf32>
    %192 = vector.shape_cast %185 : vector<2x1xi1> to vector<2x1xi1>
    %193 = vector.broadcast %192 : vector<2x1xi1> to vector<2x32xi1>
    %194 = arith.select %193, %152, %191 : vector<2x32xi1>, vector<2x32xf32>
    %c0_84 = arith.constant 0 : index
    %c0_85 = arith.constant 0 : index
    %195 = vector.load %arg9[%c0_84, %c0_85] : memref<2x32xf32, #tpu.memory_space<vmem>>, vector<2x32xf32>
    tpu.vector_store %arg9[%c0_84, %c0_85], %194 {strides = array<i32>} : memref<2x32xf32, #tpu.memory_space<vmem>>, vector<2x32xf32>,
    %c0_86 = arith.constant 0 : index
    %c0_87 = arith.constant 0 : index
    %196 = vector.load %arg8[%c0_86, %c0_87] : memref<2x32xf32, #tpu.memory_space<vmem>>, vector<2x32xf32>
    %197 = vector.shape_cast %185 : vector<2x1xi1> to vector<2x1xi1>
    %198 = vector.broadcast %197 : vector<2x1xi1> to vector<2x32xi1>
    %199 = arith.select %198, %154, %196 : vector<2x32xi1>, vector<2x32xf32>
    %c0_88 = arith.constant 0 : index
    %c0_89 = arith.constant 0 : index
    %200 = vector.load %arg8[%c0_88, %c0_89] : memref<2x32xf32, #tpu.memory_space<vmem>>, vector<2x32xf32>
    tpu.vector_store %arg8[%c0_88, %c0_89], %199 {strides = array<i32>} : memref<2x32xf32, #tpu.memory_space<vmem>>, vector<2x32xf32>,
    %c0_90 = arith.constant 0 : index
    %c0_91 = arith.constant 0 : index
    %201 = vector.load %arg11[%c0_90, %c0_91] : memref<2x32xf32, #tpu.memory_space<vmem>>, vector<2x32xf32>
    %202 = vector.shape_cast %190 : vector<2x1xi1> to vector<2x1xi1>
    %203 = vector.broadcast %202 : vector<2x1xi1> to vector<2x32xi1>
    %204 = arith.select %203, %178, %201 : vector<2x32xi1>, vector<2x32xf32>
    %c0_92 = arith.constant 0 : index
    %c0_93 = arith.constant 0 : index
    %205 = vector.load %arg11[%c0_92, %c0_93] : memref<2x32xf32, #tpu.memory_space<vmem>>, vector<2x32xf32>
    tpu.vector_store %arg11[%c0_92, %c0_93], %204 {strides = array<i32>} : memref<2x32xf32, #tpu.memory_space<vmem>>, vector<2x32xf32>,
    %c0_94 = arith.constant 0 : index
    %c0_95 = arith.constant 0 : index
    %206 = vector.load %arg10[%c0_94, %c0_95] : memref<2x32xf32, #tpu.memory_space<vmem>>, vector<2x32xf32>
    %207 = vector.shape_cast %190 : vector<2x1xi1> to vector<2x1xi1>
    %208 = vector.broadcast %207 : vector<2x1xi1> to vector<2x32xi1>
    %209 = arith.select %208, %180, %206 : vector<2x32xi1>, vector<2x32xf32>
    %c0_96 = arith.constant 0 : index
    %c0_97 = arith.constant 0 : index
    %210 = vector.load %arg10[%c0_96, %c0_97] : memref<2x32xf32, #tpu.memory_space<vmem>>, vector<2x32xf32>
    tpu.vector_store %arg10[%c0_96, %c0_97], %209 {strides = array<i32>} : memref<2x32xf32, #tpu.memory_space<vmem>>, vector<2x32xf32>,
    %c0_98 = arith.constant 0 : index
    %c0_99 = arith.constant 0 : index
    %211 = vector.load %arg8[%c0_98, %c0_99] : memref<2x32xf32, #tpu.memory_space<vmem>>, vector<2x32xf32>
    %c0_100 = arith.constant 0 : index
    %212 = arith.index_cast %c1_i32 : i32 to index
    %c0_101 = arith.constant 0 : index
    %213 = vector.load %arg6[%c0_100, %212, %c0_101] : memref<2x8x32xf32, #tpu.memory_space<vmem>>, vector<2x1x32xf32>
    %214 = vector.shape_cast %213 : vector<2x1x32xf32> to vector<2x32xf32>
    %215 = vector.shape_cast %211 : vector<2x32xf32> to vector<2x1x32xf32>
    tpu.vector_store %arg6[%c0_100, %212, %c0_101], %215 {strides = array<i32>} : memref<2x8x32xf32, #tpu.memory_space<vmem>>, vector<2x1x32xf32>,
    %c0_102 = arith.constant 0 : index
    %c0_103 = arith.constant 0 : index
    %216 = vector.load %arg10[%c0_102, %c0_103] : memref<2x32xf32, #tpu.memory_space<vmem>>, vector<2x32xf32>
    %c0_104 = arith.constant 0 : index
    %217 = arith.index_cast %114 : i32 to index
    %c0_105 = arith.constant 0 : index
    %218 = vector.load %arg7[%c0_104, %217, %c0_105] : memref<2x8x32xf32, #tpu.memory_space<vmem>>, vector<2x1x32xf32>
    %219 = vector.shape_cast %218 : vector<2x1x32xf32> to vector<2x32xf32>
    %220 = vector.shape_cast %216 : vector<2x32xf32> to vector<2x1x32xf32>
    tpu.vector_store %arg7[%c0_104, %217, %c0_105], %220 {strides = array<i32>} : memref<2x8x32xf32, #tpu.memory_space<vmem>>, vector<2x1x32xf32>,
    %c2_i32 = arith.constant 2 : i32
    %c7_i32_106 = arith.constant 7 : i32
    %221 = arith.subi %c7_i32_106, %c2_i32 : i32
    %c0_107 = arith.constant 0 : index
    %222 = arith.index_cast %c2_i32 : i32 to index
    %c0_108 = arith.constant 0 : index
    %223 = vector.load %arg1[%c0_107, %222, %c0_108] : memref<2x8x128xf32, #tpu.memory_space<vmem>>, vector<2x1x128xf32>
    %224 = vector.shape_cast %223 : vector<2x1x128xf32> to vector<2x128xf32>
    %c0_109 = arith.constant 0 : index
    %c0_110 = arith.constant 0 : index
    %225 = vector.load %arg8[%c0_109, %c0_110] : memref<2x32xf32, #tpu.memory_space<vmem>>, vector<2x32xf32>
    %226 = arith.truncf %225 : vector<2x32xf32> to vector<2x32xbf16>
    %cst_111 = arith.constant dense<0.000000e+00> : vector<2x128xf32>
    %227 = tpu.matmul %226, %4, %cst_111 {dimension_numbers = #tpu.dot_dimension_numbers<[1], [0], [0], [1], [0, 0, 1, 1], [], []>} : vector<2x32xbf16>, vector<32x128xbf16>, vector<2x128xf32> -> vector<2x128xf32>
    %228 = arith.addf %224, %227 : vector<2x128xf32>
    %c0_112 = arith.constant 0 : index
    %229 = arith.index_cast %221 : i32 to index
    %c0_113 = arith.constant 0 : index
    %230 = vector.load %arg2[%c0_112, %229, %c0_113] : memref<2x8x128xf32, #tpu.memory_space<vmem>>, vector<2x1x128xf32>
    %231 = vector.shape_cast %230 : vector<2x1x128xf32> to vector<2x128xf32>
    %c0_114 = arith.constant 0 : index
    %c0_115 = arith.constant 0 : index
    %232 = vector.load %arg10[%c0_114, %c0_115] : memref<2x32xf32, #tpu.memory_space<vmem>>, vector<2x32xf32>
    %233 = arith.truncf %232 : vector<2x32xf32> to vector<2x32xbf16>
    %cst_116 = arith.constant dense<0.000000e+00> : vector<2x128xf32>
    %234 = tpu.matmul %233, %6, %cst_116 {dimension_numbers = #tpu.dot_dimension_numbers<[1], [0], [0], [1], [0, 0, 1, 1], [], []>} : vector<2x32xbf16>, vector<32x128xbf16>, vector<2x128xf32> -> vector<2x128xf32>
    %235 = arith.addf %231, %234 : vector<2x128xf32>
    %c0_117 = arith.constant 0 : index
    %c0_118 = arith.constant 0 : index
    %236 = vector.load %arg9[%c0_117, %c0_118] : memref<2x32xf32, #tpu.memory_space<vmem>>, vector<2x32xf32>
    %237 = vector.extract_strided_slice %228 {offsets = [0, 0], sizes = [2, 32], strides = [1, 1]} : vector<2x128xf32> to vector<2x32xf32>
    %238 = arith.negf %237 : vector<2x32xf32>
    %239 = math.exp %238 : vector<2x32xf32>
    %cst_119 = arith.constant 1.000000e+00 : f32
    %240 = vector.broadcast %cst_119 : f32 to vector<2x32xf32>
    %241 = arith.addf %240, %239 : vector<2x32xf32>
    %242 = arith.divf %240, %241 : vector<2x32xf32>
    %243 = vector.extract_strided_slice %228 {offsets = [0, 32], sizes = [2, 32], strides = [1, 1]} : vector<2x128xf32> to vector<2x32xf32>
    %244 = arith.negf %243 : vector<2x32xf32>
    %245 = math.exp %244 : vector<2x32xf32>
    %cst_120 = arith.constant 1.000000e+00 : f32
    %246 = vector.broadcast %cst_120 : f32 to vector<2x32xf32>
    %247 = arith.addf %246, %245 : vector<2x32xf32>
    %248 = arith.divf %246, %247 : vector<2x32xf32>
    %249 = vector.extract_strided_slice %228 {offsets = [0, 64], sizes = [2, 32], strides = [1, 1]} : vector<2x128xf32> to vector<2x32xf32>
    %250 = math.tanh %249 : vector<2x32xf32>
    %251 = vector.extract_strided_slice %228 {offsets = [0, 96], sizes = [2, 32], strides = [1, 1]} : vector<2x128xf32> to vector<2x32xf32>
    %252 = arith.negf %251 : vector<2x32xf32>
    %253 = math.exp %252 : vector<2x32xf32>
    %cst_121 = arith.constant 1.000000e+00 : f32
    %254 = vector.broadcast %cst_121 : f32 to vector<2x32xf32>
    %255 = arith.addf %254, %253 : vector<2x32xf32>
    %256 = arith.divf %254, %255 : vector<2x32xf32>
    %257 = arith.mulf %248, %236 : vector<2x32xf32>
    %258 = arith.mulf %242, %250 : vector<2x32xf32>
    %259 = arith.addf %257, %258 : vector<2x32xf32>
    %260 = math.tanh %259 : vector<2x32xf32>
    %261 = arith.mulf %256, %260 : vector<2x32xf32>
    %c0_122 = arith.constant 0 : index
    %c0_123 = arith.constant 0 : index
    %262 = vector.load %arg11[%c0_122, %c0_123] : memref<2x32xf32, #tpu.memory_space<vmem>>, vector<2x32xf32>
    %263 = vector.extract_strided_slice %235 {offsets = [0, 0], sizes = [2, 32], strides = [1, 1]} : vector<2x128xf32> to vector<2x32xf32>
    %264 = arith.negf %263 : vector<2x32xf32>
    %265 = math.exp %264 : vector<2x32xf32>
    %cst_124 = arith.constant 1.000000e+00 : f32
    %266 = vector.broadcast %cst_124 : f32 to vector<2x32xf32>
    %267 = arith.addf %266, %265 : vector<2x32xf32>
    %268 = arith.divf %266, %267 : vector<2x32xf32>
    %269 = vector.extract_strided_slice %235 {offsets = [0, 32], sizes = [2, 32], strides = [1, 1]} : vector<2x128xf32> to vector<2x32xf32>
    %270 = arith.negf %269 : vector<2x32xf32>
    %271 = math.exp %270 : vector<2x32xf32>
    %cst_125 = arith.constant 1.000000e+00 : f32
    %272 = vector.broadcast %cst_125 : f32 to vector<2x32xf32>
    %273 = arith.addf %272, %271 : vector<2x32xf32>
    %274 = arith.divf %272, %273 : vector<2x32xf32>
    %275 = vector.extract_strided_slice %235 {offsets = [0, 64], sizes = [2, 32], strides = [1, 1]} : vector<2x128xf32> to vector<2x32xf32>
    %276 = math.tanh %275 : vector<2x32xf32>
    %277 = vector.extract_strided_slice %235 {offsets = [0, 96], sizes = [2, 32], strides = [1, 1]} : vector<2x128xf32> to vector<2x32xf32>
    %278 = arith.negf %277 : vector<2x32xf32>
    %279 = math.exp %278 : vector<2x32xf32>
    %cst_126 = arith.constant 1.000000e+00 : f32
    %280 = vector.broadcast %cst_126 : f32 to vector<2x32xf32>
    %281 = arith.addf %280, %279 : vector<2x32xf32>
    %282 = arith.divf %280, %281 : vector<2x32xf32>
    %283 = arith.mulf %274, %262 : vector<2x32xf32>
    %284 = arith.mulf %268, %276 : vector<2x32xf32>
    %285 = arith.addf %283, %284 : vector<2x32xf32>
    %286 = math.tanh %285 : vector<2x32xf32>
    %287 = arith.mulf %282, %286 : vector<2x32xf32>
    %c0_127 = arith.constant 0 : index
    %288 = arith.index_cast %c2_i32 : i32 to index
    %c0_128 = arith.constant 0 : index
    %289 = vector.load %arg3[%c0_127, %288, %c0_128] : memref<2x8x1xf32, #tpu.memory_space<vmem>>, vector<2x1x1xf32>
    %290 = vector.shape_cast %289 : vector<2x1x1xf32> to vector<2x1xf32>
    %cst_129 = arith.constant 0.000000e+00 : f32
    %291 = vector.broadcast %cst_129 : f32 to vector<2x1xf32>
    %292 = arith.cmpf ogt, %290, %291 : vector<2x1xf32>
    %c0_130 = arith.constant 0 : index
    %293 = arith.index_cast %221 : i32 to index
    %c0_131 = arith.constant 0 : index
    %294 = vector.load %arg4[%c0_130, %293, %c0_131] : memref<2x8x1xf32, #tpu.memory_space<vmem>>, vector<2x1x1xf32>
    %295 = vector.shape_cast %294 : vector<2x1x1xf32> to vector<2x1xf32>
    %cst_132 = arith.constant 0.000000e+00 : f32
    %296 = vector.broadcast %cst_132 : f32 to vector<2x1xf32>
    %297 = arith.cmpf ogt, %295, %296 : vector<2x1xf32>
    %c0_133 = arith.constant 0 : index
    %c0_134 = arith.constant 0 : index
    %298 = vector.load %arg9[%c0_133, %c0_134] : memref<2x32xf32, #tpu.memory_space<vmem>>, vector<2x32xf32>
    %299 = vector.shape_cast %292 : vector<2x1xi1> to vector<2x1xi1>
    %300 = vector.broadcast %299 : vector<2x1xi1> to vector<2x32xi1>
    %301 = arith.select %300, %259, %298 : vector<2x32xi1>, vector<2x32xf32>
    %c0_135 = arith.constant 0 : index
    %c0_136 = arith.constant 0 : index
    %302 = vector.load %arg9[%c0_135, %c0_136] : memref<2x32xf32, #tpu.memory_space<vmem>>, vector<2x32xf32>
    tpu.vector_store %arg9[%c0_135, %c0_136], %301 {strides = array<i32>} : memref<2x32xf32, #tpu.memory_space<vmem>>, vector<2x32xf32>,
    %c0_137 = arith.constant 0 : index
    %c0_138 = arith.constant 0 : index
    %303 = vector.load %arg8[%c0_137, %c0_138] : memref<2x32xf32, #tpu.memory_space<vmem>>, vector<2x32xf32>
    %304 = vector.shape_cast %292 : vector<2x1xi1> to vector<2x1xi1>
    %305 = vector.broadcast %304 : vector<2x1xi1> to vector<2x32xi1>
    %306 = arith.select %305, %261, %303 : vector<2x32xi1>, vector<2x32xf32>
    %c0_139 = arith.constant 0 : index
    %c0_140 = arith.constant 0 : index
    %307 = vector.load %arg8[%c0_139, %c0_140] : memref<2x32xf32, #tpu.memory_space<vmem>>, vector<2x32xf32>
    tpu.vector_store %arg8[%c0_139, %c0_140], %306 {strides = array<i32>} : memref<2x32xf32, #tpu.memory_space<vmem>>, vector<2x32xf32>,
    %c0_141 = arith.constant 0 : index
    %c0_142 = arith.constant 0 : index
    %308 = vector.load %arg11[%c0_141, %c0_142] : memref<2x32xf32, #tpu.memory_space<vmem>>, vector<2x32xf32>
    %309 = vector.shape_cast %297 : vector<2x1xi1> to vector<2x1xi1>
    %310 = vector.broadcast %309 : vector<2x1xi1> to vector<2x32xi1>
    %311 = arith.select %310, %285, %308 : vector<2x32xi1>, vector<2x32xf32>
    %c0_143 = arith.constant 0 : index
    %c0_144 = arith.constant 0 : index
    %312 = vector.load %arg11[%c0_143, %c0_144] : memref<2x32xf32, #tpu.memory_space<vmem>>, vector<2x32xf32>
    tpu.vector_store %arg11[%c0_143, %c0_144], %311 {strides = array<i32>} : memref<2x32xf32, #tpu.memory_space<vmem>>, vector<2x32xf32>,
    %c0_145 = arith.constant 0 : index
    %c0_146 = arith.constant 0 : index
    %313 = vector.load %arg10[%c0_145, %c0_146] : memref<2x32xf32, #tpu.memory_space<vmem>>, vector<2x32xf32>
    %314 = vector.shape_cast %297 : vector<2x1xi1> to vector<2x1xi1>
    %315 = vector.broadcast %314 : vector<2x1xi1> to vector<2x32xi1>
    %316 = arith.select %315, %287, %313 : vector<2x32xi1>, vector<2x32xf32>
    %c0_147 = arith.constant 0 : index
    %c0_148 = arith.constant 0 : index
    %317 = vector.load %arg10[%c0_147, %c0_148] : memref<2x32xf32, #tpu.memory_space<vmem>>, vector<2x32xf32>
    tpu.vector_store %arg10[%c0_147, %c0_148], %316 {strides = array<i32>} : memref<2x32xf32, #tpu.memory_space<vmem>>, vector<2x32xf32>,
    %c0_149 = arith.constant 0 : index
    %c0_150 = arith.constant 0 : index
    %318 = vector.load %arg8[%c0_149, %c0_150] : memref<2x32xf32, #tpu.memory_space<vmem>>, vector<2x32xf32>
    %c0_151 = arith.constant 0 : index
    %319 = arith.index_cast %c2_i32 : i32 to index
    %c0_152 = arith.constant 0 : index
    %320 = vector.load %arg6[%c0_151, %319, %c0_152] : memref<2x8x32xf32, #tpu.memory_space<vmem>>, vector<2x1x32xf32>
    %321 = vector.shape_cast %320 : vector<2x1x32xf32> to vector<2x32xf32>
    %322 = vector.shape_cast %318 : vector<2x32xf32> to vector<2x1x32xf32>
    tpu.vector_store %arg6[%c0_151, %319, %c0_152], %322 {strides = array<i32>} : memref<2x8x32xf32, #tpu.memory_space<vmem>>, vector<2x1x32xf32>,
    %c0_153 = arith.constant 0 : index
    %c0_154 = arith.constant 0 : index
    %323 = vector.load %arg10[%c0_153, %c0_154] : memref<2x32xf32, #tpu.memory_space<vmem>>, vector<2x32xf32>
    %c0_155 = arith.constant 0 : index
    %324 = arith.index_cast %221 : i32 to index
    %c0_156 = arith.constant 0 : index
    %325 = vector.load %arg7[%c0_155, %324, %c0_156] : memref<2x8x32xf32, #tpu.memory_space<vmem>>, vector<2x1x32xf32>
    %326 = vector.shape_cast %325 : vector<2x1x32xf32> to vector<2x32xf32>
    %327 = vector.shape_cast %323 : vector<2x32xf32> to vector<2x1x32xf32>
    tpu.vector_store %arg7[%c0_155, %324, %c0_156], %327 {strides = array<i32>} : memref<2x8x32xf32, #tpu.memory_space<vmem>>, vector<2x1x32xf32>,
    %c3_i32 = arith.constant 3 : i32
    %c7_i32_157 = arith.constant 7 : i32
    %328 = arith.subi %c7_i32_157, %c3_i32 : i32
    %c0_158 = arith.constant 0 : index
    %329 = arith.index_cast %c3_i32 : i32 to index
    %c0_159 = arith.constant 0 : index
    %330 = vector.load %arg1[%c0_158, %329, %c0_159] : memref<2x8x128xf32, #tpu.memory_space<vmem>>, vector<2x1x128xf32>
    %331 = vector.shape_cast %330 : vector<2x1x128xf32> to vector<2x128xf32>
    %c0_160 = arith.constant 0 : index
    %c0_161 = arith.constant 0 : index
    %332 = vector.load %arg8[%c0_160, %c0_161] : memref<2x32xf32, #tpu.memory_space<vmem>>, vector<2x32xf32>
    %333 = arith.truncf %332 : vector<2x32xf32> to vector<2x32xbf16>
    %cst_162 = arith.constant dense<0.000000e+00> : vector<2x128xf32>
    %334 = tpu.matmul %333, %4, %cst_162 {dimension_numbers = #tpu.dot_dimension_numbers<[1], [0], [0], [1], [0, 0, 1, 1], [], []>} : vector<2x32xbf16>, vector<32x128xbf16>, vector<2x128xf32> -> vector<2x128xf32>
    %335 = arith.addf %331, %334 : vector<2x128xf32>
    %c0_163 = arith.constant 0 : index
    %336 = arith.index_cast %328 : i32 to index
    %c0_164 = arith.constant 0 : index
    %337 = vector.load %arg2[%c0_163, %336, %c0_164] : memref<2x8x128xf32, #tpu.memory_space<vmem>>, vector<2x1x128xf32>
    %338 = vector.shape_cast %337 : vector<2x1x128xf32> to vector<2x128xf32>
    %c0_165 = arith.constant 0 : index
    %c0_166 = arith.constant 0 : index
    %339 = vector.load %arg10[%c0_165, %c0_166] : memref<2x32xf32, #tpu.memory_space<vmem>>, vector<2x32xf32>
    %340 = arith.truncf %339 : vector<2x32xf32> to vector<2x32xbf16>
    %cst_167 = arith.constant dense<0.000000e+00> : vector<2x128xf32>
    %341 = tpu.matmul %340, %6, %cst_167 {dimension_numbers = #tpu.dot_dimension_numbers<[1], [0], [0], [1], [0, 0, 1, 1], [], []>} : vector<2x32xbf16>, vector<32x128xbf16>, vector<2x128xf32> -> vector<2x128xf32>
    %342 = arith.addf %338, %341 : vector<2x128xf32>
    %c0_168 = arith.constant 0 : index
    %c0_169 = arith.constant 0 : index
    %343 = vector.load %arg9[%c0_168, %c0_169] : memref<2x32xf32, #tpu.memory_space<vmem>>, vector<2x32xf32>
    %344 = vector.extract_strided_slice %335 {offsets = [0, 0], sizes = [2, 32], strides = [1, 1]} : vector<2x128xf32> to vector<2x32xf32>
    %345 = arith.negf %344 : vector<2x32xf32>
    %346 = math.exp %345 : vector<2x32xf32>
    %cst_170 = arith.constant 1.000000e+00 : f32
    %347 = vector.broadcast %cst_170 : f32 to vector<2x32xf32>
    %348 = arith.addf %347, %346 : vector<2x32xf32>
    %349 = arith.divf %347, %348 : vector<2x32xf32>
    %350 = vector.extract_strided_slice %335 {offsets = [0, 32], sizes = [2, 32], strides = [1, 1]} : vector<2x128xf32> to vector<2x32xf32>
    %351 = arith.negf %350 : vector<2x32xf32>
    %352 = math.exp %351 : vector<2x32xf32>
    %cst_171 = arith.constant 1.000000e+00 : f32
    %353 = vector.broadcast %cst_171 : f32 to vector<2x32xf32>
    %354 = arith.addf %353, %352 : vector<2x32xf32>
    %355 = arith.divf %353, %354 : vector<2x32xf32>
    %356 = vector.extract_strided_slice %335 {offsets = [0, 64], sizes = [2, 32], strides = [1, 1]} : vector<2x128xf32> to vector<2x32xf32>
    %357 = math.tanh %356 : vector<2x32xf32>
    %358 = vector.extract_strided_slice %335 {offsets = [0, 96], sizes = [2, 32], strides = [1, 1]} : vector<2x128xf32> to vector<2x32xf32>
    %359 = arith.negf %358 : vector<2x32xf32>
    %360 = math.exp %359 : vector<2x32xf32>
    %cst_172 = arith.constant 1.000000e+00 : f32
    %361 = vector.broadcast %cst_172 : f32 to vector<2x32xf32>
    %362 = arith.addf %361, %360 : vector<2x32xf32>
    %363 = arith.divf %361, %362 : vector<2x32xf32>
    %364 = arith.mulf %355, %343 : vector<2x32xf32>
    %365 = arith.mulf %349, %357 : vector<2x32xf32>
    %366 = arith.addf %364, %365 : vector<2x32xf32>
    %367 = math.tanh %366 : vector<2x32xf32>
    %368 = arith.mulf %363, %367 : vector<2x32xf32>
    %c0_173 = arith.constant 0 : index
    %c0_174 = arith.constant 0 : index
    %369 = vector.load %arg11[%c0_173, %c0_174] : memref<2x32xf32, #tpu.memory_space<vmem>>, vector<2x32xf32>
    %370 = vector.extract_strided_slice %342 {offsets = [0, 0], sizes = [2, 32], strides = [1, 1]} : vector<2x128xf32> to vector<2x32xf32>
    %371 = arith.negf %370 : vector<2x32xf32>
    %372 = math.exp %371 : vector<2x32xf32>
    %cst_175 = arith.constant 1.000000e+00 : f32
    %373 = vector.broadcast %cst_175 : f32 to vector<2x32xf32>
    %374 = arith.addf %373, %372 : vector<2x32xf32>
    %375 = arith.divf %373, %374 : vector<2x32xf32>
    %376 = vector.extract_strided_slice %342 {offsets = [0, 32], sizes = [2, 32], strides = [1, 1]} : vector<2x128xf32> to vector<2x32xf32>
    %377 = arith.negf %376 : vector<2x32xf32>
    %378 = math.exp %377 : vector<2x32xf32>
    %cst_176 = arith.constant 1.000000e+00 : f32
    %379 = vector.broadcast %cst_176 : f32 to vector<2x32xf32>
    %380 = arith.addf %379, %378 : vector<2x32xf32>
    %381 = arith.divf %379, %380 : vector<2x32xf32>
    %382 = vector.extract_strided_slice %342 {offsets = [0, 64], sizes = [2, 32], strides = [1, 1]} : vector<2x128xf32> to vector<2x32xf32>
    %383 = math.tanh %382 : vector<2x32xf32>
    %384 = vector.extract_strided_slice %342 {offsets = [0, 96], sizes = [2, 32], strides = [1, 1]} : vector<2x128xf32> to vector<2x32xf32>
    %385 = arith.negf %384 : vector<2x32xf32>
    %386 = math.exp %385 : vector<2x32xf32>
    %cst_177 = arith.constant 1.000000e+00 : f32
    %387 = vector.broadcast %cst_177 : f32 to vector<2x32xf32>
    %388 = arith.addf %387, %386 : vector<2x32xf32>
    %389 = arith.divf %387, %388 : vector<2x32xf32>
    %390 = arith.mulf %381, %369 : vector<2x32xf32>
    %391 = arith.mulf %375, %383 : vector<2x32xf32>
    %392 = arith.addf %390, %391 : vector<2x32xf32>
    %393 = math.tanh %392 : vector<2x32xf32>
    %394 = arith.mulf %389, %393 : vector<2x32xf32>
    %c0_178 = arith.constant 0 : index
    %395 = arith.index_cast %c3_i32 : i32 to index
    %c0_179 = arith.constant 0 : index
    %396 = vector.load %arg3[%c0_178, %395, %c0_179] : memref<2x8x1xf32, #tpu.memory_space<vmem>>, vector<2x1x1xf32>
    %397 = vector.shape_cast %396 : vector<2x1x1xf32> to vector<2x1xf32>
    %cst_180 = arith.constant 0.000000e+00 : f32
    %398 = vector.broadcast %cst_180 : f32 to vector<2x1xf32>
    %399 = arith.cmpf ogt, %397, %398 : vector<2x1xf32>
    %c0_181 = arith.constant 0 : index
    %400 = arith.index_cast %328 : i32 to index
    %c0_182 = arith.constant 0 : index
    %401 = vector.load %arg4[%c0_181, %400, %c0_182] : memref<2x8x1xf32, #tpu.memory_space<vmem>>, vector<2x1x1xf32>
    %402 = vector.shape_cast %401 : vector<2x1x1xf32> to vector<2x1xf32>
    %cst_183 = arith.constant 0.000000e+00 : f32
    %403 = vector.broadcast %cst_183 : f32 to vector<2x1xf32>
    %404 = arith.cmpf ogt, %402, %403 : vector<2x1xf32>
    %c0_184 = arith.constant 0 : index
    %c0_185 = arith.constant 0 : index
    %405 = vector.load %arg9[%c0_184, %c0_185] : memref<2x32xf32, #tpu.memory_space<vmem>>, vector<2x32xf32>
    %406 = vector.shape_cast %399 : vector<2x1xi1> to vector<2x1xi1>
    %407 = vector.broadcast %406 : vector<2x1xi1> to vector<2x32xi1>
    %408 = arith.select %407, %366, %405 : vector<2x32xi1>, vector<2x32xf32>
    %c0_186 = arith.constant 0 : index
    %c0_187 = arith.constant 0 : index
    %409 = vector.load %arg9[%c0_186, %c0_187] : memref<2x32xf32, #tpu.memory_space<vmem>>, vector<2x32xf32>
    tpu.vector_store %arg9[%c0_186, %c0_187], %408 {strides = array<i32>} : memref<2x32xf32, #tpu.memory_space<vmem>>, vector<2x32xf32>,
    %c0_188 = arith.constant 0 : index
    %c0_189 = arith.constant 0 : index
    %410 = vector.load %arg8[%c0_188, %c0_189] : memref<2x32xf32, #tpu.memory_space<vmem>>, vector<2x32xf32>
    %411 = vector.shape_cast %399 : vector<2x1xi1> to vector<2x1xi1>
    %412 = vector.broadcast %411 : vector<2x1xi1> to vector<2x32xi1>
    %413 = arith.select %412, %368, %410 : vector<2x32xi1>, vector<2x32xf32>
    %c0_190 = arith.constant 0 : index
    %c0_191 = arith.constant 0 : index
    %414 = vector.load %arg8[%c0_190, %c0_191] : memref<2x32xf32, #tpu.memory_space<vmem>>, vector<2x32xf32>
    tpu.vector_store %arg8[%c0_190, %c0_191], %413 {strides = array<i32>} : memref<2x32xf32, #tpu.memory_space<vmem>>, vector<2x32xf32>,
    %c0_192 = arith.constant 0 : index
    %c0_193 = arith.constant 0 : index
    %415 = vector.load %arg11[%c0_192, %c0_193] : memref<2x32xf32, #tpu.memory_space<vmem>>, vector<2x32xf32>
    %416 = vector.shape_cast %404 : vector<2x1xi1> to vector<2x1xi1>
    %417 = vector.broadcast %416 : vector<2x1xi1> to vector<2x32xi1>
    %418 = arith.select %417, %392, %415 : vector<2x32xi1>, vector<2x32xf32>
    %c0_194 = arith.constant 0 : index
    %c0_195 = arith.constant 0 : index
    %419 = vector.load %arg11[%c0_194, %c0_195] : memref<2x32xf32, #tpu.memory_space<vmem>>, vector<2x32xf32>
    tpu.vector_store %arg11[%c0_194, %c0_195], %418 {strides = array<i32>} : memref<2x32xf32, #tpu.memory_space<vmem>>, vector<2x32xf32>,
    %c0_196 = arith.constant 0 : index
    %c0_197 = arith.constant 0 : index
    %420 = vector.load %arg10[%c0_196, %c0_197] : memref<2x32xf32, #tpu.memory_space<vmem>>, vector<2x32xf32>
    %421 = vector.shape_cast %404 : vector<2x1xi1> to vector<2x1xi1>
    %422 = vector.broadcast %421 : vector<2x1xi1> to vector<2x32xi1>
    %423 = arith.select %422, %394, %420 : vector<2x32xi1>, vector<2x32xf32>
    %c0_198 = arith.constant 0 : index
    %c0_199 = arith.constant 0 : index
    %424 = vector.load %arg10[%c0_198, %c0_199] : memref<2x32xf32, #tpu.memory_space<vmem>>, vector<2x32xf32>
    tpu.vector_store %arg10[%c0_198, %c0_199], %423 {strides = array<i32>} : memref<2x32xf32, #tpu.memory_space<vmem>>, vector<2x32xf32>,
    %c0_200 = arith.constant 0 : index
    %c0_201 = arith.constant 0 : index
    %425 = vector.load %arg8[%c0_200, %c0_201] : memref<2x32xf32, #tpu.memory_space<vmem>>, vector<2x32xf32>
    %c0_202 = arith.constant 0 : index
    %426 = arith.index_cast %c3_i32 : i32 to index
    %c0_203 = arith.constant 0 : index
    %427 = vector.load %arg6[%c0_202, %426, %c0_203] : memref<2x8x32xf32, #tpu.memory_space<vmem>>, vector<2x1x32xf32>
    %428 = vector.shape_cast %427 : vector<2x1x32xf32> to vector<2x32xf32>
    %429 = vector.shape_cast %425 : vector<2x32xf32> to vector<2x1x32xf32>
    tpu.vector_store %arg6[%c0_202, %426, %c0_203], %429 {strides = array<i32>} : memref<2x8x32xf32, #tpu.memory_space<vmem>>, vector<2x1x32xf32>,
    %c0_204 = arith.constant 0 : index
    %c0_205 = arith.constant 0 : index
    %430 = vector.load %arg10[%c0_204, %c0_205] : memref<2x32xf32, #tpu.memory_space<vmem>>, vector<2x32xf32>
    %c0_206 = arith.constant 0 : index
    %431 = arith.index_cast %328 : i32 to index
    %c0_207 = arith.constant 0 : index
    %432 = vector.load %arg7[%c0_206, %431, %c0_207] : memref<2x8x32xf32, #tpu.memory_space<vmem>>, vector<2x1x32xf32>
    %433 = vector.shape_cast %432 : vector<2x1x32xf32> to vector<2x32xf32>
    %434 = vector.shape_cast %430 : vector<2x32xf32> to vector<2x1x32xf32>
    tpu.vector_store %arg7[%c0_206, %431, %c0_207], %434 {strides = array<i32>} : memref<2x8x32xf32, #tpu.memory_space<vmem>>, vector<2x1x32xf32>,
    %c4_i32 = arith.constant 4 : i32
    %c7_i32_208 = arith.constant 7 : i32
    %435 = arith.subi %c7_i32_208, %c4_i32 : i32
    %c0_209 = arith.constant 0 : index
    %436 = arith.index_cast %c4_i32 : i32 to index
    %c0_210 = arith.constant 0 : index
    %437 = vector.load %arg1[%c0_209, %436, %c0_210] : memref<2x8x128xf32, #tpu.memory_space<vmem>>, vector<2x1x128xf32>
    %438 = vector.shape_cast %437 : vector<2x1x128xf32> to vector<2x128xf32>
    %c0_211 = arith.constant 0 : index
    %c0_212 = arith.constant 0 : index
    %439 = vector.load %arg8[%c0_211, %c0_212] : memref<2x32xf32, #tpu.memory_space<vmem>>, vector<2x32xf32>
    %440 = arith.truncf %439 : vector<2x32xf32> to vector<2x32xbf16>
    %cst_213 = arith.constant dense<0.000000e+00> : vector<2x128xf32>
    %441 = tpu.matmul %440, %4, %cst_213 {dimension_numbers = #tpu.dot_dimension_numbers<[1], [0], [0], [1], [0, 0, 1, 1], [], []>} : vector<2x32xbf16>, vector<32x128xbf16>, vector<2x128xf32> -> vector<2x128xf32>
    %442 = arith.addf %438, %441 : vector<2x128xf32>
    %c0_214 = arith.constant 0 : index
    %443 = arith.index_cast %435 : i32 to index
    %c0_215 = arith.constant 0 : index
    %444 = vector.load %arg2[%c0_214, %443, %c0_215] : memref<2x8x128xf32, #tpu.memory_space<vmem>>, vector<2x1x128xf32>
    %445 = vector.shape_cast %444 : vector<2x1x128xf32> to vector<2x128xf32>
    %c0_216 = arith.constant 0 : index
    %c0_217 = arith.constant 0 : index
    %446 = vector.load %arg10[%c0_216, %c0_217] : memref<2x32xf32, #tpu.memory_space<vmem>>, vector<2x32xf32>
    %447 = arith.truncf %446 : vector<2x32xf32> to vector<2x32xbf16>
    %cst_218 = arith.constant dense<0.000000e+00> : vector<2x128xf32>
    %448 = tpu.matmul %447, %6, %cst_218 {dimension_numbers = #tpu.dot_dimension_numbers<[1], [0], [0], [1], [0, 0, 1, 1], [], []>} : vector<2x32xbf16>, vector<32x128xbf16>, vector<2x128xf32> -> vector<2x128xf32>
    %449 = arith.addf %445, %448 : vector<2x128xf32>
    %c0_219 = arith.constant 0 : index
    %c0_220 = arith.constant 0 : index
    %450 = vector.load %arg9[%c0_219, %c0_220] : memref<2x32xf32, #tpu.memory_space<vmem>>, vector<2x32xf32>
    %451 = vector.extract_strided_slice %442 {offsets = [0, 0], sizes = [2, 32], strides = [1, 1]} : vector<2x128xf32> to vector<2x32xf32>
    %452 = arith.negf %451 : vector<2x32xf32>
    %453 = math.exp %452 : vector<2x32xf32>
    %cst_221 = arith.constant 1.000000e+00 : f32
    %454 = vector.broadcast %cst_221 : f32 to vector<2x32xf32>
    %455 = arith.addf %454, %453 : vector<2x32xf32>
    %456 = arith.divf %454, %455 : vector<2x32xf32>
    %457 = vector.extract_strided_slice %442 {offsets = [0, 32], sizes = [2, 32], strides = [1, 1]} : vector<2x128xf32> to vector<2x32xf32>
    %458 = arith.negf %457 : vector<2x32xf32>
    %459 = math.exp %458 : vector<2x32xf32>
    %cst_222 = arith.constant 1.000000e+00 : f32
    %460 = vector.broadcast %cst_222 : f32 to vector<2x32xf32>
    %461 = arith.addf %460, %459 : vector<2x32xf32>
    %462 = arith.divf %460, %461 : vector<2x32xf32>
    %463 = vector.extract_strided_slice %442 {offsets = [0, 64], sizes = [2, 32], strides = [1, 1]} : vector<2x128xf32> to vector<2x32xf32>
    %464 = math.tanh %463 : vector<2x32xf32>
    %465 = vector.extract_strided_slice %442 {offsets = [0, 96], sizes = [2, 32], strides = [1, 1]} : vector<2x128xf32> to vector<2x32xf32>
    %466 = arith.negf %465 : vector<2x32xf32>
    %467 = math.exp %466 : vector<2x32xf32>
    %cst_223 = arith.constant 1.000000e+00 : f32
    %468 = vector.broadcast %cst_223 : f32 to vector<2x32xf32>
    %469 = arith.addf %468, %467 : vector<2x32xf32>
    %470 = arith.divf %468, %469 : vector<2x32xf32>
    %471 = arith.mulf %462, %450 : vector<2x32xf32>
    %472 = arith.mulf %456, %464 : vector<2x32xf32>
    %473 = arith.addf %471, %472 : vector<2x32xf32>
    %474 = math.tanh %473 : vector<2x32xf32>
    %475 = arith.mulf %470, %474 : vector<2x32xf32>
    %c0_224 = arith.constant 0 : index
    %c0_225 = arith.constant 0 : index
    %476 = vector.load %arg11[%c0_224, %c0_225] : memref<2x32xf32, #tpu.memory_space<vmem>>, vector<2x32xf32>
    %477 = vector.extract_strided_slice %449 {offsets = [0, 0], sizes = [2, 32], strides = [1, 1]} : vector<2x128xf32> to vector<2x32xf32>
    %478 = arith.negf %477 : vector<2x32xf32>
    %479 = math.exp %478 : vector<2x32xf32>
    %cst_226 = arith.constant 1.000000e+00 : f32
    %480 = vector.broadcast %cst_226 : f32 to vector<2x32xf32>
    %481 = arith.addf %480, %479 : vector<2x32xf32>
    %482 = arith.divf %480, %481 : vector<2x32xf32>
    %483 = vector.extract_strided_slice %449 {offsets = [0, 32], sizes = [2, 32], strides = [1, 1]} : vector<2x128xf32> to vector<2x32xf32>
    %484 = arith.negf %483 : vector<2x32xf32>
    %485 = math.exp %484 : vector<2x32xf32>
    %cst_227 = arith.constant 1.000000e+00 : f32
    %486 = vector.broadcast %cst_227 : f32 to vector<2x32xf32>
    %487 = arith.addf %486, %485 : vector<2x32xf32>
    %488 = arith.divf %486, %487 : vector<2x32xf32>
    %489 = vector.extract_strided_slice %449 {offsets = [0, 64], sizes = [2, 32], strides = [1, 1]} : vector<2x128xf32> to vector<2x32xf32>
    %490 = math.tanh %489 : vector<2x32xf32>
    %491 = vector.extract_strided_slice %449 {offsets = [0, 96], sizes = [2, 32], strides = [1, 1]} : vector<2x128xf32> to vector<2x32xf32>
    %492 = arith.negf %491 : vector<2x32xf32>
    %493 = math.exp %492 : vector<2x32xf32>
    %cst_228 = arith.constant 1.000000e+00 : f32
    %494 = vector.broadcast %cst_228 : f32 to vector<2x32xf32>
    %495 = arith.addf %494, %493 : vector<2x32xf32>
    %496 = arith.divf %494, %495 : vector<2x32xf32>
    %497 = arith.mulf %488, %476 : vector<2x32xf32>
    %498 = arith.mulf %482, %490 : vector<2x32xf32>
    %499 = arith.addf %497, %498 : vector<2x32xf32>
    %500 = math.tanh %499 : vector<2x32xf32>
    %501 = arith.mulf %496, %500 : vector<2x32xf32>
    %c0_229 = arith.constant 0 : index
    %502 = arith.index_cast %c4_i32 : i32 to index
    %c0_230 = arith.constant 0 : index
    %503 = vector.load %arg3[%c0_229, %502, %c0_230] : memref<2x8x1xf32, #tpu.memory_space<vmem>>, vector<2x1x1xf32>
    %504 = vector.shape_cast %503 : vector<2x1x1xf32> to vector<2x1xf32>
    %cst_231 = arith.constant 0.000000e+00 : f32
    %505 = vector.broadcast %cst_231 : f32 to vector<2x1xf32>
    %506 = arith.cmpf ogt, %504, %505 : vector<2x1xf32>
    %c0_232 = arith.constant 0 : index
    %507 = arith.index_cast %435 : i32 to index
    %c0_233 = arith.constant 0 : index
    %508 = vector.load %arg4[%c0_232, %507, %c0_233] : memref<2x8x1xf32, #tpu.memory_space<vmem>>, vector<2x1x1xf32>
    %509 = vector.shape_cast %508 : vector<2x1x1xf32> to vector<2x1xf32>
    %cst_234 = arith.constant 0.000000e+00 : f32
    %510 = vector.broadcast %cst_234 : f32 to vector<2x1xf32>
    %511 = arith.cmpf ogt, %509, %510 : vector<2x1xf32>
    %c0_235 = arith.constant 0 : index
    %c0_236 = arith.constant 0 : index
    %512 = vector.load %arg9[%c0_235, %c0_236] : memref<2x32xf32, #tpu.memory_space<vmem>>, vector<2x32xf32>
    %513 = vector.shape_cast %506 : vector<2x1xi1> to vector<2x1xi1>
    %514 = vector.broadcast %513 : vector<2x1xi1> to vector<2x32xi1>
    %515 = arith.select %514, %473, %512 : vector<2x32xi1>, vector<2x32xf32>
    %c0_237 = arith.constant 0 : index
    %c0_238 = arith.constant 0 : index
    %516 = vector.load %arg9[%c0_237, %c0_238] : memref<2x32xf32, #tpu.memory_space<vmem>>, vector<2x32xf32>
    tpu.vector_store %arg9[%c0_237, %c0_238], %515 {strides = array<i32>} : memref<2x32xf32, #tpu.memory_space<vmem>>, vector<2x32xf32>,
    %c0_239 = arith.constant 0 : index
    %c0_240 = arith.constant 0 : index
    %517 = vector.load %arg8[%c0_239, %c0_240] : memref<2x32xf32, #tpu.memory_space<vmem>>, vector<2x32xf32>
    %518 = vector.shape_cast %506 : vector<2x1xi1> to vector<2x1xi1>
    %519 = vector.broadcast %518 : vector<2x1xi1> to vector<2x32xi1>
    %520 = arith.select %519, %475, %517 : vector<2x32xi1>, vector<2x32xf32>
    %c0_241 = arith.constant 0 : index
    %c0_242 = arith.constant 0 : index
    %521 = vector.load %arg8[%c0_241, %c0_242] : memref<2x32xf32, #tpu.memory_space<vmem>>, vector<2x32xf32>
    tpu.vector_store %arg8[%c0_241, %c0_242], %520 {strides = array<i32>} : memref<2x32xf32, #tpu.memory_space<vmem>>, vector<2x32xf32>,
    %c0_243 = arith.constant 0 : index
    %c0_244 = arith.constant 0 : index
    %522 = vector.load %arg11[%c0_243, %c0_244] : memref<2x32xf32, #tpu.memory_space<vmem>>, vector<2x32xf32>
    %523 = vector.shape_cast %511 : vector<2x1xi1> to vector<2x1xi1>
    %524 = vector.broadcast %523 : vector<2x1xi1> to vector<2x32xi1>
    %525 = arith.select %524, %499, %522 : vector<2x32xi1>, vector<2x32xf32>
    %c0_245 = arith.constant 0 : index
    %c0_246 = arith.constant 0 : index
    %526 = vector.load %arg11[%c0_245, %c0_246] : memref<2x32xf32, #tpu.memory_space<vmem>>, vector<2x32xf32>
    tpu.vector_store %arg11[%c0_245, %c0_246], %525 {strides = array<i32>} : memref<2x32xf32, #tpu.memory_space<vmem>>, vector<2x32xf32>,
    %c0_247 = arith.constant 0 : index
    %c0_248 = arith.constant 0 : index
    %527 = vector.load %arg10[%c0_247, %c0_248] : memref<2x32xf32, #tpu.memory_space<vmem>>, vector<2x32xf32>
    %528 = vector.shape_cast %511 : vector<2x1xi1> to vector<2x1xi1>
    %529 = vector.broadcast %528 : vector<2x1xi1> to vector<2x32xi1>
    %530 = arith.select %529, %501, %527 : vector<2x32xi1>, vector<2x32xf32>
    %c0_249 = arith.constant 0 : index
    %c0_250 = arith.constant 0 : index
    %531 = vector.load %arg10[%c0_249, %c0_250] : memref<2x32xf32, #tpu.memory_space<vmem>>, vector<2x32xf32>
    tpu.vector_store %arg10[%c0_249, %c0_250], %530 {strides = array<i32>} : memref<2x32xf32, #tpu.memory_space<vmem>>, vector<2x32xf32>,
    %c0_251 = arith.constant 0 : index
    %c0_252 = arith.constant 0 : index
    %532 = vector.load %arg8[%c0_251, %c0_252] : memref<2x32xf32, #tpu.memory_space<vmem>>, vector<2x32xf32>
    %c0_253 = arith.constant 0 : index
    %533 = arith.index_cast %c4_i32 : i32 to index
    %c0_254 = arith.constant 0 : index
    %534 = vector.load %arg6[%c0_253, %533, %c0_254] : memref<2x8x32xf32, #tpu.memory_space<vmem>>, vector<2x1x32xf32>
    %535 = vector.shape_cast %534 : vector<2x1x32xf32> to vector<2x32xf32>
    %536 = vector.shape_cast %532 : vector<2x32xf32> to vector<2x1x32xf32>
    tpu.vector_store %arg6[%c0_253, %533, %c0_254], %536 {strides = array<i32>} : memref<2x8x32xf32, #tpu.memory_space<vmem>>, vector<2x1x32xf32>,
    %c0_255 = arith.constant 0 : index
    %c0_256 = arith.constant 0 : index
    %537 = vector.load %arg10[%c0_255, %c0_256] : memref<2x32xf32, #tpu.memory_space<vmem>>, vector<2x32xf32>
    %c0_257 = arith.constant 0 : index
    %538 = arith.index_cast %435 : i32 to index
    %c0_258 = arith.constant 0 : index
    %539 = vector.load %arg7[%c0_257, %538, %c0_258] : memref<2x8x32xf32, #tpu.memory_space<vmem>>, vector<2x1x32xf32>
    %540 = vector.shape_cast %539 : vector<2x1x32xf32> to vector<2x32xf32>
    %541 = vector.shape_cast %537 : vector<2x32xf32> to vector<2x1x32xf32>
    tpu.vector_store %arg7[%c0_257, %538, %c0_258], %541 {strides = array<i32>} : memref<2x8x32xf32, #tpu.memory_space<vmem>>, vector<2x1x32xf32>,
    %c5_i32 = arith.constant 5 : i32
    %c7_i32_259 = arith.constant 7 : i32
    %542 = arith.subi %c7_i32_259, %c5_i32 : i32
    %c0_260 = arith.constant 0 : index
    %543 = arith.index_cast %c5_i32 : i32 to index
    %c0_261 = arith.constant 0 : index
    %544 = vector.load %arg1[%c0_260, %543, %c0_261] : memref<2x8x128xf32, #tpu.memory_space<vmem>>, vector<2x1x128xf32>
    %545 = vector.shape_cast %544 : vector<2x1x128xf32> to vector<2x128xf32>
    %c0_262 = arith.constant 0 : index
    %c0_263 = arith.constant 0 : index
    %546 = vector.load %arg8[%c0_262, %c0_263] : memref<2x32xf32, #tpu.memory_space<vmem>>, vector<2x32xf32>
    %547 = arith.truncf %546 : vector<2x32xf32> to vector<2x32xbf16>
    %cst_264 = arith.constant dense<0.000000e+00> : vector<2x128xf32>
    %548 = tpu.matmul %547, %4, %cst_264 {dimension_numbers = #tpu.dot_dimension_numbers<[1], [0], [0], [1], [0, 0, 1, 1], [], []>} : vector<2x32xbf16>, vector<32x128xbf16>, vector<2x128xf32> -> vector<2x128xf32>
    %549 = arith.addf %545, %548 : vector<2x128xf32>
    %c0_265 = arith.constant 0 : index
    %550 = arith.index_cast %542 : i32 to index
    %c0_266 = arith.constant 0 : index
    %551 = vector.load %arg2[%c0_265, %550, %c0_266] : memref<2x8x128xf32, #tpu.memory_space<vmem>>, vector<2x1x128xf32>
    %552 = vector.shape_cast %551 : vector<2x1x128xf32> to vector<2x128xf32>
    %c0_267 = arith.constant 0 : index
    %c0_268 = arith.constant 0 : index
    %553 = vector.load %arg10[%c0_267, %c0_268] : memref<2x32xf32, #tpu.memory_space<vmem>>, vector<2x32xf32>
    %554 = arith.truncf %553 : vector<2x32xf32> to vector<2x32xbf16>
    %cst_269 = arith.constant dense<0.000000e+00> : vector<2x128xf32>
    %555 = tpu.matmul %554, %6, %cst_269 {dimension_numbers = #tpu.dot_dimension_numbers<[1], [0], [0], [1], [0, 0, 1, 1], [], []>} : vector<2x32xbf16>, vector<32x128xbf16>, vector<2x128xf32> -> vector<2x128xf32>
    %556 = arith.addf %552, %555 : vector<2x128xf32>
    %c0_270 = arith.constant 0 : index
    %c0_271 = arith.constant 0 : index
    %557 = vector.load %arg9[%c0_270, %c0_271] : memref<2x32xf32, #tpu.memory_space<vmem>>, vector<2x32xf32>
    %558 = vector.extract_strided_slice %549 {offsets = [0, 0], sizes = [2, 32], strides = [1, 1]} : vector<2x128xf32> to vector<2x32xf32>
    %559 = arith.negf %558 : vector<2x32xf32>
    %560 = math.exp %559 : vector<2x32xf32>
    %cst_272 = arith.constant 1.000000e+00 : f32
    %561 = vector.broadcast %cst_272 : f32 to vector<2x32xf32>
    %562 = arith.addf %561, %560 : vector<2x32xf32>
    %563 = arith.divf %561, %562 : vector<2x32xf32>
    %564 = vector.extract_strided_slice %549 {offsets = [0, 32], sizes = [2, 32], strides = [1, 1]} : vector<2x128xf32> to vector<2x32xf32>
    %565 = arith.negf %564 : vector<2x32xf32>
    %566 = math.exp %565 : vector<2x32xf32>
    %cst_273 = arith.constant 1.000000e+00 : f32
    %567 = vector.broadcast %cst_273 : f32 to vector<2x32xf32>
    %568 = arith.addf %567, %566 : vector<2x32xf32>
    %569 = arith.divf %567, %568 : vector<2x32xf32>
    %570 = vector.extract_strided_slice %549 {offsets = [0, 64], sizes = [2, 32], strides = [1, 1]} : vector<2x128xf32> to vector<2x32xf32>
    %571 = math.tanh %570 : vector<2x32xf32>
    %572 = vector.extract_strided_slice %549 {offsets = [0, 96], sizes = [2, 32], strides = [1, 1]} : vector<2x128xf32> to vector<2x32xf32>
    %573 = arith.negf %572 : vector<2x32xf32>
    %574 = math.exp %573 : vector<2x32xf32>
    %cst_274 = arith.constant 1.000000e+00 : f32
    %575 = vector.broadcast %cst_274 : f32 to vector<2x32xf32>
    %576 = arith.addf %575, %574 : vector<2x32xf32>
    %577 = arith.divf %575, %576 : vector<2x32xf32>
    %578 = arith.mulf %569, %557 : vector<2x32xf32>
    %579 = arith.mulf %563, %571 : vector<2x32xf32>
    %580 = arith.addf %578, %579 : vector<2x32xf32>
    %581 = math.tanh %580 : vector<2x32xf32>
    %582 = arith.mulf %577, %581 : vector<2x32xf32>
    %c0_275 = arith.constant 0 : index
    %c0_276 = arith.constant 0 : index
    %583 = vector.load %arg11[%c0_275, %c0_276] : memref<2x32xf32, #tpu.memory_space<vmem>>, vector<2x32xf32>
    %584 = vector.extract_strided_slice %556 {offsets = [0, 0], sizes = [2, 32], strides = [1, 1]} : vector<2x128xf32> to vector<2x32xf32>
    %585 = arith.negf %584 : vector<2x32xf32>
    %586 = math.exp %585 : vector<2x32xf32>
    %cst_277 = arith.constant 1.000000e+00 : f32
    %587 = vector.broadcast %cst_277 : f32 to vector<2x32xf32>
    %588 = arith.addf %587, %586 : vector<2x32xf32>
    %589 = arith.divf %587, %588 : vector<2x32xf32>
    %590 = vector.extract_strided_slice %556 {offsets = [0, 32], sizes = [2, 32], strides = [1, 1]} : vector<2x128xf32> to vector<2x32xf32>
    %591 = arith.negf %590 : vector<2x32xf32>
    %592 = math.exp %591 : vector<2x32xf32>
    %cst_278 = arith.constant 1.000000e+00 : f32
    %593 = vector.broadcast %cst_278 : f32 to vector<2x32xf32>
    %594 = arith.addf %593, %592 : vector<2x32xf32>
    %595 = arith.divf %593, %594 : vector<2x32xf32>
    %596 = vector.extract_strided_slice %556 {offsets = [0, 64], sizes = [2, 32], strides = [1, 1]} : vector<2x128xf32> to vector<2x32xf32>
    %597 = math.tanh %596 : vector<2x32xf32>
    %598 = vector.extract_strided_slice %556 {offsets = [0, 96], sizes = [2, 32], strides = [1, 1]} : vector<2x128xf32> to vector<2x32xf32>
    %599 = arith.negf %598 : vector<2x32xf32>
    %600 = math.exp %599 : vector<2x32xf32>
    %cst_279 = arith.constant 1.000000e+00 : f32
    %601 = vector.broadcast %cst_279 : f32 to vector<2x32xf32>
    %602 = arith.addf %601, %600 : vector<2x32xf32>
    %603 = arith.divf %601, %602 : vector<2x32xf32>
    %604 = arith.mulf %595, %583 : vector<2x32xf32>
    %605 = arith.mulf %589, %597 : vector<2x32xf32>
    %606 = arith.addf %604, %605 : vector<2x32xf32>
    %607 = math.tanh %606 : vector<2x32xf32>
    %608 = arith.mulf %603, %607 : vector<2x32xf32>
    %c0_280 = arith.constant 0 : index
    %609 = arith.index_cast %c5_i32 : i32 to index
    %c0_281 = arith.constant 0 : index
    %610 = vector.load %arg3[%c0_280, %609, %c0_281] : memref<2x8x1xf32, #tpu.memory_space<vmem>>, vector<2x1x1xf32>
    %611 = vector.shape_cast %610 : vector<2x1x1xf32> to vector<2x1xf32>
    %cst_282 = arith.constant 0.000000e+00 : f32
    %612 = vector.broadcast %cst_282 : f32 to vector<2x1xf32>
    %613 = arith.cmpf ogt, %611, %612 : vector<2x1xf32>
    %c0_283 = arith.constant 0 : index
    %614 = arith.index_cast %542 : i32 to index
    %c0_284 = arith.constant 0 : index
    %615 = vector.load %arg4[%c0_283, %614, %c0_284] : memref<2x8x1xf32, #tpu.memory_space<vmem>>, vector<2x1x1xf32>
    %616 = vector.shape_cast %615 : vector<2x1x1xf32> to vector<2x1xf32>
    %cst_285 = arith.constant 0.000000e+00 : f32
    %617 = vector.broadcast %cst_285 : f32 to vector<2x1xf32>
    %618 = arith.cmpf ogt, %616, %617 : vector<2x1xf32>
    %c0_286 = arith.constant 0 : index
    %c0_287 = arith.constant 0 : index
    %619 = vector.load %arg9[%c0_286, %c0_287] : memref<2x32xf32, #tpu.memory_space<vmem>>, vector<2x32xf32>
    %620 = vector.shape_cast %613 : vector<2x1xi1> to vector<2x1xi1>
    %621 = vector.broadcast %620 : vector<2x1xi1> to vector<2x32xi1>
    %622 = arith.select %621, %580, %619 : vector<2x32xi1>, vector<2x32xf32>
    %c0_288 = arith.constant 0 : index
    %c0_289 = arith.constant 0 : index
    %623 = vector.load %arg9[%c0_288, %c0_289] : memref<2x32xf32, #tpu.memory_space<vmem>>, vector<2x32xf32>
    tpu.vector_store %arg9[%c0_288, %c0_289], %622 {strides = array<i32>} : memref<2x32xf32, #tpu.memory_space<vmem>>, vector<2x32xf32>,
    %c0_290 = arith.constant 0 : index
    %c0_291 = arith.constant 0 : index
    %624 = vector.load %arg8[%c0_290, %c0_291] : memref<2x32xf32, #tpu.memory_space<vmem>>, vector<2x32xf32>
    %625 = vector.shape_cast %613 : vector<2x1xi1> to vector<2x1xi1>
    %626 = vector.broadcast %625 : vector<2x1xi1> to vector<2x32xi1>
    %627 = arith.select %626, %582, %624 : vector<2x32xi1>, vector<2x32xf32>
    %c0_292 = arith.constant 0 : index
    %c0_293 = arith.constant 0 : index
    %628 = vector.load %arg8[%c0_292, %c0_293] : memref<2x32xf32, #tpu.memory_space<vmem>>, vector<2x32xf32>
    tpu.vector_store %arg8[%c0_292, %c0_293], %627 {strides = array<i32>} : memref<2x32xf32, #tpu.memory_space<vmem>>, vector<2x32xf32>,
    %c0_294 = arith.constant 0 : index
    %c0_295 = arith.constant 0 : index
    %629 = vector.load %arg11[%c0_294, %c0_295] : memref<2x32xf32, #tpu.memory_space<vmem>>, vector<2x32xf32>
    %630 = vector.shape_cast %618 : vector<2x1xi1> to vector<2x1xi1>
    %631 = vector.broadcast %630 : vector<2x1xi1> to vector<2x32xi1>
    %632 = arith.select %631, %606, %629 : vector<2x32xi1>, vector<2x32xf32>
    %c0_296 = arith.constant 0 : index
    %c0_297 = arith.constant 0 : index
    %633 = vector.load %arg11[%c0_296, %c0_297] : memref<2x32xf32, #tpu.memory_space<vmem>>, vector<2x32xf32>
    tpu.vector_store %arg11[%c0_296, %c0_297], %632 {strides = array<i32>} : memref<2x32xf32, #tpu.memory_space<vmem>>, vector<2x32xf32>,
    %c0_298 = arith.constant 0 : index
    %c0_299 = arith.constant 0 : index
    %634 = vector.load %arg10[%c0_298, %c0_299] : memref<2x32xf32, #tpu.memory_space<vmem>>, vector<2x32xf32>
    %635 = vector.shape_cast %618 : vector<2x1xi1> to vector<2x1xi1>
    %636 = vector.broadcast %635 : vector<2x1xi1> to vector<2x32xi1>
    %637 = arith.select %636, %608, %634 : vector<2x32xi1>, vector<2x32xf32>
    %c0_300 = arith.constant 0 : index
    %c0_301 = arith.constant 0 : index
    %638 = vector.load %arg10[%c0_300, %c0_301] : memref<2x32xf32, #tpu.memory_space<vmem>>, vector<2x32xf32>
    tpu.vector_store %arg10[%c0_300, %c0_301], %637 {strides = array<i32>} : memref<2x32xf32, #tpu.memory_space<vmem>>, vector<2x32xf32>,
    %c0_302 = arith.constant 0 : index
    %c0_303 = arith.constant 0 : index
    %639 = vector.load %arg8[%c0_302, %c0_303] : memref<2x32xf32, #tpu.memory_space<vmem>>, vector<2x32xf32>
    %c0_304 = arith.constant 0 : index
    %640 = arith.index_cast %c5_i32 : i32 to index
    %c0_305 = arith.constant 0 : index
    %641 = vector.load %arg6[%c0_304, %640, %c0_305] : memref<2x8x32xf32, #tpu.memory_space<vmem>>, vector<2x1x32xf32>
    %642 = vector.shape_cast %641 : vector<2x1x32xf32> to vector<2x32xf32>
    %643 = vector.shape_cast %639 : vector<2x32xf32> to vector<2x1x32xf32>
    tpu.vector_store %arg6[%c0_304, %640, %c0_305], %643 {strides = array<i32>} : memref<2x8x32xf32, #tpu.memory_space<vmem>>, vector<2x1x32xf32>,
    %c0_306 = arith.constant 0 : index
    %c0_307 = arith.constant 0 : index
    %644 = vector.load %arg10[%c0_306, %c0_307] : memref<2x32xf32, #tpu.memory_space<vmem>>, vector<2x32xf32>
    %c0_308 = arith.constant 0 : index
    %645 = arith.index_cast %542 : i32 to index
    %c0_309 = arith.constant 0 : index
    %646 = vector.load %arg7[%c0_308, %645, %c0_309] : memref<2x8x32xf32, #tpu.memory_space<vmem>>, vector<2x1x32xf32>
    %647 = vector.shape_cast %646 : vector<2x1x32xf32> to vector<2x32xf32>
    %648 = vector.shape_cast %644 : vector<2x32xf32> to vector<2x1x32xf32>
    tpu.vector_store %arg7[%c0_308, %645, %c0_309], %648 {strides = array<i32>} : memref<2x8x32xf32, #tpu.memory_space<vmem>>, vector<2x1x32xf32>,
    %c6_i32 = arith.constant 6 : i32
    %c7_i32_310 = arith.constant 7 : i32
    %649 = arith.subi %c7_i32_310, %c6_i32 : i32
    %c0_311 = arith.constant 0 : index
    %650 = arith.index_cast %c6_i32 : i32 to index
    %c0_312 = arith.constant 0 : index
    %651 = vector.load %arg1[%c0_311, %650, %c0_312] : memref<2x8x128xf32, #tpu.memory_space<vmem>>, vector<2x1x128xf32>
    %652 = vector.shape_cast %651 : vector<2x1x128xf32> to vector<2x128xf32>
    %c0_313 = arith.constant 0 : index
    %c0_314 = arith.constant 0 : index
    %653 = vector.load %arg8[%c0_313, %c0_314] : memref<2x32xf32, #tpu.memory_space<vmem>>, vector<2x32xf32>
    %654 = arith.truncf %653 : vector<2x32xf32> to vector<2x32xbf16>
    %cst_315 = arith.constant dense<0.000000e+00> : vector<2x128xf32>
    %655 = tpu.matmul %654, %4, %cst_315 {dimension_numbers = #tpu.dot_dimension_numbers<[1], [0], [0], [1], [0, 0, 1, 1], [], []>} : vector<2x32xbf16>, vector<32x128xbf16>, vector<2x128xf32> -> vector<2x128xf32>
    %656 = arith.addf %652, %655 : vector<2x128xf32>
    %c0_316 = arith.constant 0 : index
    %657 = arith.index_cast %649 : i32 to index
    %c0_317 = arith.constant 0 : index
    %658 = vector.load %arg2[%c0_316, %657, %c0_317] : memref<2x8x128xf32, #tpu.memory_space<vmem>>, vector<2x1x128xf32>
    %659 = vector.shape_cast %658 : vector<2x1x128xf32> to vector<2x128xf32>
    %c0_318 = arith.constant 0 : index
    %c0_319 = arith.constant 0 : index
    %660 = vector.load %arg10[%c0_318, %c0_319] : memref<2x32xf32, #tpu.memory_space<vmem>>, vector<2x32xf32>
    %661 = arith.truncf %660 : vector<2x32xf32> to vector<2x32xbf16>
    %cst_320 = arith.constant dense<0.000000e+00> : vector<2x128xf32>
    %662 = tpu.matmul %661, %6, %cst_320 {dimension_numbers = #tpu.dot_dimension_numbers<[1], [0], [0], [1], [0, 0, 1, 1], [], []>} : vector<2x32xbf16>, vector<32x128xbf16>, vector<2x128xf32> -> vector<2x128xf32>
    %663 = arith.addf %659, %662 : vector<2x128xf32>
    %c0_321 = arith.constant 0 : index
    %c0_322 = arith.constant 0 : index
    %664 = vector.load %arg9[%c0_321, %c0_322] : memref<2x32xf32, #tpu.memory_space<vmem>>, vector<2x32xf32>
    %665 = vector.extract_strided_slice %656 {offsets = [0, 0], sizes = [2, 32], strides = [1, 1]} : vector<2x128xf32> to vector<2x32xf32>
    %666 = arith.negf %665 : vector<2x32xf32>
    %667 = math.exp %666 : vector<2x32xf32>
    %cst_323 = arith.constant 1.000000e+00 : f32
    %668 = vector.broadcast %cst_323 : f32 to vector<2x32xf32>
    %669 = arith.addf %668, %667 : vector<2x32xf32>
    %670 = arith.divf %668, %669 : vector<2x32xf32>
    %671 = vector.extract_strided_slice %656 {offsets = [0, 32], sizes = [2, 32], strides = [1, 1]} : vector<2x128xf32> to vector<2x32xf32>
    %672 = arith.negf %671 : vector<2x32xf32>
    %673 = math.exp %672 : vector<2x32xf32>
    %cst_324 = arith.constant 1.000000e+00 : f32
    %674 = vector.broadcast %cst_324 : f32 to vector<2x32xf32>
    %675 = arith.addf %674, %673 : vector<2x32xf32>
    %676 = arith.divf %674, %675 : vector<2x32xf32>
    %677 = vector.extract_strided_slice %656 {offsets = [0, 64], sizes = [2, 32], strides = [1, 1]} : vector<2x128xf32> to vector<2x32xf32>
    %678 = math.tanh %677 : vector<2x32xf32>
    %679 = vector.extract_strided_slice %656 {offsets = [0, 96], sizes = [2, 32], strides = [1, 1]} : vector<2x128xf32> to vector<2x32xf32>
    %680 = arith.negf %679 : vector<2x32xf32>
    %681 = math.exp %680 : vector<2x32xf32>
    %cst_325 = arith.constant 1.000000e+00 : f32
    %682 = vector.broadcast %cst_325 : f32 to vector<2x32xf32>
    %683 = arith.addf %682, %681 : vector<2x32xf32>
    %684 = arith.divf %682, %683 : vector<2x32xf32>
    %685 = arith.mulf %676, %664 : vector<2x32xf32>
    %686 = arith.mulf %670, %678 : vector<2x32xf32>
    %687 = arith.addf %685, %686 : vector<2x32xf32>
    %688 = math.tanh %687 : vector<2x32xf32>
    %689 = arith.mulf %684, %688 : vector<2x32xf32>
    %c0_326 = arith.constant 0 : index
    %c0_327 = arith.constant 0 : index
    %690 = vector.load %arg11[%c0_326, %c0_327] : memref<2x32xf32, #tpu.memory_space<vmem>>, vector<2x32xf32>
    %691 = vector.extract_strided_slice %663 {offsets = [0, 0], sizes = [2, 32], strides = [1, 1]} : vector<2x128xf32> to vector<2x32xf32>
    %692 = arith.negf %691 : vector<2x32xf32>
    %693 = math.exp %692 : vector<2x32xf32>
    %cst_328 = arith.constant 1.000000e+00 : f32
    %694 = vector.broadcast %cst_328 : f32 to vector<2x32xf32>
    %695 = arith.addf %694, %693 : vector<2x32xf32>
    %696 = arith.divf %694, %695 : vector<2x32xf32>
    %697 = vector.extract_strided_slice %663 {offsets = [0, 32], sizes = [2, 32], strides = [1, 1]} : vector<2x128xf32> to vector<2x32xf32>
    %698 = arith.negf %697 : vector<2x32xf32>
    %699 = math.exp %698 : vector<2x32xf32>
    %cst_329 = arith.constant 1.000000e+00 : f32
    %700 = vector.broadcast %cst_329 : f32 to vector<2x32xf32>
    %701 = arith.addf %700, %699 : vector<2x32xf32>
    %702 = arith.divf %700, %701 : vector<2x32xf32>
    %703 = vector.extract_strided_slice %663 {offsets = [0, 64], sizes = [2, 32], strides = [1, 1]} : vector<2x128xf32> to vector<2x32xf32>
    %704 = math.tanh %703 : vector<2x32xf32>
    %705 = vector.extract_strided_slice %663 {offsets = [0, 96], sizes = [2, 32], strides = [1, 1]} : vector<2x128xf32> to vector<2x32xf32>
    %706 = arith.negf %705 : vector<2x32xf32>
    %707 = math.exp %706 : vector<2x32xf32>
    %cst_330 = arith.constant 1.000000e+00 : f32
    %708 = vector.broadcast %cst_330 : f32 to vector<2x32xf32>
    %709 = arith.addf %708, %707 : vector<2x32xf32>
    %710 = arith.divf %708, %709 : vector<2x32xf32>
    %711 = arith.mulf %702, %690 : vector<2x32xf32>
    %712 = arith.mulf %696, %704 : vector<2x32xf32>
    %713 = arith.addf %711, %712 : vector<2x32xf32>
    %714 = math.tanh %713 : vector<2x32xf32>
    %715 = arith.mulf %710, %714 : vector<2x32xf32>
    %c0_331 = arith.constant 0 : index
    %716 = arith.index_cast %c6_i32 : i32 to index
    %c0_332 = arith.constant 0 : index
    %717 = vector.load %arg3[%c0_331, %716, %c0_332] : memref<2x8x1xf32, #tpu.memory_space<vmem>>, vector<2x1x1xf32>
    %718 = vector.shape_cast %717 : vector<2x1x1xf32> to vector<2x1xf32>
    %cst_333 = arith.constant 0.000000e+00 : f32
    %719 = vector.broadcast %cst_333 : f32 to vector<2x1xf32>
    %720 = arith.cmpf ogt, %718, %719 : vector<2x1xf32>
    %c0_334 = arith.constant 0 : index
    %721 = arith.index_cast %649 : i32 to index
    %c0_335 = arith.constant 0 : index
    %722 = vector.load %arg4[%c0_334, %721, %c0_335] : memref<2x8x1xf32, #tpu.memory_space<vmem>>, vector<2x1x1xf32>
    %723 = vector.shape_cast %722 : vector<2x1x1xf32> to vector<2x1xf32>
    %cst_336 = arith.constant 0.000000e+00 : f32
    %724 = vector.broadcast %cst_336 : f32 to vector<2x1xf32>
    %725 = arith.cmpf ogt, %723, %724 : vector<2x1xf32>
    %c0_337 = arith.constant 0 : index
    %c0_338 = arith.constant 0 : index
    %726 = vector.load %arg9[%c0_337, %c0_338] : memref<2x32xf32, #tpu.memory_space<vmem>>, vector<2x32xf32>
    %727 = vector.shape_cast %720 : vector<2x1xi1> to vector<2x1xi1>
    %728 = vector.broadcast %727 : vector<2x1xi1> to vector<2x32xi1>
    %729 = arith.select %728, %687, %726 : vector<2x32xi1>, vector<2x32xf32>
    %c0_339 = arith.constant 0 : index
    %c0_340 = arith.constant 0 : index
    %730 = vector.load %arg9[%c0_339, %c0_340] : memref<2x32xf32, #tpu.memory_space<vmem>>, vector<2x32xf32>
    tpu.vector_store %arg9[%c0_339, %c0_340], %729 {strides = array<i32>} : memref<2x32xf32, #tpu.memory_space<vmem>>, vector<2x32xf32>,
    %c0_341 = arith.constant 0 : index
    %c0_342 = arith.constant 0 : index
    %731 = vector.load %arg8[%c0_341, %c0_342] : memref<2x32xf32, #tpu.memory_space<vmem>>, vector<2x32xf32>
    %732 = vector.shape_cast %720 : vector<2x1xi1> to vector<2x1xi1>
    %733 = vector.broadcast %732 : vector<2x1xi1> to vector<2x32xi1>
    %734 = arith.select %733, %689, %731 : vector<2x32xi1>, vector<2x32xf32>
    %c0_343 = arith.constant 0 : index
    %c0_344 = arith.constant 0 : index
    %735 = vector.load %arg8[%c0_343, %c0_344] : memref<2x32xf32, #tpu.memory_space<vmem>>, vector<2x32xf32>
    tpu.vector_store %arg8[%c0_343, %c0_344], %734 {strides = array<i32>} : memref<2x32xf32, #tpu.memory_space<vmem>>, vector<2x32xf32>,
    %c0_345 = arith.constant 0 : index
    %c0_346 = arith.constant 0 : index
    %736 = vector.load %arg11[%c0_345, %c0_346] : memref<2x32xf32, #tpu.memory_space<vmem>>, vector<2x32xf32>
    %737 = vector.shape_cast %725 : vector<2x1xi1> to vector<2x1xi1>
    %738 = vector.broadcast %737 : vector<2x1xi1> to vector<2x32xi1>
    %739 = arith.select %738, %713, %736 : vector<2x32xi1>, vector<2x32xf32>
    %c0_347 = arith.constant 0 : index
    %c0_348 = arith.constant 0 : index
    %740 = vector.load %arg11[%c0_347, %c0_348] : memref<2x32xf32, #tpu.memory_space<vmem>>, vector<2x32xf32>
    tpu.vector_store %arg11[%c0_347, %c0_348], %739 {strides = array<i32>} : memref<2x32xf32, #tpu.memory_space<vmem>>, vector<2x32xf32>,
    %c0_349 = arith.constant 0 : index
    %c0_350 = arith.constant 0 : index
    %741 = vector.load %arg10[%c0_349, %c0_350] : memref<2x32xf32, #tpu.memory_space<vmem>>, vector<2x32xf32>
    %742 = vector.shape_cast %725 : vector<2x1xi1> to vector<2x1xi1>
    %743 = vector.broadcast %742 : vector<2x1xi1> to vector<2x32xi1>
    %744 = arith.select %743, %715, %741 : vector<2x32xi1>, vector<2x32xf32>
    %c0_351 = arith.constant 0 : index
    %c0_352 = arith.constant 0 : index
    %745 = vector.load %arg10[%c0_351, %c0_352] : memref<2x32xf32, #tpu.memory_space<vmem>>, vector<2x32xf32>
    tpu.vector_store %arg10[%c0_351, %c0_352], %744 {strides = array<i32>} : memref<2x32xf32, #tpu.memory_space<vmem>>, vector<2x32xf32>,
    %c0_353 = arith.constant 0 : index
    %c0_354 = arith.constant 0 : index
    %746 = vector.load %arg8[%c0_353, %c0_354] : memref<2x32xf32, #tpu.memory_space<vmem>>, vector<2x32xf32>
    %c0_355 = arith.constant 0 : index
    %747 = arith.index_cast %c6_i32 : i32 to index
    %c0_356 = arith.constant 0 : index
    %748 = vector.load %arg6[%c0_355, %747, %c0_356] : memref<2x8x32xf32, #tpu.memory_space<vmem>>, vector<2x1x32xf32>
    %749 = vector.shape_cast %748 : vector<2x1x32xf32> to vector<2x32xf32>
    %750 = vector.shape_cast %746 : vector<2x32xf32> to vector<2x1x32xf32>
    tpu.vector_store %arg6[%c0_355, %747, %c0_356], %750 {strides = array<i32>} : memref<2x8x32xf32, #tpu.memory_space<vmem>>, vector<2x1x32xf32>,
    %c0_357 = arith.constant 0 : index
    %c0_358 = arith.constant 0 : index
    %751 = vector.load %arg10[%c0_357, %c0_358] : memref<2x32xf32, #tpu.memory_space<vmem>>, vector<2x32xf32>
    %c0_359 = arith.constant 0 : index
    %752 = arith.index_cast %649 : i32 to index
    %c0_360 = arith.constant 0 : index
    %753 = vector.load %arg7[%c0_359, %752, %c0_360] : memref<2x8x32xf32, #tpu.memory_space<vmem>>, vector<2x1x32xf32>
    %754 = vector.shape_cast %753 : vector<2x1x32xf32> to vector<2x32xf32>
    %755 = vector.shape_cast %751 : vector<2x32xf32> to vector<2x1x32xf32>
    tpu.vector_store %arg7[%c0_359, %752, %c0_360], %755 {strides = array<i32>} : memref<2x8x32xf32, #tpu.memory_space<vmem>>, vector<2x1x32xf32>,
    %c7_i32_361 = arith.constant 7 : i32
    %c7_i32_362 = arith.constant 7 : i32
    %756 = arith.subi %c7_i32_362, %c7_i32_361 : i32
    %c0_363 = arith.constant 0 : index
    %757 = arith.index_cast %c7_i32_361 : i32 to index
    %c0_364 = arith.constant 0 : index
    %758 = vector.load %arg1[%c0_363, %757, %c0_364] : memref<2x8x128xf32, #tpu.memory_space<vmem>>, vector<2x1x128xf32>
    %759 = vector.shape_cast %758 : vector<2x1x128xf32> to vector<2x128xf32>
    %c0_365 = arith.constant 0 : index
    %c0_366 = arith.constant 0 : index
    %760 = vector.load %arg8[%c0_365, %c0_366] : memref<2x32xf32, #tpu.memory_space<vmem>>, vector<2x32xf32>
    %761 = arith.truncf %760 : vector<2x32xf32> to vector<2x32xbf16>
    %cst_367 = arith.constant dense<0.000000e+00> : vector<2x128xf32>
    %762 = tpu.matmul %761, %4, %cst_367 {dimension_numbers = #tpu.dot_dimension_numbers<[1], [0], [0], [1], [0, 0, 1, 1], [], []>} : vector<2x32xbf16>, vector<32x128xbf16>, vector<2x128xf32> -> vector<2x128xf32>
    %763 = arith.addf %759, %762 : vector<2x128xf32>
    %c0_368 = arith.constant 0 : index
    %764 = arith.index_cast %756 : i32 to index
    %c0_369 = arith.constant 0 : index
    %765 = vector.load %arg2[%c0_368, %764, %c0_369] : memref<2x8x128xf32, #tpu.memory_space<vmem>>, vector<2x1x128xf32>
    %766 = vector.shape_cast %765 : vector<2x1x128xf32> to vector<2x128xf32>
    %c0_370 = arith.constant 0 : index
    %c0_371 = arith.constant 0 : index
    %767 = vector.load %arg10[%c0_370, %c0_371] : memref<2x32xf32, #tpu.memory_space<vmem>>, vector<2x32xf32>
    %768 = arith.truncf %767 : vector<2x32xf32> to vector<2x32xbf16>
    %cst_372 = arith.constant dense<0.000000e+00> : vector<2x128xf32>
    %769 = tpu.matmul %768, %6, %cst_372 {dimension_numbers = #tpu.dot_dimension_numbers<[1], [0], [0], [1], [0, 0, 1, 1], [], []>} : vector<2x32xbf16>, vector<32x128xbf16>, vector<2x128xf32> -> vector<2x128xf32>
    %770 = arith.addf %766, %769 : vector<2x128xf32>
    %c0_373 = arith.constant 0 : index
    %c0_374 = arith.constant 0 : index
    %771 = vector.load %arg9[%c0_373, %c0_374] : memref<2x32xf32, #tpu.memory_space<vmem>>, vector<2x32xf32>
    %772 = vector.extract_strided_slice %763 {offsets = [0, 0], sizes = [2, 32], strides = [1, 1]} : vector<2x128xf32> to vector<2x32xf32>
    %773 = arith.negf %772 : vector<2x32xf32>
    %774 = math.exp %773 : vector<2x32xf32>
    %cst_375 = arith.constant 1.000000e+00 : f32
    %775 = vector.broadcast %cst_375 : f32 to vector<2x32xf32>
    %776 = arith.addf %775, %774 : vector<2x32xf32>
    %777 = arith.divf %775, %776 : vector<2x32xf32>
    %778 = vector.extract_strided_slice %763 {offsets = [0, 32], sizes = [2, 32], strides = [1, 1]} : vector<2x128xf32> to vector<2x32xf32>
    %779 = arith.negf %778 : vector<2x32xf32>
    %780 = math.exp %779 : vector<2x32xf32>
    %cst_376 = arith.constant 1.000000e+00 : f32
    %781 = vector.broadcast %cst_376 : f32 to vector<2x32xf32>
    %782 = arith.addf %781, %780 : vector<2x32xf32>
    %783 = arith.divf %781, %782 : vector<2x32xf32>
    %784 = vector.extract_strided_slice %763 {offsets = [0, 64], sizes = [2, 32], strides = [1, 1]} : vector<2x128xf32> to vector<2x32xf32>
    %785 = math.tanh %784 : vector<2x32xf32>
    %786 = vector.extract_strided_slice %763 {offsets = [0, 96], sizes = [2, 32], strides = [1, 1]} : vector<2x128xf32> to vector<2x32xf32>
    %787 = arith.negf %786 : vector<2x32xf32>
    %788 = math.exp %787 : vector<2x32xf32>
    %cst_377 = arith.constant 1.000000e+00 : f32
    %789 = vector.broadcast %cst_377 : f32 to vector<2x32xf32>
    %790 = arith.addf %789, %788 : vector<2x32xf32>
    %791 = arith.divf %789, %790 : vector<2x32xf32>
    %792 = arith.mulf %783, %771 : vector<2x32xf32>
    %793 = arith.mulf %777, %785 : vector<2x32xf32>
    %794 = arith.addf %792, %793 : vector<2x32xf32>
    %795 = math.tanh %794 : vector<2x32xf32>
    %796 = arith.mulf %791, %795 : vector<2x32xf32>
    %c0_378 = arith.constant 0 : index
    %c0_379 = arith.constant 0 : index
    %797 = vector.load %arg11[%c0_378, %c0_379] : memref<2x32xf32, #tpu.memory_space<vmem>>, vector<2x32xf32>
    %798 = vector.extract_strided_slice %770 {offsets = [0, 0], sizes = [2, 32], strides = [1, 1]} : vector<2x128xf32> to vector<2x32xf32>
    %799 = arith.negf %798 : vector<2x32xf32>
    %800 = math.exp %799 : vector<2x32xf32>
    %cst_380 = arith.constant 1.000000e+00 : f32
    %801 = vector.broadcast %cst_380 : f32 to vector<2x32xf32>
    %802 = arith.addf %801, %800 : vector<2x32xf32>
    %803 = arith.divf %801, %802 : vector<2x32xf32>
    %804 = vector.extract_strided_slice %770 {offsets = [0, 32], sizes = [2, 32], strides = [1, 1]} : vector<2x128xf32> to vector<2x32xf32>
    %805 = arith.negf %804 : vector<2x32xf32>
    %806 = math.exp %805 : vector<2x32xf32>
    %cst_381 = arith.constant 1.000000e+00 : f32
    %807 = vector.broadcast %cst_381 : f32 to vector<2x32xf32>
    %808 = arith.addf %807, %806 : vector<2x32xf32>
    %809 = arith.divf %807, %808 : vector<2x32xf32>
    %810 = vector.extract_strided_slice %770 {offsets = [0, 64], sizes = [2, 32], strides = [1, 1]} : vector<2x128xf32> to vector<2x32xf32>
    %811 = math.tanh %810 : vector<2x32xf32>
    %812 = vector.extract_strided_slice %770 {offsets = [0, 96], sizes = [2, 32], strides = [1, 1]} : vector<2x128xf32> to vector<2x32xf32>
    %813 = arith.negf %812 : vector<2x32xf32>
    %814 = math.exp %813 : vector<2x32xf32>
    %cst_382 = arith.constant 1.000000e+00 : f32
    %815 = vector.broadcast %cst_382 : f32 to vector<2x32xf32>
    %816 = arith.addf %815, %814 : vector<2x32xf32>
    %817 = arith.divf %815, %816 : vector<2x32xf32>
    %818 = arith.mulf %809, %797 : vector<2x32xf32>
    %819 = arith.mulf %803, %811 : vector<2x32xf32>
    %820 = arith.addf %818, %819 : vector<2x32xf32>
    %821 = math.tanh %820 : vector<2x32xf32>
    %822 = arith.mulf %817, %821 : vector<2x32xf32>
    %c0_383 = arith.constant 0 : index
    %823 = arith.index_cast %c7_i32_361 : i32 to index
    %c0_384 = arith.constant 0 : index
    %824 = vector.load %arg3[%c0_383, %823, %c0_384] : memref<2x8x1xf32, #tpu.memory_space<vmem>>, vector<2x1x1xf32>
    %825 = vector.shape_cast %824 : vector<2x1x1xf32> to vector<2x1xf32>
    %cst_385 = arith.constant 0.000000e+00 : f32
    %826 = vector.broadcast %cst_385 : f32 to vector<2x1xf32>
    %827 = arith.cmpf ogt, %825, %826 : vector<2x1xf32>
    %c0_386 = arith.constant 0 : index
    %828 = arith.index_cast %756 : i32 to index
    %c0_387 = arith.constant 0 : index
    %829 = vector.load %arg4[%c0_386, %828, %c0_387] : memref<2x8x1xf32, #tpu.memory_space<vmem>>, vector<2x1x1xf32>
    %830 = vector.shape_cast %829 : vector<2x1x1xf32> to vector<2x1xf32>
    %cst_388 = arith.constant 0.000000e+00 : f32
    %831 = vector.broadcast %cst_388 : f32 to vector<2x1xf32>
    %832 = arith.cmpf ogt, %830, %831 : vector<2x1xf32>
    %c0_389 = arith.constant 0 : index
    %c0_390 = arith.constant 0 : index
    %833 = vector.load %arg9[%c0_389, %c0_390] : memref<2x32xf32, #tpu.memory_space<vmem>>, vector<2x32xf32>
    %834 = vector.shape_cast %827 : vector<2x1xi1> to vector<2x1xi1>
    %835 = vector.broadcast %834 : vector<2x1xi1> to vector<2x32xi1>
    %836 = arith.select %835, %794, %833 : vector<2x32xi1>, vector<2x32xf32>
    %c0_391 = arith.constant 0 : index
    %c0_392 = arith.constant 0 : index
    %837 = vector.load %arg9[%c0_391, %c0_392] : memref<2x32xf32, #tpu.memory_space<vmem>>, vector<2x32xf32>
    tpu.vector_store %arg9[%c0_391, %c0_392], %836 {strides = array<i32>} : memref<2x32xf32, #tpu.memory_space<vmem>>, vector<2x32xf32>,
    %c0_393 = arith.constant 0 : index
    %c0_394 = arith.constant 0 : index
    %838 = vector.load %arg8[%c0_393, %c0_394] : memref<2x32xf32, #tpu.memory_space<vmem>>, vector<2x32xf32>
    %839 = vector.shape_cast %827 : vector<2x1xi1> to vector<2x1xi1>
    %840 = vector.broadcast %839 : vector<2x1xi1> to vector<2x32xi1>
    %841 = arith.select %840, %796, %838 : vector<2x32xi1>, vector<2x32xf32>
    %c0_395 = arith.constant 0 : index
    %c0_396 = arith.constant 0 : index
    %842 = vector.load %arg8[%c0_395, %c0_396] : memref<2x32xf32, #tpu.memory_space<vmem>>, vector<2x32xf32>
    tpu.vector_store %arg8[%c0_395, %c0_396], %841 {strides = array<i32>} : memref<2x32xf32, #tpu.memory_space<vmem>>, vector<2x32xf32>,
    %c0_397 = arith.constant 0 : index
    %c0_398 = arith.constant 0 : index
    %843 = vector.load %arg11[%c0_397, %c0_398] : memref<2x32xf32, #tpu.memory_space<vmem>>, vector<2x32xf32>
    %844 = vector.shape_cast %832 : vector<2x1xi1> to vector<2x1xi1>
    %845 = vector.broadcast %844 : vector<2x1xi1> to vector<2x32xi1>
    %846 = arith.select %845, %820, %843 : vector<2x32xi1>, vector<2x32xf32>
    %c0_399 = arith.constant 0 : index
    %c0_400 = arith.constant 0 : index
    %847 = vector.load %arg11[%c0_399, %c0_400] : memref<2x32xf32, #tpu.memory_space<vmem>>, vector<2x32xf32>
    tpu.vector_store %arg11[%c0_399, %c0_400], %846 {strides = array<i32>} : memref<2x32xf32, #tpu.memory_space<vmem>>, vector<2x32xf32>,
    %c0_401 = arith.constant 0 : index
    %c0_402 = arith.constant 0 : index
    %848 = vector.load %arg10[%c0_401, %c0_402] : memref<2x32xf32, #tpu.memory_space<vmem>>, vector<2x32xf32>
    %849 = vector.shape_cast %832 : vector<2x1xi1> to vector<2x1xi1>
    %850 = vector.broadcast %849 : vector<2x1xi1> to vector<2x32xi1>
    %851 = arith.select %850, %822, %848 : vector<2x32xi1>, vector<2x32xf32>
    %c0_403 = arith.constant 0 : index
    %c0_404 = arith.constant 0 : index
    %852 = vector.load %arg10[%c0_403, %c0_404] : memref<2x32xf32, #tpu.memory_space<vmem>>, vector<2x32xf32>
    tpu.vector_store %arg10[%c0_403, %c0_404], %851 {strides = array<i32>} : memref<2x32xf32, #tpu.memory_space<vmem>>, vector<2x32xf32>,
    %c0_405 = arith.constant 0 : index
    %c0_406 = arith.constant 0 : index
    %853 = vector.load %arg8[%c0_405, %c0_406] : memref<2x32xf32, #tpu.memory_space<vmem>>, vector<2x32xf32>
    %c0_407 = arith.constant 0 : index
    %854 = arith.index_cast %c7_i32_361 : i32 to index
    %c0_408 = arith.constant 0 : index
    %855 = vector.load %arg6[%c0_407, %854, %c0_408] : memref<2x8x32xf32, #tpu.memory_space<vmem>>, vector<2x1x32xf32>
    %856 = vector.shape_cast %855 : vector<2x1x32xf32> to vector<2x32xf32>
    %857 = vector.shape_cast %853 : vector<2x32xf32> to vector<2x1x32xf32>
    tpu.vector_store %arg6[%c0_407, %854, %c0_408], %857 {strides = array<i32>} : memref<2x8x32xf32, #tpu.memory_space<vmem>>, vector<2x1x32xf32>,
    %c0_409 = arith.constant 0 : index
    %c0_410 = arith.constant 0 : index
    %858 = vector.load %arg10[%c0_409, %c0_410] : memref<2x32xf32, #tpu.memory_space<vmem>>, vector<2x32xf32>
    %c0_411 = arith.constant 0 : index
    %859 = arith.index_cast %756 : i32 to index
    %c0_412 = arith.constant 0 : index
    %860 = vector.load %arg7[%c0_411, %859, %c0_412] : memref<2x8x32xf32, #tpu.memory_space<vmem>>, vector<2x1x32xf32>
    %861 = vector.shape_cast %860 : vector<2x1x32xf32> to vector<2x32xf32>
    %862 = vector.shape_cast %858 : vector<2x32xf32> to vector<2x1x32xf32>
    tpu.vector_store %arg7[%c0_411, %859, %c0_412], %862 {strides = array<i32>} : memref<2x8x32xf32, #tpu.memory_space<vmem>>, vector<2x1x32xf32>,
    %c8_i32 = arith.constant 8 : i32
    return
  }
  func.func @transform_0(%arg0: i32) -> (i32, i32, i32) {
    %c0_i32 = arith.constant 0 : i32
    %c0_i32_0 = arith.constant 0 : i32
    %c0_i32_1 = arith.constant 0 : i32
    return %c0_i32, %arg0, %c0_i32_0 : i32, i32, i32
  }
  func.func @transform_1(%arg0: i32) -> (i32, i32, i32) {
    %c0_i32 = arith.constant 0 : i32
    %0 = arith.subi %c0_i32, %arg0 : i32
    %c0_i32_0 = arith.constant 0 : i32
    %c1_i32 = arith.constant 1 : i32
    %c0_i32_1 = arith.constant 0 : i32
    return %c0_i32_0, %0, %c1_i32 : i32, i32, i32
  }
  func.func @transform_2(%arg0: i32) -> (i32, i32, i32) {
    %c0_i32 = arith.constant 0 : i32
    %c0_i32_0 = arith.constant 0 : i32
    %c0_i32_1 = arith.constant 0 : i32
    return %c0_i32, %arg0, %c0_i32_0 : i32, i32, i32
  }
  func.func @transform_3(%arg0: i32) -> (i32, i32, i32) {
    %c0_i32 = arith.constant 0 : i32
    %0 = arith.subi %c0_i32, %arg0 : i32
    %c0_i32_0 = arith.constant 0 : i32
    %c0_i32_1 = arith.constant 0 : i32
    %c0_i32_2 = arith.constant 0 : i32
    return %c0_i32_0, %0, %c0_i32_1 : i32, i32, i32
  }
  func.func @transform_4(%arg0: i32) -> (i32, i32, i32) {
    %c0_i32 = arith.constant 0 : i32
    %c0_i32_0 = arith.constant 0 : i32
    %c0_i32_1 = arith.constant 0 : i32
    %c0_i32_2 = arith.constant 0 : i32
    return %c0_i32, %c0_i32_0, %c0_i32_1 : i32, i32, i32
  }
  func.func @transform_5(%arg0: i32) -> (i32, i32, i32) {
    %c0_i32 = arith.constant 0 : i32
    %c0_i32_0 = arith.constant 0 : i32
    %c0_i32_1 = arith.constant 0 : i32
    return %c0_i32, %arg0, %c0_i32_0 : i32, i32, i32
  }
  func.func @transform_6(%arg0: i32) -> (i32, i32, i32) {
    %c0_i32 = arith.constant 0 : i32
    %0 = arith.subi %c0_i32, %arg0 : i32
    %c0_i32_0 = arith.constant 0 : i32
    %c0_i32_1 = arith.constant 0 : i32
    %c0_i32_2 = arith.constant 0 : i32
    return %c0_i32_0, %0, %c0_i32_1 : i32, i32, i32
  }
}

</mosaic_0001>

<bundles_post_ra>
// kernel: tpu_custom_call.1
= control target key start
LH: loop header
LB: loop body
LE: loop exit
PB: predicated region body
PF: predicated region fallthrough
CT: control target
= control target key end

     0   :  { %12 = vsyncpa [#allocation8], 0  ;;  %s4158_s0 = inlined_call_operand.vmem [shape: f32[2,8,256], index: 0, kind: input, shape index: {}]   ;;  %s4159_s1 = inlined_call_operand.hbm [shape: f32[2,8,256], index: 1, kind: input, shape index: {}]   ;;  %s4160_s2 = inlined_call_operand.vmem [shape: f32[2,8,1], index: 2, kind: input, shape index: {}]   ;;  %s4161_s3 = inlined_call_operand.vmem [shape: f32[2,8,1], index: 3, kind: input, shape index: {}]   ;;  %s4162_s4 = inlined_call_operand.hbm [shape: bf16[2,32,128], index: 4, kind: input, shape index: {}]   ;;  %s4163_s5 = inlined_call_operand.hbm [shape: f32[2,8,32], index: 5, kind: output, shape index: {0}]   ;;  %s4164_s6 = inlined_call_operand.hbm [shape: f32[2,8,32], index: 6, kind: output, shape index: {1}]  }
   0x1   :  { %13 = vsyncpa [#allocation11], 0 }
   0x2   :  { %14 = vsyncpa [#allocation9], 0 }
   0x3   :  { %15 = vsyncpa [#allocation14], 0  ;;  %v48_v0 = vld [vmem:[%s4158_s0] sm:$0xff]  ;;  %v50_v1 = vld [vmem:[%s4158_s0 + $0x10] sm:$0xff]  ;;  %s2810_s27 = scalar_lea.hbm %s4159_s1, 8  ;;  %s3271_s29 = smov [#allocation7]  }
   0x4   :  { %49 = vst [vmem:[#allocation6] sm:$0xff] %v48_v0  ;;  %s64_s28 = sshll.u32 %s2810_s27, 4  ;;  %s66_s30 = sshll.u32 %s3271_s29, 4  ;;  %s65_s28 = int_to_ptr.hbm [resolvable:$true] %s64_s28  ;;  %s67_s30 = int_to_ptr.vmem [resolvable:$true] %s66_s30 }
   0x5   :  { %51 = vst [vmem:[#allocation6 + $0x8] sm:$0xff] %v50_v1  ;;  %s87_s9 = sshll.u32 %s4162_s4, 4  ;;  %s3272_s10 = smov 256   ;;  %s88_s9 = int_to_ptr.hbm [resolvable:$true] %s87_s9 }
   0x6   :  { %s3273_s11 = smov 128   ;;  %s3274_s12 = smov 8  }
   0x7   :  { %72 = dma.hbm_to_vmem [thread:$0]  %s65_s28, 256, %s67_s30, [#allocation8], %s3272_s10, %s3273_s11, %s3274_s12  }
   0x8   :  { %s3275_s0 = smov [#allocation10]   ;;  %s3276_s13 = smov 64  }
   0x9   :  { %s89_s1 = sshll.u32 %s3275_s0, 4  ;;  %s3277_s14 = smov 4   ;;  %s90_s1 = int_to_ptr.vmem [resolvable:$true] %s89_s1 }
   0xa   :  { %95 = dma.hbm_to_vmem [thread:$0]  %s88_s9, 512, %s90_s1, [#allocation11], %s3276_s13, %s3276_s13, %s3277_s14  }
   0xb   :  { %3263 = dma.done.wait [#allocation8], 256  }
   0xc   :  { %3264 = vsyncadd [#allocation8], 4294967040 }
   0xd   :  { %3265 = dma.done.wait [#allocation11], 512  }
   0xe   :  { %3266 = vsyncadd [#allocation11], 4294966784  ;;  %vm124_vm0 = vcmask 254976   ;;  %v3278_v2 = vmov 0.0   ;;  %v3339_v3 = vld [vmem:[#allocation10 + $0x8] sm:$0xff]  ;;  %v3341_v4 = vld [vmem:[#allocation10 + $0x18] sm:$0xff] }
   0xf   :  { %125 = vst.msk [vmem:[#allocation2] sm:$0x3] %vm124_vm0, %v3278_v2  ;;  %v3343_v5 = vld [vmem:[#allocation10] sm:$0xff]  ;;  %164 = vmatpush.bf16.msra.mxu0 %v3339_v3  ;;  %202 = vmatpush.bf16.msra.mxu1 %v3341_v4  ;;  %v3347_v7 = vld [vmem:[#allocation10 + $0x10] sm:$0xff]  ;;  %s3279_s4 = smov 32   ;;  %vm154_vm1 = vcmask 261120  }
  0x10   :  { %126 = vst.msk [vmem:[#allocation3] sm:$0x3] %vm124_vm0, %v3278_v2  ;;  %530 = vmatpush.bf16.msra.mxu3 %v3341_v4  ;;  %504 = vmatpush.bf16.msra.mxu2 %v3339_v3  ;;  %v138_v15 = vld [vmem:[#allocation6] sm:$0x1]  ;;  %v139_v20 = vld [vmem:[#allocation6 + $0x8] sm:$0x1] }
  0x11   :  { %127 = vst.msk [vmem:[#allocation4] sm:$0x3] %vm124_vm0, %v3278_v2  ;;  %v177_v21 = vld [vmem:[#allocation7 + $0x7] sm:$0x1]  ;;  %v178_v26 = vld [vmem:[#allocation7 + $0xf] sm:$0x1] }
  0x12   :  { %128 = vst.msk [vmem:[#allocation5] sm:$0x3] %vm124_vm0, %v3278_v2  ;;  %v3280_v52 = vmov 0   ;;  %s3281_s21 = smov 96   ;;  %s2772_s1 = sshll.u32 %s4163_s5, 4  ;;  %s2773_s1 = int_to_ptr.hbm [resolvable:$true] %s2772_s1 }
  0x13   :  { %165 = vmatpush.bf16.msra.mxu0 %v3343_v5  ;;  %203 = vmatpush.bf16.msra.mxu1 %v3347_v7  ;;  %s2788_s16 = sshll.u32 %s4164_s6, 4  ;;  %s2789_s16 = int_to_ptr.hbm [resolvable:$true] %s2788_s16 }
  0x14   :  { %531 = vmatpush.bf16.msra.mxu3 %v3347_v7  ;;  %505 = vmatpush.bf16.msra.mxu2 %v3343_v5 }
  0x15   :  { %2905 = vset.pattern.permute.xlu0 %v3280_v52  ;;  %2904 = vset.pattern.permute.xlu2 %v3280_v52 }
  0x16   :  { %v140_v6 = vld [vmem:[#allocation2] sm:$0x3]  ;;  %2906 = vset.pattern.permute.xlu1 %v3280_v52 }
  0x17   :  { %v215_v8 = vld [vmem:[#allocation3] sm:$0x3]  ;;  %v141_v11 = vpack.c.bf16 %v140_v6, %v140_v6  ;;  %829 = vmatpush.bf16.msrb.mxu0 %v3339_v3  ;;  %855 = vmatpush.bf16.msrb.mxu1 %v3341_v4 }
  0x18   :  { %v179_v9 = vld [vmem:[#allocation4] sm:$0x3]  ;;  %v257_v10 = vrot.slane %v215_v8, 1  ;;  %1154 = vmatpush.bf16.msrb.mxu2 %v3339_v3  ;;  %1180 = vmatpush.bf16.msrb.mxu3 %v3341_v4 }
  0x19   :  { %v180_v12 = vpack.c.bf16 %v179_v9, %v179_v9  ;;  %v298_v13 = vld [vmem:[#allocation5] sm:$0x3]  ;;  %2831 = vmatmul.msk.bf16.vlgmr.msra.gmra.mxu0 %vm154_vm1, %v141_v11 }
  0x1a   :  { %260 = vrot.lane.b32.xlu2 %v257_v10, %s3279_s4  ;;  %v340_v14 = vrot.slane %v298_v13, 1 }
  0x1b   :  { %2840 = vmatmul.msk.bf16.vlgmr.msra.gmra.mxu1 %vm154_vm1, %v180_v12  ;;  %830 = vmatpush.bf16.msrb.mxu0 %v3343_v5 }
  0x1c   :  { %856 = vmatpush.bf16.msrb.mxu1 %v3347_v7  ;;  %1155 = vmatpush.bf16.msrb.mxu2 %v3343_v5 }
  0x1d   :  { %1181 = vmatpush.bf16.msrb.mxu3 %v3347_v7 }
  0x1f   :  { %1479 = vmatpush.bf16.msra.mxu0 %v3339_v3 }
  0x20   :  { %1505 = vmatpush.bf16.msra.mxu1 %v3341_v4 }
  0x22   :  { %343 = vrot.lane.b32.xlu2 %v340_v14, %s3279_s4 }
  0x23   :  { %1480 = vmatpush.bf16.msra.mxu0 %v3343_v5 }
  0x24   :  { %1506 = vmatpush.bf16.msra.mxu1 %v3347_v7 }
  0x2a   :  { %341 = vrot.lane.b32.xlu2 %v298_v13, %s3279_s4 }
  0x96   :  { %v167_v16 = vpop.f32.mrf.mxu0 }
  0x97   :  { %v172_v18 = vrot.slane %v167_v16, 1  ;;  %v175_v19 = vadd.f32 %v167_v16, %v138_v15 }
  0x98   :  { %v205_v17 = vpop.f32.mrf.mxu1 }
  0x99   :  { %2907 = vtanh.f32 %v175_v19  ;;  %v176_v22 = vadd.f32 %v172_v18, %v139_v20  ;;  %v213_v23 = vadd.f32 %v205_v17, %v177_v21  ;;  %v210_v24 = vrot.slane %v205_v17, 1 }
  0x9a   :  { %v2841_v35 = vmul.f32 -1.442695, %v175_v19 }
  0x9b   :  { %2909 = vtanh.f32 %v176_v22  ;;  %v214_v29 = vadd.f32 %v210_v24, %v178_v26  ;;  %v2842_v33 = vmul.f32 -1.442695, %v176_v22  ;;  %v2843_v34 = vmul.f32 -1.442695, %v213_v23 }
  0x9c   :  { %2911 = vtanh.f32 %v213_v23 }
  0x9d   :  { %2913 = vtanh.f32 %v214_v29  ;;  %v2844_v36 = vmul.f32 -1.442695, %v214_v29 }
  0x9e   :  { %v169_v25 = vpop.f32.mrf.mxu0  ;;  %2915 = vpow2.f32 %v2842_v33 }
  0x9f   :  { %v2908_v28 = vpop.eup %2907  ;;  %2917 = vpow2.f32 %v2843_v34 }
  0xa0   :  { %v207_v27 = vpop.f32.mrf.mxu1  ;;  %268 = vrot.lane.b32.xlu1 %v2908_v28, %s3276_s13  ;;  %2919 = vpow2.f32 %v2841_v35 }
  0xa1   :  { %v2910_v30 = vpop.eup %2909  ;;  %2921 = vpow2.f32 %v2844_v36 }
  0xa2   :  { %v2912_v31 = vpop.eup %2911  ;;  %270 = vrot.lane.b32.xlu0 %v2910_v30, %s3276_s13  ;;  %v382_v30 = vld [vmem:[%s4160_s2 + $0x8] sm:$0x1] }
  0xa3   :  { %v2914_v32 = vpop.eup %2913 }
  0xa4   :  { %v2916_v37 = vpop.eup %2915 }
  0xa5   :  { %v2918_v38 = vpop.eup %2917  ;;  %v223_v39 = vadd.f32 1.0, %v2916_v37  ;;  %v386_v37 = vld [vmem:[%s4161_s3 + $0xf] sm:$0x1] }
  0xa6   :  { %v305_v40 = vadd.f32 1.0, %v2918_v38  ;;  %v2920_v41 = vpop.eup %2919 }
  0xa7   :  { %2923 = vrcp.f32 %v223_v39  ;;  %v2922_v42 = vpop.eup %2921  ;;  %v3377_v43 = vadd.f32 1.0, %v2920_v41  ;;  %v250_v61 = vand.u32 2147483648, %v223_v39  ;;  %vm244_vm5 = vweird.f32 %v223_v39 }
  0xa8   :  { %351 = vrot.lane.b32.xlu1 %v2912_v31, %s3276_s13  ;;  %2925 = vrcp.f32 %v305_v40  ;;  %v3379_v44 = vadd.f32 1.0, %v2922_v42  ;;  %vm312_vm3 = vweird.f32 %v305_v40  ;;  %v248_v62 = vand.u32 2147483647, %v223_v39  ;;  %v459_v42 = vld [vmem:[#allocation4] sm:$0x3] }
  0xa9   :  { %2927 = vrcp.f32 %v3377_v43  ;;  %v318_v63 = vand.u32 2147483648, %v305_v40  ;;  %v316_v2 = vand.u32 2147483647, %v305_v40  ;;  %v251_v11 = vor.u32 1.1754944e-38, %v250_v61 }
  0xaa   :  { %353 = vrot.lane.b32.xlu0 %v2914_v32, %s3276_s13  ;;  %2929 = vrcp.f32 %v3379_v44  ;;  %vm327_vm8 = vweird.f32 %v3379_v44  ;;  %vm249_vm9 = vcmp.eq.f32.partialorder %v248_v62, 8.507059e+37  ;;  %v331_v12 = vand.u32 2147483647, %v3379_v44 }
  0xab   :  { %v319_v13 = vor.u32 1.1754944e-38, %v318_v63  ;;  %v333_v15 = vand.u32 2147483648, %v3379_v44  ;;  %vm317_vm11 = vcmp.eq.f32.partialorder %v316_v2, 8.507059e+37  ;;  %v235_v22 = vand.u32 2147483648, %v3377_v43 }
  0xac   :  { %vm229_vm14 = vweird.f32 %v3377_v43  ;;  %v233_v24 = vand.u32 2147483647, %v3377_v43 }
  0xad   :  { %v2924_v45 = vpop.eup %2923  ;;  %v334_v26 = vor.u32 1.1754944e-38, %v333_v15  ;;  %v236_v31 = vor.u32 1.1754944e-38, %v235_v22  ;;  %v385_v15 = vld [vmem:[%s4161_s3 + $0x7] sm:$0x1] }
  0xae   :  { %v2926_v46 = vpop.eup %2925  ;;  %v240_v47 = vmul.f32 %v2924_v45, %v223_v39  ;;  %vm245_vm2 = vweird.f32 %v2924_v45 }
  0xaf   :  { %v308_v48 = vmul.f32 %v2926_v46, %v305_v40  ;;  %v3383_v49 = vpop.eup %2927  ;;  %vm313_vm4 = vweird.f32 %v2926_v46  ;;  %vm246_vm6 = vmor %vm244_vm5, %vm245_vm2  ;;  %vm332_vm2 = vcmp.eq.f32.partialorder %v331_v12, 8.507059e+37  ;;  %vm388_vm5 = vcmp.gt.f32.partialorder %v386_v37, 0.0  ;;  %v381_v40 = vld [vmem:[%s4160_s2] sm:$0x1] }
  0xb0   :  { %v241_v50 = vsub.f32 1.0, %v240_v47  ;;  %v2930_v51 = vpop.eup %2929  ;;  %v225_v56 = vmul.f32 %v3383_v49, %v3377_v43  ;;  %vm3391_vm7 = vmor %vm312_vm3, %vm313_vm4  ;;  %vm230_vm12 = vweird.f32 %v3383_v49  ;;  %vm234_vm3 = vcmp.eq.f32.partialorder %v233_v24, 8.507059e+37  ;;  %v411_v47 = vld [vmem:[#allocation2] sm:$0x3] }
  0xb1   :  { %v309_v53 = vsub.f32 1.0, %v308_v48  ;;  %v323_v55 = vmul.f32 %v2930_v51, %v3379_v44  ;;  %vm328_vm10 = vweird.f32 %v2930_v51  ;;  %vm231_vm15 = vmor %vm229_vm14, %vm230_vm12  ;;  %vm384_vm4 = vcmp.gt.f32.partialorder %v382_v30, 0.0  ;;  %v261_v44 = vpop.permute.xlu2 %260 }
  0xb2   :  { %258 = vrot.lane.b32.xlu0 %v215_v8, %s3279_s4  ;;  %v242_v54 = vmul.f32 %v2924_v45, %v241_v50  ;;  %v226_v60 = vsub.f32 1.0, %v225_v56  ;;  %vm3406_vm13 = vmor %vm327_vm8, %vm328_vm10  ;;  %v390_v38 = vsel %vm384_vm4, 1, %v3280_v52  ;;  %v432_v39 = vsel %vm388_vm5, 1, %v3280_v52 }
  0xb3   :  { %v310_v57 = vmul.f32 %v2926_v46, %v309_v53  ;;  %v324_v59 = vsub.f32 1.0, %v323_v55  ;;  %v461_v43 = vrot.slane %v459_v42, 1  ;;  %v413_v48 = vrot.slane %v411_v47, 1 }
  0xb4   :  { %v243_v58 = vadd.f32 %v2924_v45, %v242_v54  ;;  %v227_v10 = vmul.f32 %v3383_v49, %v226_v60  ;;  %vm404_vm8 = vcmask 1041409   ;;  %vm387_vm10 = vcmp.gt.f32.partialorder %v385_v15, 0.0 }
  0xb5   :  { %v311_v1 = vadd.f32 %v2926_v46, %v310_v57  ;;  %v325_v8 = vmul.f32 %v2930_v51, %v324_v59 }
  0xb6   :  { %v247_v6 = vsel %vm246_vm6, %v2924_v45, %v243_v58  ;;  %v228_v19 = vadd.f32 %v3383_v49, %v227_v10  ;;  %vm383_vm6 = vcmp.gt.f32.partialorder %v381_v40, 0.0 }
  0xb7   :  { %v3398_v14 = vsel %vm249_vm9, %v251_v11, %v247_v6  ;;  %v315_v16 = vsel %vm3391_vm7, %v2926_v46, %v311_v1  ;;  %v326_v18 = vadd.f32 %v2930_v51, %v325_v8  ;;  %v389_v41 = vsel %vm383_vm6, 1, %v3280_v52  ;;  %v430_v8 = vld [vmem:[#allocation5] sm:$0x3] }
  0xb8   :  { %v3411_v23 = vsel %vm317_vm11, %v319_v13, %v315_v16  ;;  %v232_v29 = vsel %vm231_vm15, %v3383_v49, %v228_v19  ;;  %v265_v54 = vmul.f32 %v261_v44, %v3398_v14  ;;  %v442_v10 = vrot.slane %v430_v8, 1 }
  0xb9   :  { %v330_v28 = vsel %vm3406_vm13, %v2930_v51, %v326_v18  ;;  %v3426_v33 = vsel %vm234_vm3, %v236_v31, %v232_v29  ;;  %v344_v45 = vpop.permute.xlu2 %343  ;;  %v431_v18 = vsel %vm387_vm10, 1, %v3280_v52  ;;  %vm482_vm13 = vcmask 253952  }
  0xba   :  { %v3424_v32 = vsel %vm332_vm2, %v334_v26, %v330_v28 }
  0xbb   :  { %v348_v63 = vmul.f32 %v344_v45, %v3424_v32 }
  0xc1   :  { %v342_v46 = vpop.permute.xlu2 %341 }
  0xc2   :  { %v347_v49 = vmul.f32 %v342_v46, %v3411_v23 }
 0x112   :  { %v269_v0 = vpop.permute.xlu1 %268 }
 0x113   :  { %v274_v35 = vmul.f32 %v269_v0, %v3426_v33 }
 0x114   :  { %v271_v17 = vpop.permute.xlu0 %270 }
 0x115   :  { %v275_v20 = vmul.f32 %v271_v17, %v3398_v14 }
 0x117   :  { %280 = vrot.lane.b32.xlu1 %v275_v20, %s3279_s4 }
 0x11a   :  { %v352_v25 = vpop.permute.xlu1 %351 }
 0x11b   :  { %v357_v27 = vmul.f32 %v352_v25, %v3411_v23 }
 0x11c   :  { %v354_v34 = vpop.permute.xlu0 %353 }
 0x11d   :  { %361 = vrot.lane.b32.xlu2 %v357_v27, %s3279_s4  ;;  %v358_v36 = vmul.f32 %v354_v34, %v3424_v32 }
 0x11f   :  { %363 = vrot.lane.b32.xlu0 %v358_v36, %s3279_s4  ;;  %278 = vrot.lane.b32.xlu1 %v274_v35, %s3279_s4 }
 0x124   :  { %v259_v55 = vpop.permute.xlu0 %258 }
 0x125   :  { %395 = vperm.xlu2 %2904, %v390_v38   ;;  %v264_v58 = vmul.f32 %v259_v55, %v3426_v33 }
 0x127   :  { %437 = vperm.xlu0 %2905, %v432_v39   ;;  %416 = vrot.lane.b32.xlu1 %v413_v48, %s3281_s21 }
 0x12d   :  { %464 = vrot.lane.b32.xlu2 %v461_v43, %s3281_s21 }
 0x12f   :  { %392 = vperm.xlu0 %2905, %v389_v41  }
 0x177   :  { %v362_v50 = vpop.permute.xlu2 %361 }
 0x178   :  { %v3444_v51 = vadd.f32 %v362_v50, %v347_v49 }
 0x17a   :  { %2931 = vtanh.f32 %v3444_v51 }
 0x17f   :  { %v396_v0 = vpop.permute.xlu2 %395 }
 0x180   :  { %v2932_v53 = vpop.eup %2931  ;;  %vm398_vm7 = vcmp.eq.s32.totalorder %v396_v0, 1 }
 0x181   :  { %373 = vrot.lane.b32.xlu2 %v2932_v53, %s3276_s13 }
 0x187   :  { %v465_v19 = vpop.permute.xlu2 %464 }
 0x189   :  { %414 = vrot.lane.b32.xlu2 %v411_v47, %s3281_s21  ;;  %v281_v56 = vpop.permute.xlu1 %280 }
 0x18a   :  { %v285_v57 = vadd.f32 %v281_v56, %v265_v54 }
 0x18c   :  { %2933 = vtanh.f32 %v285_v57  ;;  %v400_v9 = vsel %vm398_vm7, %v285_v57, %v261_v44 }
 0x18d   :  { %v403_v12 = vrot.slane %v400_v9, 7  ;;  %v517_v9 = vld [vmem:[#allocation7 + $0x6] sm:$0x1] }
 0x191   :  { %v364_v59 = vpop.permute.xlu0 %363  ;;  %v279_v60 = vpop.permute.xlu1 %278 }
 0x192   :  { %v2934_v61 = vpop.eup %2933  ;;  %v284_v62 = vadd.f32 %v279_v60, %v264_v58  ;;  %v3453_v1 = vadd.f32 %v364_v59, %v348_v63  ;;  %v491_v60 = vld [vmem:[#allocation6 + $0x1] sm:$0x1] }
 0x193   :  { %292 = vrot.lane.b32.xlu0 %v2934_v61, %s3276_s13 }
 0x194   :  { %2935 = vtanh.f32 %v284_v62 }
 0x195   :  { %2937 = vtanh.f32 %v3453_v1 }
 0x199   :  { %v3455_v2 = vpop.permute.xlu0 %437  ;;  %v417_v20 = vpop.permute.xlu1 %416 }
 0x19a   :  { %v2936_v6 = vpop.eup %2935  ;;  %vm440_vm11 = vcmp.eq.s32.totalorder %v3455_v2, 1 }
 0x19b   :  { %462 = vrot.lane.b32.xlu0 %v459_v42, %s3281_s21  ;;  %290 = vrot.lane.b32.xlu1 %v2936_v6, %s3276_s13  ;;  %v2938_v13 = vpop.eup %2937 }
 0x1a1   :  { %v393_v11 = vpop.permute.xlu0 %392 }
 0x1a2   :  { %vm397_vm9 = vcmp.eq.s32.totalorder %v393_v11, 1 }
 0x1a3   :  { %445 = vrot.lane.b32.xlu0 %v442_v10, %s3279_s4  ;;  %v399_v16 = vsel %vm397_vm9, %v284_v62, %v259_v55  ;;  %375 = vrot.lane.b32.xlu1 %v2938_v13, %s3276_s13 }
 0x1a4   :  { %v405_v17 = vsel %vm404_vm8, %v403_v12, %v399_v16 }
 0x1ab   :  { %434 = vperm.xlu1 %2906, %v431_v18  }
 0x1db   :  { %v374_v21 = vpop.permute.xlu2 %373 }
 0x1dc   :  { %v379_v36 = vmul.f32 %v374_v21, %v3411_v23 }
 0x1e3   :  { %v415_v27 = vpop.permute.xlu2 %414 }
 0x205   :  { %v293_v22 = vpop.permute.xlu0 %292 }
 0x206   :  { %v297_v24 = vmul.f32 %v293_v22, %v3398_v14 }
 0x208   :  { %v421_v25 = vsel %vm398_vm7, %v297_v24, %v417_v20 }
 0x209   :  { %v424_v29 = vrot.slane %v421_v25, 7 }
 0x20d   :  { %v291_v26 = vpop.permute.xlu1 %290  ;;  %v463_v37 = vpop.permute.xlu0 %462 }
 0x20e   :  { %v296_v28 = vmul.f32 %v291_v26, %v3426_v33 }
 0x210   :  { %v420_v30 = vsel %vm397_vm9, %v296_v28, %v415_v27 }
 0x211   :  { %v425_v31 = vsel %vm404_vm8, %v424_v29, %v420_v30 }
 0x212   :  { %426 = vrot.lane.b32.xlu1 %v425_v31, %s3279_s4 }
 0x215   :  { %v376_v34 = vpop.permute.xlu1 %375  ;;  %v446_v46 = vpop.permute.xlu0 %445 }
 0x216   :  { %v380_v35 = vmul.f32 %v376_v34, %v3424_v32  ;;  %v450_v47 = vsel %vm440_vm11, %v3453_v1, %v446_v46  ;;  %v492_v1 = vld [vmem:[#allocation6 + $0x9] sm:$0x1] }
 0x217   :  { %v453_v48 = vrot.slane %v450_v47, 7 }
 0x218   :  { %v469_v14 = vsel %vm440_vm11, %v380_v35, %v465_v19 }
 0x219   :  { %v472_v38 = vrot.slane %v469_v14, 7 }
 0x21a   :  { %443 = vrot.lane.b32.xlu1 %v430_v8, %s3279_s4 }
 0x21d   :  { %v435_v33 = vpop.permute.xlu1 %434 }
 0x21e   :  { %vm439_vm12 = vcmp.eq.s32.totalorder %v435_v33, 1 }
 0x21f   :  { %v468_v39 = vsel %vm439_vm12, %v379_v36, %v463_v37  ;;  %v714_v37 = vld [vmem:[%s4161_s3 + $0xe] sm:$0x1] }
 0x220   :  { %v473_v40 = vsel %vm404_vm8, %v472_v38, %v468_v39  ;;  %vm716_vm4 = vcmp.gt.f32.partialorder %v714_v37, 0.0 }
 0x221   :  { %474 = vrot.lane.b32.xlu2 %v473_v40, %s3279_s4  ;;  %v758_v40 = vsel %vm716_vm4, 1, %v3280_v52 }
 0x229   :  { %406 = vrot.lane.b32.xlu2 %v405_v17, %s3281_s21 }
 0x27b   :  { %v475_v32 = vpop.permute.xlu2 %474 }
 0x27c   :  { %477 = vst.msk [vmem:[#allocation4] sm:$0x3] %vm124_vm0, %v475_v32 }
 0x283   :  { %v407_v41 = vpop.permute.xlu2 %406  ;;  %v519_v42 = vld [vmem:[#allocation4] sm:$0x3] }
 0x284   :  { %v485_v43 = vld [vmem:[#allocation4] sm:$0x3]  ;;  %410 = vst.msk [vmem:[#allocation3] sm:$0x3] %vm124_vm0, %v407_v41  ;;  %v427_v23 = vpop.permute.xlu1 %426  ;;  %v520_v44 = vpack.c.bf16 %v519_v42, %v519_v42 }
 0x285   :  { %v487_v45 = vrot.slane %v485_v43, 1  ;;  %429 = vst.msk [vmem:[#allocation2] sm:$0x3] %vm124_vm0, %v427_v23 }
 0x286   :  { %2846 = vmatmul.msk.bf16.vlgmr.msra.gmra.mxu3 %vm154_vm1, %v520_v44  ;;  %489 = vst.msk [vmem:[#allocation13 + $0x7] sm:$0x1] %vm482_vm13, %v485_v43 }
 0x287   :  { %490 = vst.msk [vmem:[#allocation13 + $0xf] sm:$0x1] %vm482_vm13, %v487_v45  ;;  %1830 = vmatpush.bf16.msra.mxu3 %v3341_v4 }
 0x28b   :  { %1831 = vmatpush.bf16.msra.mxu3 %v3347_v7  ;;  %v518_v7 = vld [vmem:[#allocation7 + $0xe] sm:$0x1] }
 0x28c   :  { %v444_v49 = vpop.permute.xlu1 %443  ;;  %v493_v50 = vld [vmem:[#allocation2] sm:$0x3] }
 0x28d   :  { %v449_v53 = vsel %vm439_vm12, %v3444_v51, %v444_v49  ;;  %v494_v54 = vpack.c.bf16 %v493_v50, %v493_v50  ;;  %v478_v55 = vld [vmem:[#allocation2] sm:$0x3] }
 0x28e   :  { %v454_v56 = vsel %vm404_vm8, %v453_v48, %v449_v53  ;;  %v480_v57 = vrot.slane %v478_v55, 1  ;;  %483 = vst.msk [vmem:[#allocation12] sm:$0x1] %vm482_vm13, %v478_v55  ;;  %v3522_v23 = vld [vmem:[#allocation2] sm:$0x3] }
 0x28f   :  { %2845 = vmatmul.msk.bf16.vlgmr.msra.gmra.mxu2 %vm154_vm1, %v494_v54  ;;  %455 = vrot.lane.b32.xlu0 %v454_v56, %s3281_s21  ;;  %v739_v45 = vrot.slane %v3522_v23, 1 }
 0x290   :  { %484 = vst.msk [vmem:[#allocation12 + $0x8] sm:$0x1] %vm482_vm13, %v480_v57  ;;  %1804 = vmatpush.bf16.msra.mxu2 %v3339_v3 }
 0x294   :  { %1805 = vmatpush.bf16.msra.mxu2 %v3343_v5  ;;  %v543_v5 = vld [vmem:[#allocation3] sm:$0x3] }
 0x295   :  { %v585_v10 = vrot.slane %v543_v5, 1 }
 0x301   :  { %v456_v4 = vpop.permute.xlu0 %455 }
 0x302   :  { %458 = vst.msk [vmem:[#allocation5] sm:$0x3] %vm124_vm0, %v456_v4 }
 0x309   :  { %v533_v51 = vpop.f32.mrf.mxu3  ;;  %v626_v12 = vld [vmem:[#allocation5] sm:$0x3] }
 0x30a   :  { %v538_v58 = vrot.slane %v533_v51, 1  ;;  %v541_v11 = vadd.f32 %v533_v51, %v517_v9  ;;  %v668_v15 = vrot.slane %v626_v12, 1 }
 0x30c   :  { %v542_v59 = vadd.f32 %v538_v58, %v518_v7  ;;  %v2849_v30 = vmul.f32 -1.442695, %v541_v11 }
 0x30e   :  { %2939 = vtanh.f32 %v542_v59  ;;  %v2850_v17 = vmul.f32 -1.442695, %v542_v59 }
 0x311   :  { %v535_v61 = vpop.f32.mrf.mxu3 }
 0x312   :  { %v507_v62 = vpop.f32.mrf.mxu2 }
 0x313   :  { %v512_v63 = vrot.slane %v507_v62, 1  ;;  %v515_v0 = vadd.f32 %v507_v62, %v491_v60 }
 0x314   :  { %v2940_v2 = vpop.eup %2939 }
 0x315   :  { %2941 = vtanh.f32 %v515_v0  ;;  %681 = vrot.lane.b32.xlu2 %v2940_v2, %s3276_s13  ;;  %v516_v3 = vadd.f32 %v512_v63, %v492_v1  ;;  %v2847_v34 = vmul.f32 -1.442695, %v515_v0 }
 0x317   :  { %2943 = vtanh.f32 %v516_v3  ;;  %v2848_v25 = vmul.f32 -1.442695, %v516_v3 }
 0x318   :  { %2945 = vtanh.f32 %v541_v11 }
 0x319   :  { %2947 = vpow2.f32 %v2850_v17 }
 0x31a   :  { %v509_v6 = vpop.f32.mrf.mxu2 }
 0x31b   :  { %v2942_v8 = vpop.eup %2941 }
 0x31c   :  { %596 = vrot.lane.b32.xlu0 %v2942_v8, %s3276_s13 }
 0x31d   :  { %588 = vrot.lane.b32.xlu2 %v585_v10, %s3279_s4  ;;  %v2944_v13 = vpop.eup %2943 }
 0x31e   :  { %598 = vrot.lane.b32.xlu1 %v2944_v13, %s3276_s13  ;;  %v2946_v16 = vpop.eup %2945 }
 0x31f   :  { %v2948_v18 = vpop.eup %2947 }
 0x320   :  { %v634_v19 = vadd.f32 1.0, %v2948_v18  ;;  %v710_v18 = vld [vmem:[%s4160_s2 + $0x9] sm:$0x1] }
 0x322   :  { %2949 = vrcp.f32 %v634_v19  ;;  %v661_v27 = vand.u32 2147483648, %v634_v19  ;;  %vm655_vm15 = vweird.f32 %v634_v19  ;;  %v659_v28 = vand.u32 2147483647, %v634_v19 }
 0x323   :  { %2951 = vpow2.f32 %v2848_v25 }
 0x324   :  { %671 = vrot.lane.b32.xlu0 %v668_v15, %s3279_s4  ;;  %v662_v31 = vor.u32 1.1754944e-38, %v661_v27  ;;  %vm660_vm3 = vcmp.eq.f32.partialorder %v659_v28, 8.507059e+37  ;;  %2953 = vpow2.f32 %v2849_v30 }
 0x325   :  { %2955 = vpow2.f32 %v2847_v34 }
 0x326   :  { %679 = vrot.lane.b32.xlu1 %v2946_v16, %s3276_s13 }
 0x328   :  { %v2950_v20 = vpop.eup %2949 }
 0x329   :  { %v651_v21 = vmul.f32 %v2950_v20, %v634_v19  ;;  %vm656_vm14 = vweird.f32 %v2950_v20  ;;  %v2952_v36 = vpop.eup %2951  ;;  %v785_v19 = vld [vmem:[#allocation4] sm:$0x3] }
 0x32a   :  { %vm657_vm2 = vmor %vm655_vm15, %vm656_vm14  ;;  %v551_v38 = vadd.f32 1.0, %v2952_v36  ;;  %v2954_v39 = vpop.eup %2953  ;;  %v713_v36 = vld [vmem:[%s4161_s3 + $0x6] sm:$0x1] }
 0x32b   :  { %v652_v22 = vsub.f32 1.0, %v651_v21  ;;  %v2956_v32 = vpop.eup %2955  ;;  %v633_v41 = vadd.f32 1.0, %v2954_v39  ;;  %v787_v21 = vrot.slane %v785_v19, 1 }
 0x32c   :  { %669 = vrot.lane.b32.xlu0 %v626_v12, %s3279_s4  ;;  %2957 = vrcp.f32 %v551_v38  ;;  %v550_v42 = vadd.f32 1.0, %v2956_v32  ;;  %v578_v57 = vand.u32 2147483648, %v551_v38  ;;  %vm572_vm6 = vweird.f32 %v551_v38 }
 0x32d   :  { %v653_v24 = vmul.f32 %v2950_v20, %v652_v22  ;;  %2959 = vrcp.f32 %v633_v41  ;;  %v576_v4 = vand.u32 2147483647, %v551_v38  ;;  %vm640_vm12 = vweird.f32 %v633_v41  ;;  %v709_v22 = vld [vmem:[%s4160_s2 + $0x1] sm:$0x1] }
 0x32e   :  { %586 = vrot.lane.b32.xlu1 %v543_v5, %s3279_s4  ;;  %2961 = vrcp.f32 %v550_v42  ;;  %v579_v59 = vor.u32 1.1754944e-38, %v578_v57  ;;  %v563_v1 = vand.u32 2147483648, %v550_v42  ;;  %v646_v2 = vand.u32 2147483648, %v633_v41 }
 0x32f   :  { %v654_v26 = vadd.f32 %v2950_v20, %v653_v24  ;;  %vm577_vm9 = vcmp.eq.f32.partialorder %v576_v4, 8.507059e+37  ;;  %vm557_vm14 = vweird.f32 %v550_v42  ;;  %v561_v3 = vand.u32 2147483647, %v550_v42 }
 0x330   :  { %v644_v5 = vand.u32 2147483647, %v633_v41  ;;  %v564_v9 = vor.u32 1.1754944e-38, %v563_v1  ;;  %v647_v11 = vor.u32 1.1754944e-38, %v646_v2 }
 0x331   :  { %v658_v29 = vsel %vm657_vm2, %v2950_v20, %v654_v26 }
 0x332   :  { %v3514_v35 = vsel %vm660_vm3, %v662_v31, %v658_v29  ;;  %v2958_v43 = vpop.eup %2957  ;;  %vm562_vm3 = vcmp.eq.f32.partialorder %v561_v3, 8.507059e+37  ;;  %vm645_vm4 = vcmp.eq.f32.partialorder %v644_v5, 8.507059e+37 }
 0x333   :  { %v568_v44 = vmul.f32 %v2958_v43, %v551_v38  ;;  %v2960_v46 = vpop.eup %2959  ;;  %vm573_vm5 = vweird.f32 %v2958_v43 }
 0x334   :  { %v2962_v48 = vpop.eup %2961  ;;  %v636_v53 = vmul.f32 %v2960_v46, %v633_v41  ;;  %vm574_vm7 = vmor %vm572_vm6, %vm573_vm5  ;;  %vm641_vm10 = vweird.f32 %v2960_v46  ;;  %vm712_vm5 = vcmp.gt.f32.partialorder %v710_v18, 0.0  ;;  %vm711_vm6 = vcmp.gt.f32.partialorder %v709_v22, 0.0 }
 0x335   :  { %v569_v47 = vsub.f32 1.0, %v568_v44  ;;  %v553_v50 = vmul.f32 %v2962_v48, %v550_v42  ;;  %vm558_vm11 = vweird.f32 %v2962_v48  ;;  %vm642_vm15 = vmor %vm640_vm12, %vm641_vm10  ;;  %v718_v20 = vsel %vm712_vm5, 1, %v3280_v52 }
 0x336   :  { %v637_v56 = vsub.f32 1.0, %v636_v53  ;;  %vm559_vm2 = vmor %vm557_vm14, %vm558_vm11  ;;  %v717_v24 = vsel %vm711_vm6, 1, %v3280_v52 }
 0x337   :  { %v570_v49 = vmul.f32 %v2958_v43, %v569_v47  ;;  %v554_v55 = vsub.f32 1.0, %v553_v50 }
 0x338   :  { %v638_v58 = vmul.f32 %v2960_v46, %v637_v56 }
 0x339   :  { %v571_v54 = vadd.f32 %v2958_v43, %v570_v49  ;;  %v555_v51 = vmul.f32 %v2962_v48, %v554_v55  ;;  %v756_v55 = vld [vmem:[#allocation5] sm:$0x3] }
 0x33a   :  { %v639_v0 = vadd.f32 %v2960_v46, %v638_v58  ;;  %v768_v56 = vrot.slane %v756_v55, 1 }
 0x33b   :  { %v575_v7 = vsel %vm574_vm7, %v2958_v43, %v571_v54  ;;  %v556_v62 = vadd.f32 %v2962_v48, %v555_v51  ;;  %vm715_vm7 = vcmp.gt.f32.partialorder %v713_v36, 0.0  ;;  %v3600_v36 = vld [vmem:[#allocation10 + $0x10] sm:$0xff] }
 0x33c   :  { %v3526_v60 = vsel %vm577_vm9, %v579_v59, %v575_v7  ;;  %v643_v8 = vsel %vm642_vm15, %v2960_v46, %v639_v0 }
 0x33d   :  { %v560_v6 = vsel %vm559_vm2, %v2962_v48, %v556_v62  ;;  %v3532_v15 = vsel %vm645_vm4, %v647_v11, %v643_v8 }
 0x33e   :  { %v3530_v12 = vsel %vm562_vm3, %v564_v9, %v560_v6 }
 0x36f   :  { %v682_v14 = vpop.permute.xlu2 %681 }
 0x370   :  { %v686_v33 = vmul.f32 %v682_v14, %v3514_v35 }
 0x372   :  { %691 = vrot.lane.b32.xlu1 %v686_v33, %s3279_s4 }
 0x377   :  { %v589_v25 = vpop.permute.xlu2 %588 }
 0x378   :  { %v593_v26 = vmul.f32 %v589_v25, %v3526_v60 }
 0x37a   :  { %763 = vperm.xlu1 %2906, %v758_v40   ;;  %v757_v40 = vsel %vm715_vm7, 1, %v3280_v52 }
 0x382   :  { %742 = vrot.lane.b32.xlu1 %v739_v45, %s3281_s21 }
 0x38e   :  { %v597_v10 = vpop.permute.xlu0 %596 }
 0x38f   :  { %v602_v16 = vmul.f32 %v597_v10, %v3530_v12 }
 0x390   :  { %v599_v61 = vpop.permute.xlu1 %598 }
 0x391   :  { %v603_v63 = vmul.f32 %v599_v61, %v3526_v60 }
 0x393   :  { %608 = vrot.lane.b32.xlu2 %v603_v63, %s3279_s4 }
 0x396   :  { %v672_v33 = vpop.permute.xlu0 %671 }
 0x397   :  { %v676_v38 = vmul.f32 %v672_v33, %v3514_v35 }
 0x398   :  { %v680_v13 = vpop.permute.xlu1 %679 }
 0x399   :  { %v685_v17 = vmul.f32 %v680_v13, %v3532_v15 }
 0x39b   :  { %689 = vrot.lane.b32.xlu0 %v685_v17, %s3279_s4  ;;  %606 = vrot.lane.b32.xlu2 %v602_v16, %s3279_s4 }
 0x39e   :  { %v670_v41 = vpop.permute.xlu0 %669 }
 0x39f   :  { %v675_v43 = vmul.f32 %v670_v41, %v3532_v15 }
 0x3a0   :  { %v587_v29 = vpop.permute.xlu1 %586 }
 0x3a1   :  { %v592_v30 = vmul.f32 %v587_v29, %v3530_v12 }
 0x3a3   :  { %723 = vperm.xlu0 %2905, %v718_v20   ;;  %790 = vrot.lane.b32.xlu2 %v787_v21, %s3281_s21 }
 0x3ab   :  { %720 = vperm.xlu0 %2905, %v717_v24  }
 0x3e4   :  { %v692_v37 = vpop.permute.xlu1 %691 }
 0x3e5   :  { %v696_v39 = vadd.f32 %v692_v37, %v676_v38  ;;  %v816_v37 = vld [vmem:[#allocation6 + $0x2] sm:$0x1]  ;;  %v817_v38 = vld [vmem:[#allocation6 + $0xa] sm:$0x1] }
 0x3ec   :  { %v764_v57 = vpop.permute.xlu1 %763 }
 0x3ed   :  { %v609_v27 = vpop.permute.xlu2 %608  ;;  %vm766_vm11 = vcmp.eq.s32.totalorder %v764_v57, 1 }
 0x3ee   :  { %v613_v28 = vadd.f32 %v609_v27, %v593_v26  ;;  %v3586_v26 = vld [vmem:[#allocation10 + $0x8] sm:$0xff]  ;;  %v3590_v27 = vld [vmem:[#allocation10] sm:$0xff] }
 0x3f0   :  { %2963 = vtanh.f32 %v613_v28 }
 0x3f4   :  { %v743_v7 = vpop.permute.xlu1 %742 }
 0x3f5   :  { %v607_v31 = vpop.permute.xlu2 %606 }
 0x3f6   :  { %v2964_v34 = vpop.eup %2963  ;;  %v612_v14 = vadd.f32 %v607_v31, %v592_v30 }
 0x3f7   :  { %620 = vrot.lane.b32.xlu1 %v2964_v34, %s3276_s13 }
 0x3f8   :  { %2965 = vtanh.f32 %v612_v14 }
 0x3f9   :  { %2967 = vtanh.f32 %v696_v39 }
 0x3fe   :  { %v2966_v32 = vpop.eup %2965 }
 0x3ff   :  { %760 = vperm.xlu1 %2906, %v757_v40   ;;  %618 = vrot.lane.b32.xlu2 %v2966_v32, %s3276_s13  ;;  %v2968_v42 = vpop.eup %2967 }
 0x407   :  { %703 = vrot.lane.b32.xlu2 %v2968_v42, %s3276_s13 }
 0x40d   :  { %v690_v44 = vpop.permute.xlu0 %689 }
 0x40e   :  { %v695_v45 = vadd.f32 %v690_v44, %v675_v43  ;;  %v842_v44 = vld [vmem:[#allocation7 + $0x5] sm:$0x1] }
 0x40f   :  { %740 = vrot.lane.b32.xlu2 %v3522_v23, %s3281_s21  ;;  %v791_v23 = vpop.permute.xlu2 %790 }
 0x410   :  { %2969 = vtanh.f32 %v695_v45 }
 0x415   :  { %v724_v46 = vpop.permute.xlu0 %723 }
 0x416   :  { %v2970_v47 = vpop.eup %2969  ;;  %vm726_vm9 = vcmp.eq.s32.totalorder %v724_v46, 1  ;;  %v843_v46 = vld [vmem:[#allocation7 + $0xd] sm:$0x1] }
 0x417   :  { %701 = vrot.lane.b32.xlu0 %v2970_v47, %s3276_s13  ;;  %v728_v48 = vsel %vm726_vm9, %v613_v28, %v589_v25 }
 0x418   :  { %v731_v50 = vrot.slane %v728_v48, 7 }
 0x41d   :  { %v721_v49 = vpop.permute.xlu0 %720 }
 0x41e   :  { %vm725_vm10 = vcmp.eq.s32.totalorder %v721_v49, 1 }
 0x41f   :  { %788 = vrot.lane.b32.xlu0 %v785_v19, %s3281_s21  ;;  %v727_v53 = vsel %vm725_vm10, %v612_v14, %v587_v29  ;;  %v3597_v14 = vld [vmem:[#allocation10 + $0x18] sm:$0xff] }
 0x420   :  { %v732_v54 = vsel %vm404_vm8, %v731_v50, %v727_v53 }
 0x427   :  { %771 = vrot.lane.b32.xlu0 %v768_v56, %s3279_s4 }
 0x459   :  { %v619_v4 = vpop.permute.xlu2 %618 }
 0x45a   :  { %v624_v62 = vmul.f32 %v619_v4, %v3530_v12 }
 0x461   :  { %v704_v51 = vpop.permute.xlu2 %703 }
 0x462   :  { %v708_v5 = vmul.f32 %v704_v51, %v3514_v35 }
 0x464   :  { %v795_v6 = vsel %vm766_vm11, %v708_v5, %v791_v23 }
 0x465   :  { %v798_v10 = vrot.slane %v795_v6, 7 }
 0x469   :  { %v621_v58 = vpop.permute.xlu1 %620  ;;  %v741_v61 = vpop.permute.xlu2 %740 }
 0x46a   :  { %v625_v59 = vmul.f32 %v621_v58, %v3526_v60  ;;  %v746_v1 = vsel %vm725_vm10, %v624_v62, %v741_v61 }
 0x46c   :  { %v747_v63 = vsel %vm726_vm9, %v625_v59, %v743_v7 }
 0x46d   :  { %v750_v0 = vrot.slane %v747_v63, 7 }
 0x46f   :  { %v751_v2 = vsel %vm404_vm8, %v750_v0, %v746_v1 }
 0x470   :  { %752 = vrot.lane.b32.xlu1 %v751_v2, %s3279_s4 }
 0x471   :  { %v761_v60 = vpop.permute.xlu1 %760 }
 0x472   :  { %vm765_vm12 = vcmp.eq.s32.totalorder %v761_v60, 1 }
 0x478   :  { %769 = vrot.lane.b32.xlu1 %v756_v55, %s3279_s4 }
 0x489   :  { %v702_v3 = vpop.permute.xlu0 %701 }
 0x48a   :  { %v707_v8 = vmul.f32 %v702_v3, %v3532_v15 }
 0x491   :  { %v789_v9 = vpop.permute.xlu0 %788 }
 0x492   :  { %v794_v11 = vsel %vm765_vm12, %v707_v8, %v789_v9 }
 0x493   :  { %v799_v12 = vsel %vm404_vm8, %v798_v10, %v794_v11 }
 0x494   :  { %800 = vrot.lane.b32.xlu2 %v799_v12, %s3279_s4 }
 0x499   :  { %v772_v35 = vpop.permute.xlu0 %771 }
 0x49a   :  { %v776_v16 = vsel %vm766_vm11, %v696_v39, %v772_v35 }
 0x49b   :  { %v779_v17 = vrot.slane %v776_v16, 7 }
 0x49c   :  { %733 = vrot.lane.b32.xlu2 %v732_v54, %s3281_s21 }
 0x4e2   :  { %v753_v13 = vpop.permute.xlu1 %752 }
 0x4e3   :  { %755 = vst.msk [vmem:[#allocation2] sm:$0x3] %vm124_vm0, %v753_v13 }
 0x4ea   :  { %v804_v18 = vld [vmem:[#allocation2] sm:$0x3]  ;;  %v770_v19 = vpop.permute.xlu1 %769 }
 0x4eb   :  { %v818_v15 = vld [vmem:[#allocation2] sm:$0x3]  ;;  %v806_v20 = vrot.slane %v804_v18, 1  ;;  %808 = vst.msk [vmem:[#allocation12 + $0x1] sm:$0x1] %vm482_vm13, %v804_v18  ;;  %v775_v21 = vsel %vm765_vm12, %v695_v45, %v770_v19 }
 0x4ec   :  { %v819_v22 = vpack.c.bf16 %v818_v15, %v818_v15  ;;  %v780_v24 = vsel %vm404_vm8, %v779_v17, %v775_v21 }
 0x4ed   :  { %809 = vst.msk [vmem:[#allocation12 + $0x9] sm:$0x1] %vm482_vm13, %v806_v20  ;;  %781 = vrot.lane.b32.xlu0 %v780_v24, %s3281_s21 }
 0x4ee   :  { %2851 = vmatmul.msk.bf16.vlgmr.msrb.gmra.mxu0 %vm154_vm1, %v819_v22  ;;  %v801_v25 = vpop.permute.xlu2 %800 }
 0x4ef   :  { %2129 = vmatpush.bf16.msrb.mxu0 %v3586_v26  ;;  %803 = vst.msk [vmem:[#allocation4] sm:$0x3] %vm124_vm0, %v801_v25 }
 0x4f3   :  { %2130 = vmatpush.bf16.msrb.mxu0 %v3590_v27 }
 0x4f6   :  { %v810_v28 = vld [vmem:[#allocation4] sm:$0x3]  ;;  %v734_v29 = vpop.permute.xlu2 %733 }
 0x4f7   :  { %v844_v30 = vld [vmem:[#allocation4] sm:$0x3]  ;;  %v812_v31 = vrot.slane %v810_v28, 1  ;;  %814 = vst.msk [vmem:[#allocation13 + $0x6] sm:$0x1] %vm482_vm13, %v810_v28 }
 0x4f8   :  { %v845_v34 = vpack.c.bf16 %v844_v30, %v844_v30  ;;  %736 = vst.msk [vmem:[#allocation3] sm:$0x3] %vm124_vm0, %v734_v29  ;;  %v1039_v28 = vld [vmem:[%s4161_s3 + $0xd] sm:$0x1] }
 0x4f9   :  { %815 = vst.msk [vmem:[#allocation13 + $0xe] sm:$0x1] %vm482_vm13, %v812_v31  ;;  %vm1041_vm5 = vcmp.gt.f32.partialorder %v1039_v28, 0.0 }
 0x4fa   :  { %2852 = vmatmul.msk.bf16.vlgmr.msrb.gmra.mxu1 %vm154_vm1, %v845_v34 }
 0x4fb   :  { %2155 = vmatpush.bf16.msrb.mxu1 %v3597_v14 }
 0x4ff   :  { %2156 = vmatpush.bf16.msrb.mxu1 %v3600_v36  ;;  %v868_v57 = vld [vmem:[#allocation3] sm:$0x3] }
 0x500   :  { %v910_v4 = vrot.slane %v868_v57, 1 }
 0x55f   :  { %v782_v33 = vpop.permute.xlu0 %781 }
 0x560   :  { %784 = vst.msk [vmem:[#allocation5] sm:$0x3] %vm124_vm0, %v782_v33 }
 0x567   :  { %v951_v50 = vld [vmem:[#allocation5] sm:$0x3] }
 0x568   :  { %v993_v54 = vrot.slane %v951_v50, 1 }
 0x56b   :  { %v832_v39 = vpop.f32.mrf.mxu0 }
 0x56c   :  { %v837_v40 = vrot.slane %v832_v39, 1  ;;  %v840_v32 = vadd.f32 %v832_v39, %v816_v37 }
 0x56e   :  { %v841_v41 = vadd.f32 %v837_v40, %v817_v38  ;;  %2971 = vtanh.f32 %v840_v32  ;;  %v2853_v61 = vmul.f32 -1.442695, %v840_v32  ;;  %v1083_v38 = vsel %vm1041_vm5, 1, %v3280_v52 }
 0x570   :  { %2973 = vtanh.f32 %v841_v41  ;;  %v2854_v58 = vmul.f32 -1.442695, %v841_v41 }
 0x573   :  { %v834_v42 = vpop.f32.mrf.mxu0 }
 0x574   :  { %v2972_v43 = vpop.eup %2971 }
 0x575   :  { %921 = vrot.lane.b32.xlu0 %v2972_v43, %s3276_s13 }
 0x576   :  { %v2974_v45 = vpop.eup %2973 }
 0x577   :  { %v858_v47 = vpop.f32.mrf.mxu1  ;;  %923 = vrot.lane.b32.xlu1 %v2974_v45, %s3276_s13 }
 0x578   :  { %v863_v48 = vrot.slane %v858_v47, 1  ;;  %v866_v49 = vadd.f32 %v858_v47, %v842_v44  ;;  %v3632_v47 = vld [vmem:[#allocation2] sm:$0x3] }
 0x57a   :  { %v867_v53 = vadd.f32 %v863_v48, %v843_v46  ;;  %2975 = vtanh.f32 %v866_v49  ;;  %v2855_v62 = vmul.f32 -1.442695, %v866_v49 }
 0x57c   :  { %2977 = vtanh.f32 %v867_v53  ;;  %v2856_v7 = vmul.f32 -1.442695, %v867_v53 }
 0x57d   :  { %996 = vrot.lane.b32.xlu0 %v993_v54, %s3279_s4 }
 0x57e   :  { %2979 = vpow2.f32 %v2856_v7 }
 0x57f   :  { %v860_v55 = vpop.f32.mrf.mxu1  ;;  %2981 = vpow2.f32 %v2854_v58 }
 0x580   :  { %v2976_v56 = vpop.eup %2975  ;;  %v1064_v55 = vrot.slane %v3632_v47, 1 }
 0x581   :  { %1004 = vrot.lane.b32.xlu1 %v2976_v56, %s3276_s13 }
 0x582   :  { %v2978_v23 = vpop.eup %2977 }
 0x583   :  { %1006 = vrot.lane.b32.xlu2 %v2978_v23, %s3276_s13 }
 0x584   :  { %v2980_v51 = vpop.eup %2979 }
 0x585   :  { %994 = vrot.lane.b32.xlu0 %v951_v50, %s3279_s4  ;;  %v959_v59 = vadd.f32 1.0, %v2980_v51  ;;  %v2982_v63 = vpop.eup %2981 }
 0x586   :  { %v876_v1 = vadd.f32 1.0, %v2982_v63  ;;  %v1110_v63 = vld [vmem:[#allocation4] sm:$0x3] }
 0x587   :  { %2983 = vrcp.f32 %v959_v59  ;;  %v986_v13 = vand.u32 2147483648, %v959_v59  ;;  %vm980_vm15 = vweird.f32 %v959_v59  ;;  %v984_v35 = vand.u32 2147483647, %v959_v59 }
 0x588   :  { %2985 = vpow2.f32 %v2853_v61  ;;  %v903_v34 = vand.u32 2147483648, %v876_v1  ;;  %vm897_vm6 = vweird.f32 %v876_v1  ;;  %v901_v37 = vand.u32 2147483647, %v876_v1 }
 0x589   :  { %911 = vrot.lane.b32.xlu1 %v868_v57, %s3279_s4  ;;  %2987 = vpow2.f32 %v2855_v62  ;;  %v987_v19 = vor.u32 1.1754944e-38, %v986_v13  ;;  %vm985_vm3 = vcmp.eq.f32.partialorder %v984_v35, 8.507059e+37  ;;  %v1035_v62 = vld [vmem:[%s4160_s2 + $0xa] sm:$0x1]  ;;  %v1038_v35 = vld [vmem:[%s4161_s3 + $0x5] sm:$0x1] }
 0x58a   :  { %2989 = vrcp.f32 %v876_v1  ;;  %v904_v32 = vor.u32 1.1754944e-38, %v903_v34  ;;  %vm902_vm9 = vcmp.eq.f32.partialorder %v901_v37, 8.507059e+37  ;;  %vm1037_vm5 = vcmp.gt.f32.partialorder %v1035_v62, 0.0 }
 0x58b   :  { %913 = vrot.lane.b32.xlu2 %v910_v4, %s3279_s4 }
 0x58d   :  { %v2984_v0 = vpop.eup %2983 }
 0x58e   :  { %v976_v2 = vmul.f32 %v2984_v0, %v959_v59  ;;  %v2986_v3 = vpop.eup %2985  ;;  %vm981_vm14 = vweird.f32 %v2984_v0 }
 0x58f   :  { %v2988_v6 = vpop.eup %2987  ;;  %v3612_v60 = vadd.f32 1.0, %v2986_v3  ;;  %vm982_vm2 = vmor %vm980_vm15, %vm981_vm14 }
 0x590   :  { %v977_v5 = vsub.f32 1.0, %v976_v2  ;;  %v3614_v8 = vadd.f32 1.0, %v2988_v6  ;;  %v2990_v10 = vpop.eup %2989  ;;  %v1034_v2 = vld [vmem:[%s4160_s2 + $0x2] sm:$0x1] }
 0x591   :  { %2991 = vrcp.f32 %v3612_v60  ;;  %v893_v12 = vmul.f32 %v2990_v10, %v876_v1  ;;  %vm898_vm4 = vweird.f32 %v2990_v10  ;;  %v888_v46 = vand.u32 2147483648, %v3612_v60 }
 0x592   :  { %v978_v9 = vmul.f32 %v2984_v0, %v977_v5  ;;  %2993 = vrcp.f32 %v3614_v8  ;;  %vm899_vm7 = vmor %vm897_vm6, %vm898_vm4  ;;  %vm882_vm12 = vweird.f32 %v3612_v60  ;;  %v886_v49 = vand.u32 2147483647, %v3612_v60 }
 0x593   :  { %v894_v17 = vsub.f32 1.0, %v893_v12  ;;  %v971_v50 = vand.u32 2147483648, %v3614_v8  ;;  %vm965_vm15 = vweird.f32 %v3614_v8  ;;  %v969_v53 = vand.u32 2147483647, %v3614_v8 }
 0x594   :  { %v979_v11 = vadd.f32 %v2984_v0, %v978_v9  ;;  %v889_v23 = vor.u32 1.1754944e-38, %v888_v46  ;;  %v1043_v1 = vsel %vm1037_vm5, 1, %v3280_v52  ;;  %vm1036_vm6 = vcmp.gt.f32.partialorder %v1034_v2, 0.0 }
 0x595   :  { %v895_v24 = vmul.f32 %v2990_v10, %v894_v17  ;;  %v972_v4 = vor.u32 1.1754944e-38, %v971_v50  ;;  %vm970_vm4 = vcmp.eq.f32.partialorder %v969_v53, 8.507059e+37  ;;  %v1042_v3 = vsel %vm1036_vm6, 1, %v3280_v52 }
 0x596   :  { %v983_v16 = vsel %vm982_vm2, %v2984_v0, %v979_v11  ;;  %v1112_v0 = vrot.slane %v1110_v63, 1 }
 0x597   :  { %v2992_v18 = vpop.eup %2991  ;;  %v3618_v20 = vsel %vm985_vm3, %v987_v19, %v983_v16  ;;  %v896_v30 = vadd.f32 %v2990_v10, %v895_v24  ;;  %vm887_vm3 = vcmp.eq.f32.partialorder %v886_v49, 8.507059e+37 }
 0x598   :  { %v2994_v15 = vpop.eup %2993  ;;  %v878_v25 = vmul.f32 %v2992_v18, %v3612_v60  ;;  %vm883_vm10 = vweird.f32 %v2992_v18 }
 0x599   :  { %v961_v29 = vmul.f32 %v2994_v15, %v3614_v8  ;;  %v900_v39 = vsel %vm899_vm7, %v2990_v10, %v896_v30  ;;  %vm966_vm11 = vweird.f32 %v2994_v15  ;;  %vm884_vm14 = vmor %vm882_vm12, %vm883_vm10  ;;  %vm1040_vm7 = vcmp.gt.f32.partialorder %v1038_v35, 0.0 }
 0x59a   :  { %v879_v31 = vsub.f32 1.0, %v878_v25  ;;  %v3628_v42 = vsel %vm902_vm9, %v904_v32, %v900_v39  ;;  %vm967_vm2 = vmor %vm965_vm15, %vm966_vm11 }
 0x59b   :  { %v962_v33 = vsub.f32 1.0, %v961_v29 }
 0x59c   :  { %v880_v40 = vmul.f32 %v2992_v18, %v879_v31 }
 0x59d   :  { %v963_v41 = vmul.f32 %v2994_v15, %v962_v33 }
 0x59e   :  { %v881_v44 = vadd.f32 %v2992_v18, %v880_v40  ;;  %v1081_v40 = vld [vmem:[#allocation5] sm:$0x3] }
 0x59f   :  { %v964_v48 = vadd.f32 %v2994_v15, %v963_v41  ;;  %v1093_v32 = vrot.slane %v1081_v40, 1 }
 0x5a0   :  { %v885_v54 = vsel %vm884_vm14, %v2992_v18, %v881_v44 }
 0x5a1   :  { %v968_v57 = vsel %vm967_vm2, %v2994_v15, %v964_v48  ;;  %v3642_v7 = vsel %vm887_vm3, %v889_v23, %v885_v54  ;;  %v1082_v15 = vsel %vm1040_vm7, 1, %v3280_v52 }
 0x5a2   :  { %v3645_v58 = vsel %vm970_vm4, %v972_v4, %v968_v57 }
 0x5dd   :  { %v1007_v21 = vpop.permute.xlu2 %1006 }
 0x5de   :  { %v1011_v22 = vmul.f32 %v1007_v21, %v3618_v20 }
 0x5e0   :  { %1016 = vrot.lane.b32.xlu1 %v1011_v22, %s3279_s4 }
 0x5e5   :  { %v914_v5 = vpop.permute.xlu2 %913 }
 0x5e6   :  { %v918_v6 = vmul.f32 %v914_v5, %v3628_v42 }
 0x5e7   :  { %v922_v56 = vpop.permute.xlu0 %921 }
 0x5e8   :  { %1088 = vperm.xlu1 %2906, %v1083_v38   ;;  %v927_v51 = vmul.f32 %v922_v56, %v3642_v7 }
 0x5e9   :  { %v924_v43 = vpop.permute.xlu1 %923 }
 0x5ea   :  { %v928_v45 = vmul.f32 %v924_v43, %v3628_v42 }
 0x5ec   :  { %933 = vrot.lane.b32.xlu2 %v928_v45, %s3279_s4 }
 0x5ef   :  { %v997_v16 = vpop.permute.xlu0 %996 }
 0x5f0   :  { %1067 = vrot.lane.b32.xlu1 %v1064_v55, %s3281_s21  ;;  %v1001_v18 = vmul.f32 %v997_v16, %v3618_v20  ;;  %v1142_v16 = vld [vmem:[#allocation6 + $0xb] sm:$0x1] }
 0x5f3   :  { %v1005_v59 = vpop.permute.xlu1 %1004 }
 0x5f4   :  { %v1010_v61 = vmul.f32 %v1005_v59, %v3645_v58  ;;  %931 = vrot.lane.b32.xlu2 %v927_v51, %s3279_s4 }
 0x5f6   :  { %1014 = vrot.lane.b32.xlu0 %v1010_v61, %s3279_s4 }
 0x5f7   :  { %v995_v24 = vpop.permute.xlu0 %994 }
 0x5f8   :  { %v1000_v25 = vmul.f32 %v995_v24, %v3645_v58  ;;  %v1167_v24 = vld [vmem:[#allocation7 + $0x4] sm:$0x1] }
 0x5fb   :  { %v912_v9 = vpop.permute.xlu1 %911 }
 0x5fc   :  { %1115 = vrot.lane.b32.xlu2 %v1112_v0, %s3281_s21  ;;  %v917_v10 = vmul.f32 %v912_v9, %v3642_v7 }
 0x5fe   :  { %1048 = vperm.xlu0 %2905, %v1043_v1  }
 0x606   :  { %1045 = vperm.xlu0 %2905, %v1042_v3  }
 0x646   :  { %v934_v60 = vpop.permute.xlu2 %933 }
 0x647   :  { %v938_v8 = vadd.f32 %v934_v60, %v918_v6 }
 0x649   :  { %2995 = vtanh.f32 %v938_v8 }
 0x64e   :  { %v932_v11 = vpop.permute.xlu2 %931 }
 0x64f   :  { %v2996_v12 = vpop.eup %2995  ;;  %v937_v13 = vadd.f32 %v932_v11, %v917_v10 }
 0x650   :  { %945 = vrot.lane.b32.xlu1 %v2996_v12, %s3276_s13 }
 0x651   :  { %2997 = vtanh.f32 %v937_v13 }
 0x652   :  { %v1017_v17 = vpop.permute.xlu1 %1016 }
 0x653   :  { %v1021_v19 = vadd.f32 %v1017_v17, %v1001_v18 }
 0x655   :  { %2999 = vtanh.f32 %v1021_v19 }
 0x656   :  { %v1116_v41 = vpop.permute.xlu2 %1115 }
 0x657   :  { %v2998_v21 = vpop.eup %2997 }
 0x658   :  { %943 = vrot.lane.b32.xlu2 %v2998_v21, %s3276_s13  ;;  %1085 = vperm.xlu1 %2906, %v1082_v15  }
 0x65a   :  { %v1089_v43 = vpop.permute.xlu1 %1088 }
 0x65b   :  { %v3000_v22 = vpop.eup %2999  ;;  %vm1091_vm11 = vcmp.eq.s32.totalorder %v1089_v43, 1 }
 0x660   :  { %1028 = vrot.lane.b32.xlu2 %v3000_v22, %s3276_s13 }
 0x662   :  { %v1068_v45 = vpop.permute.xlu1 %1067 }
 0x668   :  { %v1015_v28 = vpop.permute.xlu0 %1014  ;;  %1065 = vrot.lane.b32.xlu2 %v3632_v47, %s3281_s21 }
 0x669   :  { %v1020_v29 = vadd.f32 %v1015_v28, %v1000_v25 }
 0x66b   :  { %3001 = vtanh.f32 %v1020_v29 }
 0x670   :  { %v1049_v30 = vpop.permute.xlu0 %1048 }
 0x671   :  { %v3002_v31 = vpop.eup %3001  ;;  %vm1051_vm9 = vcmp.eq.s32.totalorder %v1049_v30, 1 }
 0x672   :  { %1026 = vrot.lane.b32.xlu0 %v3002_v31, %s3276_s13  ;;  %v1053_v34 = vsel %vm1051_vm9, %v938_v8, %v914_v5 }
 0x673   :  { %v1056_v37 = vrot.slane %v1053_v34, 7 }
 0x678   :  { %v1046_v33 = vpop.permute.xlu0 %1045 }
 0x679   :  { %vm1050_vm10 = vcmp.eq.s32.totalorder %v1046_v33, 1 }
 0x67a   :  { %1113 = vrot.lane.b32.xlu0 %v1110_v63, %s3281_s21  ;;  %v1052_v38 = vsel %vm1050_vm10, %v937_v13, %v912_v9 }
 0x67b   :  { %v1057_v39 = vsel %vm404_vm8, %v1056_v37, %v1052_v38 }
 0x682   :  { %1096 = vrot.lane.b32.xlu0 %v1093_v32, %s3279_s4 }
 0x6b2   :  { %v944_v44 = vpop.permute.xlu2 %943 }
 0x6b3   :  { %v949_v50 = vmul.f32 %v944_v44, %v3642_v7 }
 0x6ba   :  { %v1029_v46 = vpop.permute.xlu2 %1028 }
 0x6bb   :  { %v1033_v57 = vmul.f32 %v1029_v46, %v3618_v20 }
 0x6bd   :  { %v1120_v4 = vsel %vm1091_vm11, %v1033_v57, %v1116_v41 }
 0x6be   :  { %v1123_v59 = vrot.slane %v1120_v4, 7 }
 0x6c2   :  { %v946_v47 = vpop.permute.xlu1 %945  ;;  %v1066_v49 = vpop.permute.xlu2 %1065 }
 0x6c3   :  { %v950_v48 = vmul.f32 %v946_v47, %v3628_v42  ;;  %v1071_v55 = vsel %vm1050_vm10, %v949_v50, %v1066_v49 }
 0x6c5   :  { %v1072_v53 = vsel %vm1051_vm9, %v950_v48, %v1068_v45 }
 0x6c6   :  { %v1075_v54 = vrot.slane %v1072_v53, 7 }
 0x6c8   :  { %v1076_v56 = vsel %vm404_vm8, %v1075_v54, %v1071_v55 }
 0x6c9   :  { %1077 = vrot.lane.b32.xlu1 %v1076_v56, %s3279_s4 }
 0x6ca   :  { %v1086_v42 = vpop.permute.xlu1 %1085 }
 0x6cb   :  { %vm1090_vm12 = vcmp.eq.s32.totalorder %v1086_v42, 1 }
 0x6d1   :  { %1094 = vrot.lane.b32.xlu1 %v1081_v40, %s3279_s4 }
 0x6e4   :  { %v1027_v23 = vpop.permute.xlu0 %1026 }
 0x6e5   :  { %v1032_v51 = vmul.f32 %v1027_v23, %v3645_v58 }
 0x6ec   :  { %v1114_v7 = vpop.permute.xlu0 %1113 }
 0x6ed   :  { %v1119_v61 = vsel %vm1090_vm12, %v1032_v51, %v1114_v7 }
 0x6ee   :  { %v1124_v62 = vsel %vm404_vm8, %v1123_v59, %v1119_v61 }
 0x6ef   :  { %1125 = vrot.lane.b32.xlu2 %v1124_v62, %s3279_s4 }
 0x6f4   :  { %v1097_v20 = vpop.permute.xlu0 %1096 }
 0x6f5   :  { %v1101_v0 = vsel %vm1091_vm11, %v1021_v19, %v1097_v20 }
 0x6f6   :  { %v1104_v1 = vrot.slane %v1101_v0, 7 }
 0x6f7   :  { %1058 = vrot.lane.b32.xlu2 %v1057_v39, %s3281_s21 }
 0x73b   :  { %v1078_v63 = vpop.permute.xlu1 %1077 }
 0x73c   :  { %1080 = vst.msk [vmem:[#allocation2] sm:$0x3] %vm124_vm0, %v1078_v63 }
 0x743   :  { %v1129_v2 = vld [vmem:[#allocation2] sm:$0x3]  ;;  %v1095_v3 = vpop.permute.xlu1 %1094 }
 0x744   :  { %v1143_v58 = vld [vmem:[#allocation2] sm:$0x3]  ;;  %v1131_v5 = vrot.slane %v1129_v2, 1  ;;  %1133 = vst.msk [vmem:[#allocation12 + $0x2] sm:$0x1] %vm482_vm13, %v1129_v2  ;;  %v1100_v6 = vsel %vm1090_vm12, %v1020_v29, %v1095_v3 }
 0x745   :  { %v1144_v60 = vpack.c.bf16 %v1143_v58, %v1143_v58  ;;  %v1105_v8 = vsel %vm404_vm8, %v1104_v1, %v1100_v6  ;;  %v1364_v6 = vld [vmem:[%s4161_s3 + $0xc] sm:$0x1] }
 0x746   :  { %1134 = vst.msk [vmem:[#allocation12 + $0xa] sm:$0x1] %vm482_vm13, %v1131_v5  ;;  %1106 = vrot.lane.b32.xlu0 %v1105_v8, %s3281_s21  ;;  %vm1366_vm5 = vcmp.gt.f32.partialorder %v1364_v6, 0.0 }
 0x747   :  { %2857 = vmatmul.msk.bf16.vlgmr.msrb.gmra.mxu2 %vm154_vm1, %v1144_v60 }
 0x748   :  { %2454 = vmatpush.bf16.msrb.mxu2 %v3586_v26 }
 0x749   :  { %v1126_v9 = vpop.permute.xlu2 %1125 }
 0x74a   :  { %1128 = vst.msk [vmem:[#allocation4] sm:$0x3] %vm124_vm0, %v1126_v9 }
 0x74c   :  { %2455 = vmatpush.bf16.msrb.mxu2 %v3590_v27  ;;  %v1141_v27 = vld [vmem:[#allocation6 + $0x3] sm:$0x1] }
 0x751   :  { %v1135_v10 = vld [vmem:[#allocation4] sm:$0x3]  ;;  %v1059_v11 = vpop.permute.xlu2 %1058 }
 0x752   :  { %v1169_v12 = vld [vmem:[#allocation4] sm:$0x3]  ;;  %v1137_v13 = vrot.slane %v1135_v10, 1  ;;  %1139 = vst.msk [vmem:[#allocation13 + $0x5] sm:$0x1] %vm482_vm13, %v1135_v10 }
 0x753   :  { %v1170_v35 = vpack.c.bf16 %v1169_v12, %v1169_v12  ;;  %1061 = vst.msk [vmem:[#allocation3] sm:$0x3] %vm124_vm0, %v1059_v11 }
 0x754   :  { %1140 = vst.msk [vmem:[#allocation13 + $0xd] sm:$0x1] %vm482_vm13, %v1137_v13 }
 0x755   :  { %2858 = vmatmul.msk.bf16.vlgmr.msrb.gmra.mxu3 %vm154_vm1, %v1170_v35 }
 0x756   :  { %2480 = vmatpush.bf16.msrb.mxu3 %v3597_v14  ;;  %v1168_v14 = vld [vmem:[#allocation7 + $0xc] sm:$0x1] }
 0x75a   :  { %2481 = vmatpush.bf16.msrb.mxu3 %v3600_v36  ;;  %v1193_v39 = vld [vmem:[#allocation3] sm:$0x3] }
 0x75b   :  { %v1235_v40 = vrot.slane %v1193_v39, 1 }
 0x7b8   :  { %v1107_v26 = vpop.permute.xlu0 %1106 }
 0x7b9   :  { %1109 = vst.msk [vmem:[#allocation5] sm:$0x3] %vm124_vm0, %v1107_v26  ;;  %v1408_v26 = vsel %vm1366_vm5, 1, %v3280_v52 }
 0x7c0   :  { %v1276_v28 = vld [vmem:[#allocation5] sm:$0x3] }
 0x7c1   :  { %v1318_v34 = vrot.slane %v1276_v28, 1 }
 0x7ca   :  { %v1157_v17 = vpop.f32.mrf.mxu2 }
 0x7cb   :  { %v1162_v18 = vrot.slane %v1157_v17, 1  ;;  %v1165_v19 = vadd.f32 %v1157_v17, %v1141_v27 }
 0x7cd   :  { %v1166_v15 = vadd.f32 %v1162_v18, %v1142_v16  ;;  %3003 = vtanh.f32 %v1165_v19  ;;  %v2859_v45 = vmul.f32 -1.442695, %v1165_v19 }
 0x7cf   :  { %3005 = vtanh.f32 %v1166_v15  ;;  %v2860_v43 = vmul.f32 -1.442695, %v1166_v15 }
 0x7d2   :  { %v1159_v21 = vpop.f32.mrf.mxu2 }
 0x7d3   :  { %v3004_v22 = vpop.eup %3003 }
 0x7d4   :  { %1246 = vrot.lane.b32.xlu0 %v3004_v22, %s3276_s13 }
 0x7d5   :  { %v3006_v25 = vpop.eup %3005 }
 0x7d6   :  { %1248 = vrot.lane.b32.xlu1 %v3006_v25, %s3276_s13 }
 0x7d8   :  { %v1183_v36 = vpop.f32.mrf.mxu3 }
 0x7d9   :  { %v1188_v29 = vrot.slane %v1183_v36, 1  ;;  %v1191_v30 = vadd.f32 %v1183_v36, %v1167_v24  ;;  %v1387_v24 = vld [vmem:[#allocation2] sm:$0x3] }
 0x7db   :  { %v1192_v31 = vadd.f32 %v1188_v29, %v1168_v14  ;;  %3007 = vtanh.f32 %v1191_v30  ;;  %v2861_v47 = vmul.f32 -1.442695, %v1191_v30  ;;  %v1389_v30 = vrot.slane %v1387_v24, 1 }
 0x7dc   :  { %1321 = vrot.lane.b32.xlu0 %v1318_v34, %s3279_s4 }
 0x7dd   :  { %3009 = vtanh.f32 %v1192_v31  ;;  %v2862_v32 = vmul.f32 -1.442695, %v1192_v31 }
 0x7df   :  { %3011 = vpow2.f32 %v2862_v32 }
 0x7e0   :  { %v1185_v33 = vpop.f32.mrf.mxu3  ;;  %3013 = vpow2.f32 %v2860_v43  ;;  %v1435_v43 = vld [vmem:[#allocation4] sm:$0x3] }
 0x7e1   :  { %v3008_v37 = vpop.eup %3007 }
 0x7e2   :  { %1329 = vrot.lane.b32.xlu1 %v3008_v37, %s3276_s13 }
 0x7e3   :  { %v3010_v38 = vpop.eup %3009 }
 0x7e4   :  { %1331 = vrot.lane.b32.xlu2 %v3010_v38, %s3276_s13  ;;  %1319 = vrot.lane.b32.xlu0 %v1276_v28, %s3279_s4 }
 0x7e5   :  { %v3012_v41 = vpop.eup %3011 }
 0x7e6   :  { %v1284_v44 = vadd.f32 1.0, %v3012_v41  ;;  %v3014_v46 = vpop.eup %3013  ;;  %v1360_v41 = vld [vmem:[%s4160_s2 + $0xb] sm:$0x1] }
 0x7e7   :  { %v1201_v49 = vadd.f32 1.0, %v3014_v46  ;;  %vm1362_vm5 = vcmp.gt.f32.partialorder %v1360_v41, 0.0  ;;  %v1359_v46 = vld [vmem:[%s4160_s2 + $0x3] sm:$0x1] }
 0x7e8   :  { %3015 = vrcp.f32 %v1284_v44  ;;  %v1311_v7 = vand.u32 2147483648, %v1284_v44  ;;  %vm1305_vm15 = vweird.f32 %v1284_v44  ;;  %v1309_v59 = vand.u32 2147483647, %v1284_v44 }
 0x7e9   :  { %3017 = vpow2.f32 %v2859_v45  ;;  %v1228_v10 = vand.u32 2147483648, %v1201_v49  ;;  %vm1222_vm6 = vweird.f32 %v1201_v49  ;;  %v1226_v11 = vand.u32 2147483647, %v1201_v49 }
 0x7ea   :  { %1236 = vrot.lane.b32.xlu1 %v1193_v39, %s3279_s4  ;;  %3019 = vpow2.f32 %v2861_v47  ;;  %v1312_v20 = vor.u32 1.1754944e-38, %v1311_v7  ;;  %vm1310_vm3 = vcmp.eq.f32.partialorder %v1309_v59, 8.507059e+37  ;;  %v1368_v45 = vsel %vm1362_vm5, 1, %v3280_v52 }
 0x7eb   :  { %3021 = vrcp.f32 %v1201_v49  ;;  %v1229_v27 = vor.u32 1.1754944e-38, %v1228_v10  ;;  %vm1227_vm9 = vcmp.eq.f32.partialorder %v1226_v11, 8.507059e+37  ;;  %v1406_v11 = vld [vmem:[#allocation5] sm:$0x3] }
 0x7ec   :  { %1238 = vrot.lane.b32.xlu2 %v1235_v40, %s3279_s4 }
 0x7ee   :  { %v3016_v48 = vpop.eup %3015 }
 0x7ef   :  { %v1301_v50 = vmul.f32 %v3016_v48, %v1284_v44  ;;  %v3018_v53 = vpop.eup %3017  ;;  %vm1306_vm14 = vweird.f32 %v3016_v48  ;;  %v1437_v44 = vrot.slane %v1435_v43, 1 }
 0x7f0   :  { %v3020_v55 = vpop.eup %3019  ;;  %v3716_v56 = vadd.f32 1.0, %v3018_v53  ;;  %vm1307_vm2 = vmor %vm1305_vm15, %vm1306_vm14 }
 0x7f1   :  { %v1302_v54 = vsub.f32 1.0, %v1301_v50  ;;  %v3022_v23 = vpop.eup %3021  ;;  %v3718_v4 = vadd.f32 1.0, %v3020_v55 }
 0x7f2   :  { %3023 = vrcp.f32 %v3716_v56  ;;  %v1218_v42 = vmul.f32 %v3022_v23, %v1201_v49  ;;  %vm1223_vm4 = vweird.f32 %v3022_v23  ;;  %v1213_v21 = vand.u32 2147483648, %v3716_v56 }
 0x7f3   :  { %v1303_v57 = vmul.f32 %v3016_v48, %v1302_v54  ;;  %3025 = vrcp.f32 %v3718_v4  ;;  %vm1224_vm7 = vmor %vm1222_vm6, %vm1223_vm4  ;;  %vm1207_vm11 = vweird.f32 %v3716_v56  ;;  %v1211_v22 = vand.u32 2147483647, %v3716_v56 }
 0x7f4   :  { %v1219_v61 = vsub.f32 1.0, %v1218_v42  ;;  %v1296_v36 = vand.u32 2147483648, %v3718_v4  ;;  %v1214_v28 = vor.u32 1.1754944e-38, %v1213_v21  ;;  %vm1290_vm15 = vweird.f32 %v3718_v4 }
 0x7f5   :  { %v1304_v51 = vadd.f32 %v3016_v48, %v1303_v57  ;;  %v1294_v31 = vand.u32 2147483647, %v3718_v4  ;;  %vm1361_vm6 = vcmp.gt.f32.partialorder %v1359_v46, 0.0 }
 0x7f6   :  { %v1220_v3 = vmul.f32 %v3022_v23, %v1219_v61  ;;  %v1297_v38 = vor.u32 1.1754944e-38, %v1296_v36  ;;  %v1367_v47 = vsel %vm1361_vm6, 1, %v3280_v52 }
 0x7f7   :  { %v1308_v63 = vsel %vm1307_vm2, %v3016_v48, %v1304_v51  ;;  %vm1212_vm2 = vcmp.eq.f32.partialorder %v1211_v22, 8.507059e+37  ;;  %vm1295_vm4 = vcmp.eq.f32.partialorder %v1294_v31, 8.507059e+37 }
 0x7f8   :  { %v3024_v62 = vpop.eup %3023  ;;  %v3722_v1 = vsel %vm1310_vm3, %v1312_v20, %v1308_v63  ;;  %v1221_v8 = vadd.f32 %v3022_v23, %v1220_v3 }
 0x7f9   :  { %v3026_v0 = vpop.eup %3025  ;;  %v1203_v58 = vmul.f32 %v3024_v62, %v3716_v56  ;;  %vm1208_vm10 = vweird.f32 %v3024_v62 }
 0x7fa   :  { %v1286_v60 = vmul.f32 %v3026_v0, %v3718_v4  ;;  %v1225_v13 = vsel %vm1224_vm7, %v3022_v23, %v1221_v8  ;;  %vm1209_vm12 = vmor %vm1207_vm11, %vm1208_vm10  ;;  %vm1291_vm14 = vweird.f32 %v3026_v0  ;;  %v1363_v4 = vld [vmem:[%s4161_s3 + $0x4] sm:$0x1] }
 0x7fb   :  { %v1204_v9 = vsub.f32 1.0, %v1203_v58  ;;  %v3732_v16 = vsel %vm1227_vm9, %v1229_v27, %v1225_v13  ;;  %vm1292_vm3 = vmor %vm1290_vm15, %vm1291_vm14  ;;  %vm1365_vm7 = vcmp.gt.f32.partialorder %v1363_v4, 0.0 }
 0x7fc   :  { %v1287_v12 = vsub.f32 1.0, %v1286_v60  ;;  %v1407_v61 = vsel %vm1365_vm7, 1, %v3280_v52 }
 0x7fd   :  { %v1205_v35 = vmul.f32 %v3024_v62, %v1204_v9 }
 0x7fe   :  { %v1288_v18 = vmul.f32 %v3026_v0, %v1287_v12  ;;  %v1418_v12 = vrot.slane %v1406_v11, 1 }
 0x7ff   :  { %v1206_v19 = vadd.f32 %v3024_v62, %v1205_v35 }
 0x800   :  { %v1289_v25 = vadd.f32 %v3026_v0, %v1288_v18 }
 0x801   :  { %v1210_v14 = vsel %vm1209_vm12, %v3024_v62, %v1206_v19 }
 0x802   :  { %v3742_v34 = vsel %vm1212_vm2, %v1214_v28, %v1210_v14  ;;  %v1293_v33 = vsel %vm1292_vm3, %v3026_v0, %v1289_v25 }
 0x803   :  { %v3747_v39 = vsel %vm1295_vm4, %v1297_v38, %v1293_v33 }
 0x83e   :  { %v1332_v2 = vpop.permute.xlu2 %1331 }
 0x83f   :  { %v1336_v5 = vmul.f32 %v1332_v2, %v3722_v1 }
 0x841   :  { %1341 = vrot.lane.b32.xlu1 %v1336_v5, %s3279_s4 }
 0x846   :  { %v1247_v29 = vpop.permute.xlu0 %1246  ;;  %v1239_v48 = vpop.permute.xlu2 %1238 }
 0x847   :  { %v1252_v37 = vmul.f32 %v1247_v29, %v3742_v34  ;;  %v1243_v49 = vmul.f32 %v1239_v48, %v3732_v16 }
 0x848   :  { %v1249_v17 = vpop.permute.xlu1 %1248 }
 0x849   :  { %1413 = vperm.xlu1 %2906, %v1408_v26   ;;  %v1253_v15 = vmul.f32 %v1249_v17, %v3732_v16 }
 0x84b   :  { %1258 = vrot.lane.b32.xlu2 %v1253_v15, %s3279_s4 }
 0x84e   :  { %v1322_v42 = vpop.permute.xlu0 %1321 }
 0x84f   :  { %v1326_v51 = vmul.f32 %v1322_v42, %v3722_v1 }
 0x851   :  { %1392 = vrot.lane.b32.xlu1 %v1389_v30, %s3281_s21 }
 0x853   :  { %1256 = vrot.lane.b32.xlu2 %v1252_v37, %s3279_s4 }
 0x854   :  { %v1330_v40 = vpop.permute.xlu1 %1329 }
 0x855   :  { %v1335_v32 = vmul.f32 %v1330_v40, %v3747_v39 }
 0x856   :  { %v1320_v20 = vpop.permute.xlu0 %1319 }
 0x857   :  { %1339 = vrot.lane.b32.xlu0 %v1335_v32, %s3279_s4  ;;  %v1325_v0 = vmul.f32 %v1320_v20, %v3747_v39 }
 0x85b   :  { %1440 = vrot.lane.b32.xlu2 %v1437_v44, %s3281_s21 }
 0x85c   :  { %v1237_v54 = vpop.permute.xlu1 %1236 }
 0x85d   :  { %v1242_v55 = vmul.f32 %v1237_v54, %v3742_v34 }
 0x85f   :  { %1373 = vperm.xlu0 %2905, %v1368_v45  }
 0x867   :  { %1370 = vperm.xlu0 %2905, %v1367_v47  }
 0x8a5   :  { %v1259_v50 = vpop.permute.xlu2 %1258 }
 0x8a6   :  { %v1263_v53 = vadd.f32 %v1259_v50, %v1243_v49 }
 0x8a8   :  { %3027 = vtanh.f32 %v1263_v53 }
 0x8ad   :  { %v1257_v56 = vpop.permute.xlu2 %1256 }
 0x8ae   :  { %v3028_v23 = vpop.eup %3027  ;;  %v1262_v57 = vadd.f32 %v1257_v56, %v1242_v55 }
 0x8af   :  { %1270 = vrot.lane.b32.xlu1 %v3028_v23, %s3276_s13  ;;  %v1466_v23 = vld [vmem:[#allocation6 + $0x4] sm:$0x1] }
 0x8b0   :  { %3029 = vtanh.f32 %v1262_v57 }
 0x8b3   :  { %v1342_v7 = vpop.permute.xlu1 %1341 }
 0x8b4   :  { %v1346_v59 = vadd.f32 %v1342_v7, %v1326_v51 }
 0x8b5   :  { %v1441_v13 = vpop.permute.xlu2 %1440 }
 0x8b6   :  { %v3030_v62 = vpop.eup %3029  ;;  %3031 = vtanh.f32 %v1346_v59 }
 0x8b7   :  { %1410 = vperm.xlu1 %2906, %v1407_v61   ;;  %1268 = vrot.lane.b32.xlu2 %v3030_v62, %s3276_s13 }
 0x8bb   :  { %v1414_v35 = vpop.permute.xlu1 %1413 }
 0x8bc   :  { %v3032_v63 = vpop.eup %3031  ;;  %vm1416_vm11 = vcmp.eq.s32.totalorder %v1414_v35, 1 }
 0x8bf   :  { %1353 = vrot.lane.b32.xlu2 %v3032_v63, %s3276_s13  ;;  %v1492_v63 = vld [vmem:[#allocation7 + $0x3] sm:$0x1] }
 0x8c3   :  { %v1393_v27 = vpop.permute.xlu1 %1392 }
 0x8c7   :  { %1390 = vrot.lane.b32.xlu2 %v1387_v24, %s3281_s21 }
 0x8c9   :  { %v1340_v2 = vpop.permute.xlu0 %1339 }
 0x8ca   :  { %v1345_v3 = vadd.f32 %v1340_v2, %v1325_v0  ;;  %v1493_v0 = vld [vmem:[#allocation7 + $0xb] sm:$0x1] }
 0x8cc   :  { %3033 = vtanh.f32 %v1345_v3 }
 0x8d1   :  { %v1374_v58 = vpop.permute.xlu0 %1373 }
 0x8d2   :  { %v3034_v5 = vpop.eup %3033  ;;  %vm1376_vm9 = vcmp.eq.s32.totalorder %v1374_v58, 1 }
 0x8d3   :  { %1351 = vrot.lane.b32.xlu0 %v3034_v5, %s3276_s13  ;;  %v1378_v6 = vsel %vm1376_vm9, %v1263_v53, %v1239_v48 }
 0x8d4   :  { %v1381_v8 = vrot.slane %v1378_v6, 7 }
 0x8d9   :  { %v1371_v60 = vpop.permute.xlu0 %1370 }
 0x8da   :  { %vm1375_vm10 = vcmp.eq.s32.totalorder %v1371_v60, 1 }
 0x8db   :  { %v1377_v9 = vsel %vm1375_vm10, %v1262_v57, %v1237_v54  ;;  %1438 = vrot.lane.b32.xlu0 %v1435_v43, %s3281_s21  ;;  %v1467_v57 = vld [vmem:[#allocation6 + $0xc] sm:$0x1] }
 0x8dc   :  { %v1382_v10 = vsel %vm404_vm8, %v1381_v8, %v1377_v9 }
 0x8e3   :  { %1421 = vrot.lane.b32.xlu0 %v1418_v12, %s3279_s4 }
 0x911   :  { %v1269_v26 = vpop.permute.xlu2 %1268 }
 0x912   :  { %v1274_v21 = vmul.f32 %v1269_v26, %v3742_v34 }
 0x919   :  { %v1354_v17 = vpop.permute.xlu2 %1353 }
 0x91a   :  { %v1358_v28 = vmul.f32 %v1354_v17, %v3722_v1 }
 0x91c   :  { %v1445_v29 = vsel %vm1416_vm11, %v1358_v28, %v1441_v13 }
 0x91d   :  { %v1448_v31 = vrot.slane %v1445_v29, 7 }
 0x921   :  { %v1271_v18 = vpop.permute.xlu1 %1270  ;;  %v1391_v15 = vpop.permute.xlu2 %1390 }
 0x922   :  { %v1275_v19 = vmul.f32 %v1271_v18, %v3732_v16  ;;  %v1396_v25 = vsel %vm1375_vm10, %v1274_v21, %v1391_v15 }
 0x924   :  { %v1397_v22 = vsel %vm1376_vm9, %v1275_v19, %v1393_v27 }
 0x925   :  { %v1400_v24 = vrot.slane %v1397_v22, 7 }
 0x927   :  { %v1401_v14 = vsel %vm404_vm8, %v1400_v24, %v1396_v25 }
 0x928   :  { %1402 = vrot.lane.b32.xlu1 %v1401_v14, %s3279_s4 }
 0x929   :  { %v1411_v16 = vpop.permute.xlu1 %1410 }
 0x92a   :  { %vm1415_vm12 = vcmp.eq.s32.totalorder %v1411_v16, 1 }
 0x930   :  { %1419 = vrot.lane.b32.xlu1 %v1406_v11, %s3279_s4 }
 0x945   :  { %v1352_v36 = vpop.permute.xlu0 %1351 }
 0x946   :  { %v1357_v30 = vmul.f32 %v1352_v36, %v3747_v39 }
 0x94d   :  { %v1439_v34 = vpop.permute.xlu0 %1438 }
 0x94e   :  { %v1444_v33 = vsel %vm1415_vm12, %v1357_v30, %v1439_v34 }
 0x94f   :  { %v1449_v37 = vsel %vm404_vm8, %v1448_v31, %v1444_v33 }
 0x950   :  { %1450 = vrot.lane.b32.xlu2 %v1449_v37, %s3279_s4 }
 0x955   :  { %v1422_v40 = vpop.permute.xlu0 %1421 }
 0x956   :  { %v1426_v1 = vsel %vm1416_vm11, %v1346_v59, %v1422_v40 }
 0x957   :  { %v1429_v32 = vrot.slane %v1426_v1, 7 }
 0x958   :  { %1383 = vrot.lane.b32.xlu2 %v1382_v10, %s3281_s21 }
 0x99a   :  { %v1403_v38 = vpop.permute.xlu1 %1402 }
 0x99b   :  { %1405 = vst.msk [vmem:[#allocation2] sm:$0x3] %vm124_vm0, %v1403_v38 }
 0x9a2   :  { %v1420_v41 = vpop.permute.xlu1 %1419  ;;  %v1454_v43 = vld [vmem:[#allocation2] sm:$0x3] }
 0x9a3   :  { %v1468_v44 = vld [vmem:[#allocation2] sm:$0x3]  ;;  %v1425_v39 = vsel %vm1415_vm12, %v1345_v3, %v1420_v41  ;;  %v1456_v45 = vrot.slane %v1454_v43, 1  ;;  %1458 = vst.msk [vmem:[#allocation12 + $0x3] sm:$0x1] %vm482_vm13, %v1454_v43 }
 0x9a4   :  { %v1469_v46 = vpack.c.bf16 %v1468_v44, %v1468_v44  ;;  %v1430_v47 = vsel %vm404_vm8, %v1429_v32, %v1425_v39 }
 0x9a5   :  { %1459 = vst.msk [vmem:[#allocation12 + $0xb] sm:$0x1] %vm482_vm13, %v1456_v45  ;;  %1431 = vrot.lane.b32.xlu0 %v1430_v47, %s3281_s21  ;;  %v1689_v47 = vld [vmem:[%s4161_s3 + $0xb] sm:$0x1] }
 0x9a6   :  { %2863 = vmatmul.msk.bf16.vlgmr.msra.gmra.mxu0 %vm154_vm1, %v1469_v46  ;;  %vm1691_vm7 = vcmp.gt.f32.partialorder %v1689_v47, 0.0 }
 0x9aa   :  { %v1451_v48 = vpop.permute.xlu2 %1450 }
 0x9ab   :  { %1453 = vst.msk [vmem:[#allocation4] sm:$0x3] %vm124_vm0, %v1451_v48 }
 0x9b2   :  { %v1384_v49 = vpop.permute.xlu2 %1383  ;;  %v1460_v50 = vld [vmem:[#allocation4] sm:$0x3] }
 0x9b3   :  { %v1494_v53 = vld [vmem:[#allocation4] sm:$0x3]  ;;  %1386 = vst.msk [vmem:[#allocation3] sm:$0x3] %vm124_vm0, %v1384_v49  ;;  %v1462_v54 = vrot.slane %v1460_v50, 1 }
 0x9b4   :  { %v1495_v55 = vpack.c.bf16 %v1494_v53, %v1494_v53  ;;  %1464 = vst.msk [vmem:[#allocation13 + $0x4] sm:$0x1] %vm482_vm13, %v1460_v50 }
 0x9b5   :  { %1465 = vst.msk [vmem:[#allocation13 + $0xc] sm:$0x1] %vm482_vm13, %v1462_v54 }
 0x9b6   :  { %2864 = vmatmul.msk.bf16.vlgmr.msra.gmra.mxu1 %vm154_vm1, %v1495_v55 }
 0x9ba   :  { %v1518_v10 = vld [vmem:[#allocation3] sm:$0x3] }
 0x9bb   :  { %v1560_v11 = vrot.slane %v1518_v10, 1 }
 0xa17   :  { %v1432_v56 = vpop.permute.xlu0 %1431 }
 0xa18   :  { %1434 = vst.msk [vmem:[#allocation5] sm:$0x3] %vm124_vm0, %v1432_v56 }
 0xa1f   :  { %v1601_v20 = vld [vmem:[#allocation5] sm:$0x3] }
 0xa20   :  { %v1643_v5 = vrot.slane %v1601_v20, 1 }
 0xa23   :  { %v1482_v4 = vpop.f32.mrf.mxu0 }
 0xa24   :  { %v1487_v42 = vrot.slane %v1482_v4, 1  ;;  %v1490_v51 = vadd.f32 %v1482_v4, %v1466_v23  ;;  %v1733_v23 = vsel %vm1691_vm7, 1, %v3280_v52 }
 0xa26   :  { %v1491_v7 = vadd.f32 %v1487_v42, %v1467_v57  ;;  %3035 = vtanh.f32 %v1490_v51  ;;  %v2865_v27 = vmul.f32 -1.442695, %v1490_v51 }
 0xa28   :  { %3037 = vtanh.f32 %v1491_v7  ;;  %v2866_v13 = vmul.f32 -1.442695, %v1491_v7 }
 0xa2b   :  { %v1484_v59 = vpop.f32.mrf.mxu0 }
 0xa2c   :  { %v3036_v61 = vpop.eup %3035 }
 0xa2d   :  { %1571 = vrot.lane.b32.xlu0 %v3036_v61, %s3276_s13 }
 0xa2e   :  { %v3038_v62 = vpop.eup %3037 }
 0xa2f   :  { %1573 = vrot.lane.b32.xlu1 %v3038_v62, %s3276_s13 }
 0xa33   :  { %v1508_v2 = vpop.f32.mrf.mxu1 }
 0xa34   :  { %v1513_v3 = vrot.slane %v1508_v2, 1  ;;  %v1516_v58 = vadd.f32 %v1508_v2, %v1492_v63  ;;  %v1712_v63 = vld [vmem:[#allocation2] sm:$0x3] }
 0xa35   :  { %1646 = vrot.lane.b32.xlu0 %v1643_v5, %s3279_s4 }
 0xa36   :  { %v1517_v6 = vadd.f32 %v1513_v3, %v1493_v0  ;;  %3039 = vtanh.f32 %v1516_v58  ;;  %v2867_v18 = vmul.f32 -1.442695, %v1516_v58 }
 0xa38   :  { %3041 = vtanh.f32 %v1517_v6  ;;  %v2868_v12 = vmul.f32 -1.442695, %v1517_v6  ;;  %v1714_v6 = vrot.slane %v1712_v63, 1 }
 0xa3a   :  { %3043 = vpow2.f32 %v2868_v12 }
 0xa3b   :  { %v1510_v60 = vpop.f32.mrf.mxu1  ;;  %3045 = vpow2.f32 %v2866_v13  ;;  %v1760_v13 = vld [vmem:[#allocation4] sm:$0x3] }
 0xa3c   :  { %v3040_v8 = vpop.eup %3039 }
 0xa3d   :  { %1654 = vrot.lane.b32.xlu1 %v3040_v8, %s3276_s13  ;;  %1644 = vrot.lane.b32.xlu0 %v1601_v20, %s3279_s4 }
 0xa3e   :  { %v3042_v9 = vpop.eup %3041 }
 0xa3f   :  { %1656 = vrot.lane.b32.xlu2 %v3042_v9, %s3276_s13 }
 0xa40   :  { %v3044_v35 = vpop.eup %3043 }
 0xa41   :  { %v1609_v26 = vadd.f32 1.0, %v3044_v35  ;;  %v3046_v17 = vpop.eup %3045  ;;  %v1685_v35 = vld [vmem:[%s4160_s2 + $0xc] sm:$0x1] }
 0xa42   :  { %v1526_v19 = vadd.f32 1.0, %v3046_v17  ;;  %v1684_v17 = vld [vmem:[%s4160_s2 + $0x4] sm:$0x1] }
 0xa43   :  { %3047 = vrcp.f32 %v1609_v26  ;;  %v1636_v31 = vand.u32 2147483648, %v1609_v26  ;;  %vm1630_vm15 = vweird.f32 %v1609_v26  ;;  %v1634_v37 = vand.u32 2147483647, %v1609_v26 }
 0xa44   :  { %3049 = vpow2.f32 %v2865_v27  ;;  %v1553_v49 = vand.u32 2147483648, %v1526_v19  ;;  %vm1547_vm5 = vweird.f32 %v1526_v19  ;;  %v1551_v50 = vand.u32 2147483647, %v1526_v19 }
 0xa45   :  { %1561 = vrot.lane.b32.xlu1 %v1518_v10, %s3279_s4  ;;  %3051 = vpow2.f32 %v2867_v18  ;;  %v1637_v40 = vor.u32 1.1754944e-38, %v1636_v31  ;;  %vm1635_vm3 = vcmp.eq.f32.partialorder %v1634_v37, 8.507059e+37 }
 0xa46   :  { %3053 = vrcp.f32 %v1526_v19  ;;  %v1554_v56 = vor.u32 1.1754944e-38, %v1553_v49  ;;  %vm1552_vm9 = vcmp.eq.f32.partialorder %v1551_v50, 8.507059e+37  ;;  %v1731_v50 = vld [vmem:[#allocation5] sm:$0x3] }
 0xa47   :  { %1563 = vrot.lane.b32.xlu2 %v1560_v11, %s3279_s4 }
 0xa49   :  { %v3048_v15 = vpop.eup %3047 }
 0xa4a   :  { %v1626_v21 = vmul.f32 %v3048_v15, %v1609_v26  ;;  %v3050_v22 = vpop.eup %3049  ;;  %vm1631_vm14 = vweird.f32 %v3048_v15  ;;  %v1762_v26 = vrot.slane %v1760_v13, 1 }
 0xa4b   :  { %v1525_v24 = vadd.f32 1.0, %v3050_v22  ;;  %v3052_v14 = vpop.eup %3051  ;;  %vm1632_vm2 = vmor %vm1630_vm15, %vm1631_vm14 }
 0xa4c   :  { %v1627_v25 = vsub.f32 1.0, %v1626_v21  ;;  %v3054_v36 = vpop.eup %3053  ;;  %v3810_v28 = vadd.f32 1.0, %v3052_v14 }
 0xa4d   :  { %3055 = vrcp.f32 %v1525_v24  ;;  %v1543_v16 = vmul.f32 %v3054_v36, %v1526_v19  ;;  %vm1548_vm4 = vweird.f32 %v3054_v36  ;;  %v1538_v59 = vand.u32 2147483648, %v1525_v24 }
 0xa4e   :  { %v1628_v29 = vmul.f32 %v3048_v15, %v1627_v25  ;;  %3057 = vrcp.f32 %v3810_v28  ;;  %vm1549_vm6 = vmor %vm1547_vm5, %vm1548_vm4  ;;  %vm1532_vm11 = vweird.f32 %v1525_v24  ;;  %v1536_v61 = vand.u32 2147483647, %v1525_v24 }
 0xa4f   :  { %v1544_v34 = vsub.f32 1.0, %v1543_v16  ;;  %v1539_v2 = vor.u32 1.1754944e-38, %v1538_v59  ;;  %v1621_v3 = vand.u32 2147483648, %v3810_v28  ;;  %v1619_v58 = vand.u32 2147483647, %v3810_v28 }
 0xa50   :  { %v1629_v30 = vadd.f32 %v3048_v15, %v1628_v29  ;;  %vm1537_vm15 = vcmp.eq.f32.partialorder %v1536_v61, 8.507059e+37  ;;  %vm1687_vm5 = vcmp.gt.f32.partialorder %v1685_v35, 0.0  ;;  %v1688_v29 = vld [vmem:[%s4161_s3 + $0x3] sm:$0x1] }
 0xa51   :  { %v1545_v32 = vmul.f32 %v3054_v36, %v1544_v34  ;;  %v1622_v9 = vor.u32 1.1754944e-38, %v1621_v3  ;;  %vm1620_vm4 = vcmp.eq.f32.partialorder %v1619_v58, 8.507059e+37  ;;  %v1693_v27 = vsel %vm1687_vm5, 1, %v3280_v52 }
 0xa52   :  { %v1633_v38 = vsel %vm1632_vm2, %v3048_v15, %v1629_v30  ;;  %vm1615_vm2 = vweird.f32 %v3810_v28  ;;  %vm1690_vm7 = vcmp.gt.f32.partialorder %v1688_v29, 0.0 }
 0xa53   :  { %v3056_v33 = vpop.eup %3055  ;;  %v3813_v43 = vsel %vm1635_vm3, %v1637_v40, %v1633_v38  ;;  %v1546_v46 = vadd.f32 %v3054_v36, %v1545_v32  ;;  %v1732_v34 = vsel %vm1690_vm7, 1, %v3280_v52 }
 0xa54   :  { %v1528_v1 = vmul.f32 %v3056_v33, %v1525_v24  ;;  %v3058_v41 = vpop.eup %3057  ;;  %vm1533_vm10 = vweird.f32 %v3056_v33 }
 0xa55   :  { %v1611_v48 = vmul.f32 %v3058_v41, %v3810_v28  ;;  %v1550_v54 = vsel %vm1549_vm6, %v3054_v36, %v1546_v46  ;;  %vm1534_vm12 = vmor %vm1532_vm11, %vm1533_vm10  ;;  %vm1616_vm14 = vweird.f32 %v3058_v41  ;;  %vm1686_vm6 = vcmp.gt.f32.partialorder %v1684_v17, 0.0 }
 0xa56   :  { %v1529_v45 = vsub.f32 1.0, %v1528_v1  ;;  %v3822_v57 = vsel %vm1552_vm9, %v1554_v56, %v1550_v54  ;;  %vm1617_vm3 = vmor %vm1615_vm2, %vm1616_vm14  ;;  %v1692_v18 = vsel %vm1686_vm6, 1, %v3280_v52 }
 0xa57   :  { %v1612_v55 = vsub.f32 1.0, %v1611_v48 }
 0xa58   :  { %v1530_v53 = vmul.f32 %v3056_v33, %v1529_v45 }
 0xa59   :  { %v1613_v7 = vmul.f32 %v3058_v41, %v1612_v55 }
 0xa5a   :  { %v1531_v42 = vadd.f32 %v3056_v33, %v1530_v53  ;;  %v1743_v53 = vrot.slane %v1731_v50, 1 }
 0xa5b   :  { %v1614_v20 = vadd.f32 %v3058_v41, %v1613_v7 }
 0xa5c   :  { %v1535_v62 = vsel %vm1534_vm12, %v3056_v33, %v1531_v42 }
 0xa5d   :  { %v3829_v5 = vsel %vm1537_vm15, %v1539_v2, %v1535_v62  ;;  %v1618_v8 = vsel %vm1617_vm3, %v3058_v41, %v1614_v20 }
 0xa5e   :  { %v3834_v10 = vsel %vm1620_vm4, %v1622_v9, %v1618_v8 }
 0xa99   :  { %v1657_v44 = vpop.permute.xlu2 %1656 }
 0xa9a   :  { %v1661_v39 = vmul.f32 %v1657_v44, %v3813_v43 }
 0xa9c   :  { %1666 = vrot.lane.b32.xlu1 %v1661_v39, %s3279_s4 }
 0xa9f   :  { %v1572_v0 = vpop.permute.xlu0 %1571 }
 0xaa0   :  { %v1577_v60 = vmul.f32 %v1572_v0, %v3829_v5 }
 0xaa1   :  { %v1574_v4 = vpop.permute.xlu1 %1573  ;;  %v1564_v19 = vpop.permute.xlu2 %1563 }
 0xaa2   :  { %v1578_v51 = vmul.f32 %v1574_v4, %v3822_v57  ;;  %v1568_v15 = vmul.f32 %v1564_v19, %v3822_v57 }
 0xaa4   :  { %1738 = vperm.xlu1 %2906, %v1733_v23   ;;  %1583 = vrot.lane.b32.xlu2 %v1578_v51, %s3279_s4 }
 0xaa7   :  { %v1647_v16 = vpop.permute.xlu0 %1646 }
 0xaa8   :  { %v1651_v30 = vmul.f32 %v1647_v16, %v3813_v43 }
 0xaac   :  { %1717 = vrot.lane.b32.xlu1 %v1714_v6, %s3281_s21  ;;  %1581 = vrot.lane.b32.xlu2 %v1577_v60, %s3279_s4 }
 0xaaf   :  { %v1655_v11 = vpop.permute.xlu1 %1654  ;;  %v1645_v40 = vpop.permute.xlu0 %1644 }
 0xab0   :  { %v1660_v12 = vmul.f32 %v1655_v11, %v3834_v10  ;;  %v1650_v1 = vmul.f32 %v1645_v40, %v3834_v10  ;;  %v1817_v40 = vld [vmem:[#allocation7 + $0x2] sm:$0x1] }
 0xab2   :  { %1664 = vrot.lane.b32.xlu0 %v1660_v12, %s3279_s4 }
 0xab4   :  { %1765 = vrot.lane.b32.xlu2 %v1762_v26, %s3281_s21 }
 0xab7   :  { %v1562_v24 = vpop.permute.xlu1 %1561 }
 0xab8   :  { %v1567_v25 = vmul.f32 %v1562_v24, %v3829_v5 }
 0xaba   :  { %1698 = vperm.xlu0 %2905, %v1693_v27  }
 0xac2   :  { %1695 = vperm.xlu0 %2905, %v1692_v18  }
 0xafe   :  { %v1584_v21 = vpop.permute.xlu2 %1583 }
 0xaff   :  { %v1588_v22 = vadd.f32 %v1584_v21, %v1568_v15 }
 0xb01   :  { %3059 = vtanh.f32 %v1588_v22 }
 0xb06   :  { %v1582_v14 = vpop.permute.xlu2 %1581 }
 0xb07   :  { %v3060_v36 = vpop.eup %3059  ;;  %v1587_v28 = vadd.f32 %v1582_v14, %v1567_v25 }
 0xb08   :  { %1595 = vrot.lane.b32.xlu1 %v3060_v36, %s3276_s13  ;;  %v1791_v36 = vld [vmem:[#allocation6 + $0x5] sm:$0x1] }
 0xb09   :  { %3061 = vtanh.f32 %v1587_v28 }
 0xb0e   :  { %v1667_v31 = vpop.permute.xlu1 %1666  ;;  %v1766_v54 = vpop.permute.xlu2 %1765 }
 0xb0f   :  { %v1671_v33 = vadd.f32 %v1667_v31, %v1651_v30  ;;  %v3062_v37 = vpop.eup %3061 }
 0xb10   :  { %1593 = vrot.lane.b32.xlu2 %v3062_v37, %s3276_s13  ;;  %1735 = vperm.xlu1 %2906, %v1732_v34  }
 0xb11   :  { %3063 = vtanh.f32 %v1671_v33 }
 0xb16   :  { %v1739_v55 = vpop.permute.xlu1 %1738 }
 0xb17   :  { %v3064_v38 = vpop.eup %3063  ;;  %vm1741_vm11 = vcmp.eq.s32.totalorder %v1739_v55, 1 }
 0xb18   :  { %1678 = vrot.lane.b32.xlu2 %v3064_v38, %s3276_s13 }
 0xb1e   :  { %v1718_v23 = vpop.permute.xlu1 %1717 }
 0xb20   :  { %1715 = vrot.lane.b32.xlu2 %v1712_v63, %s3281_s21 }
 0xb24   :  { %v1665_v32 = vpop.permute.xlu0 %1664 }
 0xb25   :  { %v1670_v41 = vadd.f32 %v1665_v32, %v1650_v1  ;;  %v1818_v1 = vld [vmem:[#allocation7 + $0xa] sm:$0x1] }
 0xb27   :  { %3065 = vtanh.f32 %v1670_v41 }
 0xb2c   :  { %v1699_v44 = vpop.permute.xlu0 %1698 }
 0xb2d   :  { %v3066_v39 = vpop.eup %3065  ;;  %vm1701_vm9 = vcmp.eq.s32.totalorder %v1699_v44, 1 }
 0xb2e   :  { %1676 = vrot.lane.b32.xlu0 %v3066_v39, %s3276_s13  ;;  %v1703_v45 = vsel %vm1701_vm9, %v1588_v22, %v1564_v19 }
 0xb2f   :  { %v1706_v47 = vrot.slane %v1703_v45, 7 }
 0xb34   :  { %v1696_v46 = vpop.permute.xlu0 %1695 }
 0xb35   :  { %vm1700_vm10 = vcmp.eq.s32.totalorder %v1696_v46, 1 }
 0xb36   :  { %v1702_v48 = vsel %vm1700_vm10, %v1587_v28, %v1562_v24  ;;  %1763 = vrot.lane.b32.xlu0 %v1760_v13, %s3281_s21  ;;  %v1792_v28 = vld [vmem:[#allocation6 + $0xd] sm:$0x1] }
 0xb37   :  { %v1707_v49 = vsel %vm404_vm8, %v1706_v47, %v1702_v48 }
 0xb3e   :  { %1746 = vrot.lane.b32.xlu0 %v1743_v53, %s3279_s4 }
 0xb6a   :  { %v1594_v56 = vpop.permute.xlu2 %1593 }
 0xb6b   :  { %v1599_v59 = vmul.f32 %v1594_v56, %v3829_v5 }
 0xb72   :  { %v1679_v4 = vpop.permute.xlu2 %1678 }
 0xb73   :  { %v1683_v2 = vmul.f32 %v1679_v4, %v3813_v43 }
 0xb75   :  { %v1770_v3 = vsel %vm1741_vm11, %v1683_v2, %v1766_v54 }
 0xb76   :  { %v1773_v5 = vrot.slane %v1770_v3, 7 }
 0xb7a   :  { %v1596_v42 = vpop.permute.xlu1 %1595  ;;  %v1716_v7 = vpop.permute.xlu2 %1715 }
 0xb7b   :  { %v1600_v51 = vmul.f32 %v1596_v42, %v3822_v57  ;;  %v1721_v63 = vsel %vm1700_vm10, %v1599_v59, %v1716_v7 }
 0xb7d   :  { %v1722_v61 = vsel %vm1701_vm9, %v1600_v51, %v1718_v23 }
 0xb7e   :  { %v1725_v62 = vrot.slane %v1722_v61, 7 }
 0xb80   :  { %v1726_v20 = vsel %vm404_vm8, %v1725_v62, %v1721_v63 }
 0xb81   :  { %1727 = vrot.lane.b32.xlu1 %v1726_v20, %s3279_s4 }
 0xb82   :  { %v1736_v57 = vpop.permute.xlu1 %1735 }
 0xb83   :  { %vm1740_vm12 = vcmp.eq.s32.totalorder %v1736_v57, 1 }
 0xb89   :  { %1744 = vrot.lane.b32.xlu1 %v1731_v50, %s3279_s4 }
 0xba0   :  { %v1677_v0 = vpop.permute.xlu0 %1676 }
 0xba1   :  { %v1682_v58 = vmul.f32 %v1677_v0, %v3834_v10 }
 0xba8   :  { %v1764_v6 = vpop.permute.xlu0 %1763 }
 0xba9   :  { %v1769_v60 = vsel %vm1740_vm12, %v1682_v58, %v1764_v6 }
 0xbaa   :  { %v1774_v8 = vsel %vm404_vm8, %v1773_v5, %v1769_v60 }
 0xbab   :  { %1775 = vrot.lane.b32.xlu2 %v1774_v8, %s3279_s4 }
 0xbb0   :  { %v1747_v11 = vpop.permute.xlu0 %1746 }
 0xbb1   :  { %v1751_v43 = vsel %vm1741_vm11, %v1671_v33, %v1747_v11 }
 0xbb2   :  { %v1754_v12 = vrot.slane %v1751_v43, 7 }
 0xbb3   :  { %1708 = vrot.lane.b32.xlu2 %v1707_v49, %s3281_s21 }
 0xbf3   :  { %v1728_v9 = vpop.permute.xlu1 %1727 }
 0xbf4   :  { %1730 = vst.msk [vmem:[#allocation2] sm:$0x3] %vm124_vm0, %v1728_v9 }
 0xbfb   :  { %v1779_v13 = vld [vmem:[#allocation2] sm:$0x3]  ;;  %v1745_v35 = vpop.permute.xlu1 %1744 }
 0xbfc   :  { %v1793_v26 = vld [vmem:[#allocation2] sm:$0x3]  ;;  %1783 = vst.msk [vmem:[#allocation12 + $0x4] sm:$0x1] %vm482_vm13, %v1779_v13  ;;  %v1750_v10 = vsel %vm1740_vm12, %v1670_v41, %v1745_v35  ;;  %v1781_v17 = vrot.slane %v1779_v13, 1 }
 0xbfd   :  { %v1794_v27 = vpack.c.bf16 %v1793_v26, %v1793_v26  ;;  %v1755_v18 = vsel %vm404_vm8, %v1754_v12, %v1750_v10 }
 0xbfe   :  { %1756 = vrot.lane.b32.xlu0 %v1755_v18, %s3281_s21  ;;  %1784 = vst.msk [vmem:[#allocation12 + $0xc] sm:$0x1] %vm482_vm13, %v1781_v17 }
 0xbff   :  { %2869 = vmatmul.msk.bf16.vlgmr.msra.gmra.mxu2 %vm154_vm1, %v1794_v27 }
 0xc05   :  { %v1776_v19 = vpop.permute.xlu2 %1775 }
 0xc06   :  { %1778 = vst.msk [vmem:[#allocation4] sm:$0x3] %vm124_vm0, %v1776_v19  ;;  %v2014_v19 = vld [vmem:[%s4161_s3 + $0xa] sm:$0x1] }
 0xc07   :  { %vm2016_vm7 = vcmp.gt.f32.partialorder %v2014_v19, 0.0 }
 0xc0d   :  { %v1785_v15 = vld [vmem:[#allocation4] sm:$0x3]  ;;  %v1709_v21 = vpop.permute.xlu2 %1708 }
 0xc0e   :  { %v1819_v22 = vld [vmem:[#allocation4] sm:$0x3]  ;;  %1789 = vst.msk [vmem:[#allocation13 + $0x3] sm:$0x1] %vm482_vm13, %v1785_v15  ;;  %v1787_v25 = vrot.slane %v1785_v15, 1 }
 0xc0f   :  { %v1820_v24 = vpack.c.bf16 %v1819_v22, %v1819_v22  ;;  %1711 = vst.msk [vmem:[#allocation3] sm:$0x3] %vm124_vm0, %v1709_v21 }
 0xc10   :  { %1790 = vst.msk [vmem:[#allocation13 + $0xb] sm:$0x1] %vm482_vm13, %v1787_v25 }
 0xc11   :  { %2870 = vmatmul.msk.bf16.vlgmr.msra.gmra.mxu3 %vm154_vm1, %v1820_v24 }
 0xc16   :  { %v1843_v49 = vld [vmem:[#allocation3] sm:$0x3] }
 0xc17   :  { %v1885_v50 = vrot.slane %v1843_v49, 1 }
 0xc70   :  { %v1757_v14 = vpop.permute.xlu0 %1756 }
 0xc71   :  { %1759 = vst.msk [vmem:[#allocation5] sm:$0x3] %vm124_vm0, %v1757_v14 }
 0xc78   :  { %v1926_v38 = vld [vmem:[#allocation5] sm:$0x3] }
 0xc79   :  { %v1968_v41 = vrot.slane %v1926_v38, 1 }
 0xc82   :  { %v1807_v29 = vpop.f32.mrf.mxu2 }
 0xc83   :  { %v1812_v16 = vrot.slane %v1807_v29, 1  ;;  %v1815_v30 = vadd.f32 %v1807_v29, %v1791_v36  ;;  %v2058_v29 = vsel %vm2016_vm7, 1, %v3280_v52 }
 0xc85   :  { %v1816_v31 = vadd.f32 %v1812_v16, %v1792_v28  ;;  %3067 = vtanh.f32 %v1815_v30  ;;  %v2871_v23 = vmul.f32 -1.442695, %v1815_v30 }
 0xc87   :  { %3069 = vtanh.f32 %v1816_v31  ;;  %v2872_v54 = vmul.f32 -1.442695, %v1816_v31 }
 0xc8a   :  { %v1809_v34 = vpop.f32.mrf.mxu2 }
 0xc8b   :  { %v3068_v33 = vpop.eup %3067 }
 0xc8c   :  { %1896 = vrot.lane.b32.xlu0 %v3068_v33, %s3276_s13 }
 0xc8d   :  { %v3070_v37 = vpop.eup %3069 }
 0xc8e   :  { %1898 = vrot.lane.b32.xlu1 %v3070_v37, %s3276_s13 }
 0xc94   :  { %v1833_v32 = vpop.f32.mrf.mxu3  ;;  %1971 = vrot.lane.b32.xlu0 %v1968_v41, %s3279_s4 }
 0xc95   :  { %v1838_v44 = vrot.slane %v1833_v32, 1  ;;  %v1841_v39 = vadd.f32 %v1833_v32, %v1817_v40 }
 0xc97   :  { %v1842_v45 = vadd.f32 %v1838_v44, %v1818_v1  ;;  %3071 = vtanh.f32 %v1841_v39  ;;  %v2873_v51 = vmul.f32 -1.442695, %v1841_v39  ;;  %v2037_v1 = vld [vmem:[#allocation2] sm:$0x3] }
 0xc99   :  { %3073 = vtanh.f32 %v1842_v45  ;;  %v2874_v53 = vmul.f32 -1.442695, %v1842_v45 }
 0xc9b   :  { %3075 = vpow2.f32 %v2874_v53 }
 0xc9c   :  { %v1835_v46 = vpop.f32.mrf.mxu3  ;;  %1969 = vrot.lane.b32.xlu0 %v1926_v38, %s3279_s4  ;;  %3077 = vpow2.f32 %v2872_v54  ;;  %v2085_v54 = vld [vmem:[#allocation4] sm:$0x3] }
 0xc9d   :  { %v3072_v47 = vpop.eup %3071  ;;  %v2039_v46 = vrot.slane %v2037_v1, 1 }
 0xc9e   :  { %1979 = vrot.lane.b32.xlu1 %v3072_v47, %s3276_s13 }
 0xc9f   :  { %v3074_v48 = vpop.eup %3073 }
 0xca0   :  { %1981 = vrot.lane.b32.xlu2 %v3074_v48, %s3276_s13 }
 0xca1   :  { %v3076_v55 = vpop.eup %3075 }
 0xca2   :  { %v1934_v56 = vadd.f32 1.0, %v3076_v55  ;;  %v3078_v4 = vpop.eup %3077  ;;  %v2010_v55 = vld [vmem:[%s4160_s2 + $0xd] sm:$0x1] }
 0xca3   :  { %v1851_v42 = vadd.f32 1.0, %v3078_v4  ;;  %v2009_v4 = vld [vmem:[%s4160_s2 + $0x5] sm:$0x1] }
 0xca4   :  { %3079 = vrcp.f32 %v1934_v56  ;;  %v1961_v60 = vand.u32 2147483648, %v1934_v56  ;;  %vm1955_vm15 = vweird.f32 %v1934_v56  ;;  %v1959_v8 = vand.u32 2147483647, %v1934_v56 }
 0xca5   :  { %3081 = vpow2.f32 %v2871_v23  ;;  %v1878_v18 = vand.u32 2147483648, %v1851_v42  ;;  %vm1872_vm5 = vweird.f32 %v1851_v42  ;;  %v1876_v21 = vand.u32 2147483647, %v1851_v42 }
 0xca6   :  { %1886 = vrot.lane.b32.xlu1 %v1843_v49, %s3279_s4  ;;  %3083 = vrcp.f32 %v1851_v42  ;;  %v1962_v12 = vor.u32 1.1754944e-38, %v1961_v60  ;;  %vm1960_vm3 = vcmp.eq.f32.partialorder %v1959_v8, 8.507059e+37 }
 0xca7   :  { %3085 = vpow2.f32 %v2873_v51  ;;  %v1879_v25 = vor.u32 1.1754944e-38, %v1878_v18  ;;  %vm1877_vm9 = vcmp.eq.f32.partialorder %v1876_v21, 8.507059e+37  ;;  %v2056_v21 = vld [vmem:[#allocation5] sm:$0x3] }
 0xca8   :  { %1888 = vrot.lane.b32.xlu2 %v1885_v50, %s3279_s4 }
 0xcaa   :  { %v3080_v7 = vpop.eup %3079 }
 0xcab   :  { %v3082_v59 = vpop.eup %3081  ;;  %v1951_v61 = vmul.f32 %v3080_v7, %v1934_v56  ;;  %vm1956_vm14 = vweird.f32 %v3080_v7  ;;  %v2087_v56 = vrot.slane %v2085_v54, 1 }
 0xcac   :  { %v1850_v62 = vadd.f32 1.0, %v3082_v59  ;;  %v3084_v63 = vpop.eup %3083  ;;  %vm1957_vm2 = vmor %vm1955_vm15, %vm1956_vm14 }
 0xcad   :  { %v1952_v20 = vsub.f32 1.0, %v1951_v61  ;;  %v3086_v0 = vpop.eup %3085  ;;  %v1868_v57 = vmul.f32 %v3084_v63, %v1851_v42  ;;  %vm1873_vm4 = vweird.f32 %v3084_v63 }
 0xcae   :  { %3087 = vrcp.f32 %v1850_v62  ;;  %v3897_v2 = vadd.f32 1.0, %v3086_v0  ;;  %vm1874_vm6 = vmor %vm1872_vm5, %vm1873_vm4  ;;  %v1863_v31 = vand.u32 2147483648, %v1850_v62  ;;  %vm1857_vm11 = vweird.f32 %v1850_v62 }
 0xcaf   :  { %v1953_v3 = vmul.f32 %v3080_v7, %v1952_v20  ;;  %v1869_v5 = vsub.f32 1.0, %v1868_v57  ;;  %v1861_v33 = vand.u32 2147483647, %v1850_v62  ;;  %vm2012_vm5 = vcmp.gt.f32.partialorder %v2010_v55, 0.0 }
 0xcb0   :  { %3089 = vrcp.f32 %v3897_v2  ;;  %v1864_v38 = vor.u32 1.1754944e-38, %v1863_v31  ;;  %v1946_v41 = vand.u32 2147483648, %v3897_v2  ;;  %v1944_v39 = vand.u32 2147483647, %v3897_v2 }
 0xcb1   :  { %v1954_v58 = vadd.f32 %v3080_v7, %v1953_v3  ;;  %v1870_v43 = vmul.f32 %v3084_v63, %v1869_v5  ;;  %vm1862_vm15 = vcmp.eq.f32.partialorder %v1861_v33, 8.507059e+37  ;;  %v2018_v23 = vsel %vm2012_vm5, 1, %v3280_v52  ;;  %v2013_v3 = vld [vmem:[%s4161_s3 + $0x2] sm:$0x1] }
 0xcb2   :  { %v1947_v48 = vor.u32 1.1754944e-38, %v1946_v41  ;;  %vm1945_vm4 = vcmp.eq.f32.partialorder %v1944_v39, 8.507059e+37  ;;  %vm2015_vm7 = vcmp.gt.f32.partialorder %v2013_v3, 0.0 }
 0xcb3   :  { %v1958_v9 = vsel %vm1957_vm2, %v3080_v7, %v1954_v58  ;;  %v1871_v17 = vadd.f32 %v3084_v63, %v1870_v43  ;;  %vm1940_vm2 = vweird.f32 %v3897_v2  ;;  %v2057_v5 = vsel %vm2015_vm7, 1, %v3280_v52 }
 0xcb4   :  { %v3088_v6 = vpop.eup %3087  ;;  %v3900_v35 = vsel %vm1960_vm3, %v1962_v12, %v1958_v9 }
 0xcb5   :  { %v1853_v11 = vmul.f32 %v3088_v6, %v1850_v62  ;;  %v1875_v24 = vsel %vm1874_vm6, %v3084_v63, %v1871_v17  ;;  %vm1858_vm10 = vweird.f32 %v3088_v6  ;;  %vm2011_vm6 = vcmp.gt.f32.partialorder %v2009_v4, 0.0 }
 0xcb6   :  { %v3090_v13 = vpop.eup %3089  ;;  %v3908_v36 = vsel %vm1877_vm9, %v1879_v25, %v1875_v24  ;;  %vm1859_vm12 = vmor %vm1857_vm11, %vm1858_vm10  ;;  %v2017_v42 = vsel %vm2011_vm6, 1, %v3280_v52 }
 0xcb7   :  { %v1854_v27 = vsub.f32 1.0, %v1853_v11  ;;  %v1936_v15 = vmul.f32 %v3090_v13, %v3897_v2  ;;  %vm1941_vm14 = vweird.f32 %v3090_v13 }
 0xcb8   :  { %vm1942_vm3 = vmor %vm1940_vm2, %vm1941_vm14 }
 0xcb9   :  { %v1855_v22 = vmul.f32 %v3088_v6, %v1854_v27  ;;  %v1937_v14 = vsub.f32 1.0, %v1936_v15 }
 0xcbb   :  { %v1856_v16 = vadd.f32 %v3088_v6, %v1855_v22  ;;  %v1938_v34 = vmul.f32 %v3090_v13, %v1937_v14  ;;  %v2068_v22 = vrot.slane %v2056_v21, 1 }
 0xcbd   :  { %v1860_v37 = vsel %vm1859_vm12, %v3088_v6, %v1856_v16  ;;  %v1939_v32 = vadd.f32 %v3090_v13, %v1938_v34 }
 0xcbe   :  { %v3914_v44 = vsel %vm1862_vm15, %v1864_v38, %v1860_v37 }
 0xcbf   :  { %v1943_v47 = vsel %vm1942_vm3, %v3090_v13, %v1939_v32 }
 0xcc0   :  { %v3921_v49 = vsel %vm1945_vm4, %v1947_v48, %v1943_v47 }
 0xcfa   :  { %v1982_v26 = vpop.permute.xlu2 %1981 }
 0xcfb   :  { %v1986_v10 = vmul.f32 %v1982_v26, %v3900_v35 }
 0xcfd   :  { %1991 = vrot.lane.b32.xlu1 %v1986_v10, %s3279_s4 }
 0xcfe   :  { %v1897_v40 = vpop.permute.xlu0 %1896 }
 0xcff   :  { %v1902_v45 = vmul.f32 %v1897_v40, %v3914_v44 }
 0xd00   :  { %v1899_v28 = vpop.permute.xlu1 %1898 }
 0xd01   :  { %v1903_v30 = vmul.f32 %v1899_v28, %v3908_v36 }
 0xd02   :  { %v1889_v51 = vpop.permute.xlu2 %1888 }
 0xd03   :  { %1908 = vrot.lane.b32.xlu2 %v1903_v30, %s3279_s4  ;;  %v1893_v7 = vmul.f32 %v1889_v51, %v3908_v36 }
 0xd05   :  { %2063 = vperm.xlu1 %2906, %v2058_v29  }
 0xd06   :  { %v1972_v57 = vpop.permute.xlu0 %1971 }
 0xd07   :  { %v1976_v58 = vmul.f32 %v1972_v57, %v3900_v35 }
 0xd0b   :  { %1906 = vrot.lane.b32.xlu2 %v1902_v45, %s3279_s4 }
 0xd0d   :  { %2042 = vrot.lane.b32.xlu1 %v2039_v46, %s3281_s21 }
 0xd0e   :  { %v1970_v11 = vpop.permute.xlu0 %1969 }
 0xd0f   :  { %v1975_v43 = vmul.f32 %v1970_v11, %v3921_v49  ;;  %v2142_v11 = vld [vmem:[#allocation7 + $0x1] sm:$0x1] }
 0xd10   :  { %v1980_v50 = vpop.permute.xlu1 %1979 }
 0xd11   :  { %v1985_v53 = vmul.f32 %v1980_v50, %v3921_v49 }
 0xd13   :  { %1989 = vrot.lane.b32.xlu0 %v1985_v53, %s3279_s4  ;;  %2090 = vrot.lane.b32.xlu2 %v2087_v56, %s3281_s21 }
 0xd18   :  { %v1887_v62 = vpop.permute.xlu1 %1886 }
 0xd19   :  { %v1892_v63 = vmul.f32 %v1887_v62, %v3914_v44 }
 0xd1b   :  { %2023 = vperm.xlu0 %2905, %v2018_v23  }
 0xd23   :  { %2020 = vperm.xlu0 %2905, %v2017_v42  }
 0xd5d   :  { %v1909_v59 = vpop.permute.xlu2 %1908 }
 0xd5e   :  { %v1913_v61 = vadd.f32 %v1909_v59, %v1893_v7 }
 0xd60   :  { %3091 = vtanh.f32 %v1913_v61 }
 0xd65   :  { %v1907_v20 = vpop.permute.xlu2 %1906 }
 0xd66   :  { %v3092_v0 = vpop.eup %3091  ;;  %v1912_v2 = vadd.f32 %v1907_v20, %v1892_v63 }
 0xd67   :  { %1920 = vrot.lane.b32.xlu1 %v3092_v0, %s3276_s13  ;;  %v2116_v0 = vld [vmem:[#allocation6 + $0x6] sm:$0x1] }
 0xd68   :  { %3093 = vtanh.f32 %v1912_v2 }
 0xd6d   :  { %v2091_v24 = vpop.permute.xlu2 %2090 }
 0xd6e   :  { %v3094_v60 = vpop.eup %3093 }
 0xd6f   :  { %v1992_v6 = vpop.permute.xlu1 %1991  ;;  %2060 = vperm.xlu1 %2906, %v2057_v5   ;;  %1918 = vrot.lane.b32.xlu2 %v3094_v60, %s3276_s13 }
 0xd70   :  { %v1996_v8 = vadd.f32 %v1992_v6, %v1976_v58 }
 0xd72   :  { %3095 = vtanh.f32 %v1996_v8 }
 0xd77   :  { %v2064_v25 = vpop.permute.xlu1 %2063 }
 0xd78   :  { %v3096_v9 = vpop.eup %3095  ;;  %vm2066_vm11 = vcmp.eq.s32.totalorder %v2064_v25, 1 }
 0xd79   :  { %2003 = vrot.lane.b32.xlu2 %v3096_v9, %s3276_s13 }
 0xd7f   :  { %v2043_v28 = vpop.permute.xlu1 %2042 }
 0xd81   :  { %2040 = vrot.lane.b32.xlu2 %v2037_v1, %s3281_s21 }
 0xd85   :  { %v1990_v12 = vpop.permute.xlu0 %1989 }
 0xd86   :  { %v1995_v13 = vadd.f32 %v1990_v12, %v1975_v43  ;;  %v2143_v12 = vld [vmem:[#allocation7 + $0x9] sm:$0x1] }
 0xd88   :  { %3097 = vtanh.f32 %v1995_v13 }
 0xd8d   :  { %v2024_v26 = vpop.permute.xlu0 %2023 }
 0xd8e   :  { %v3098_v10 = vpop.eup %3097  ;;  %vm2026_vm9 = vcmp.eq.s32.totalorder %v2024_v26, 1 }
 0xd8f   :  { %2001 = vrot.lane.b32.xlu0 %v3098_v10, %s3276_s13  ;;  %v2028_v27 = vsel %vm2026_vm9, %v1913_v61, %v1889_v51 }
 0xd90   :  { %v2031_v18 = vrot.slane %v2028_v27, 7 }
 0xd95   :  { %v2021_v17 = vpop.permute.xlu0 %2020 }
 0xd96   :  { %vm2025_vm10 = vcmp.eq.s32.totalorder %v2021_v17, 1 }
 0xd97   :  { %v2027_v19 = vsel %vm2025_vm10, %v1912_v2, %v1887_v62  ;;  %2088 = vrot.lane.b32.xlu0 %v2085_v54, %s3281_s21  ;;  %v2117_v2 = vld [vmem:[#allocation6 + $0xe] sm:$0x1] }
 0xd98   :  { %v2032_v15 = vsel %vm404_vm8, %v2031_v18, %v2027_v19 }
 0xd9f   :  { %2071 = vrot.lane.b32.xlu0 %v2068_v22, %s3279_s4 }
 0xdc9   :  { %v1919_v14 = vpop.permute.xlu2 %1918 }
 0xdca   :  { %v1924_v34 = vmul.f32 %v1919_v14, %v3914_v44 }
 0xdd3   :  { %v2004_v29 = vpop.permute.xlu2 %2003 }
 0xdd4   :  { %v2008_v32 = vmul.f32 %v2004_v29, %v3900_v35 }
 0xdd6   :  { %v2095_v41 = vsel %vm2066_vm11, %v2008_v32, %v2091_v24 }
 0xdd7   :  { %v2098_v44 = vrot.slane %v2095_v41, 7 }
 0xdd9   :  { %v1921_v16 = vpop.permute.xlu1 %1920 }
 0xdda   :  { %v1925_v30 = vmul.f32 %v1921_v16, %v3908_v36 }
 0xddb   :  { %v2041_v31 = vpop.permute.xlu2 %2040 }
 0xddc   :  { %v2047_v33 = vsel %vm2026_vm9, %v1925_v30, %v2043_v28  ;;  %v2046_v38 = vsel %vm2025_vm10, %v1924_v34, %v2041_v31 }
 0xddd   :  { %v2050_v37 = vrot.slane %v2047_v33, 7 }
 0xddf   :  { %v2051_v40 = vsel %vm404_vm8, %v2050_v37, %v2046_v38 }
 0xde0   :  { %2052 = vrot.lane.b32.xlu1 %v2051_v40, %s3279_s4 }
 0xde1   :  { %v2061_v36 = vpop.permute.xlu1 %2060 }
 0xde2   :  { %vm2065_vm12 = vcmp.eq.s32.totalorder %v2061_v36, 1 }
 0xde8   :  { %2069 = vrot.lane.b32.xlu1 %v2056_v21, %s3279_s4 }
 0xe01   :  { %v2002_v1 = vpop.permute.xlu0 %2001 }
 0xe02   :  { %v2007_v39 = vmul.f32 %v2002_v1, %v3921_v49 }
 0xe09   :  { %v2089_v45 = vpop.permute.xlu0 %2088 }
 0xe0a   :  { %v2094_v46 = vsel %vm2065_vm12, %v2007_v39, %v2089_v45 }
 0xe0b   :  { %v2099_v47 = vsel %vm404_vm8, %v2098_v44, %v2094_v46 }
 0xe0c   :  { %2100 = vrot.lane.b32.xlu2 %v2099_v47, %s3279_s4 }
 0xe11   :  { %v2072_v50 = vpop.permute.xlu0 %2071 }
 0xe12   :  { %v2076_v35 = vsel %vm2066_vm11, %v1996_v8, %v2072_v50 }
 0xe13   :  { %v2079_v53 = vrot.slane %v2076_v35, 7 }
 0xe14   :  { %2033 = vrot.lane.b32.xlu2 %v2032_v15, %s3281_s21 }
 0xe52   :  { %v2053_v48 = vpop.permute.xlu1 %2052 }
 0xe53   :  { %2055 = vst.msk [vmem:[#allocation2] sm:$0x3] %vm124_vm0, %v2053_v48 }
 0xe5a   :  { %v2104_v54 = vld [vmem:[#allocation2] sm:$0x3]  ;;  %v2070_v55 = vpop.permute.xlu1 %2069 }
 0xe5b   :  { %v2118_v56 = vld [vmem:[#allocation2] sm:$0x3]  ;;  %2108 = vst.msk [vmem:[#allocation12 + $0x5] sm:$0x1] %vm482_vm13, %v2104_v54  ;;  %v2075_v49 = vsel %vm2065_vm12, %v1995_v13, %v2070_v55  ;;  %v2106_v4 = vrot.slane %v2104_v54, 1 }
 0xe5c   :  { %v2119_v23 = vpack.c.bf16 %v2118_v56, %v2118_v56  ;;  %v2080_v42 = vsel %vm404_vm8, %v2079_v53, %v2075_v49 }
 0xe5d   :  { %2081 = vrot.lane.b32.xlu0 %v2080_v42, %s3281_s21  ;;  %2109 = vst.msk [vmem:[#allocation12 + $0xd] sm:$0x1] %vm482_vm13, %v2106_v4 }
 0xe5e   :  { %2875 = vmatmul.msk.bf16.vlgmr.msrb.gmra.mxu0 %vm154_vm1, %v2119_v23 }
 0xe66   :  { %v2101_v51 = vpop.permute.xlu2 %2100 }
 0xe67   :  { %2103 = vst.msk [vmem:[#allocation4] sm:$0x3] %vm124_vm0, %v2101_v51 }
 0xe6e   :  { %v2110_v7 = vld [vmem:[#allocation4] sm:$0x3]  ;;  %v2034_v59 = vpop.permute.xlu2 %2033 }
 0xe6f   :  { %v2144_v61 = vld [vmem:[#allocation4] sm:$0x3]  ;;  %2114 = vst.msk [vmem:[#allocation13 + $0x2] sm:$0x1] %vm482_vm13, %v2110_v7  ;;  %v2112_v63 = vrot.slane %v2110_v7, 1 }
 0xe70   :  { %v2145_v62 = vpack.c.bf16 %v2144_v61, %v2144_v61  ;;  %2036 = vst.msk [vmem:[#allocation3] sm:$0x3] %vm124_vm0, %v2034_v59  ;;  %v2339_v7 = vld [vmem:[%s4161_s3 + $0x9] sm:$0x1] }
 0xe71   :  { %2115 = vst.msk [vmem:[#allocation13 + $0xa] sm:$0x1] %vm482_vm13, %v2112_v63  ;;  %vm2341_vm7 = vcmp.gt.f32.partialorder %v2339_v7, 0.0 }
 0xe72   :  { %2876 = vmatmul.msk.bf16.vlgmr.msrb.gmra.mxu1 %vm154_vm1, %v2145_v62 }
 0xe77   :  { %v2168_v15 = vld [vmem:[#allocation3] sm:$0x3] }
 0xe78   :  { %v2210_v21 = vrot.slane %v2168_v15, 1 }
 0xecf   :  { %v2082_v20 = vpop.permute.xlu0 %2081 }
 0xed0   :  { %2084 = vst.msk [vmem:[#allocation5] sm:$0x3] %vm124_vm0, %v2082_v20 }
 0xed7   :  { %v2251_v9 = vld [vmem:[#allocation5] sm:$0x3] }
 0xed8   :  { %v2293_v43 = vrot.slane %v2251_v9, 1 }
 0xedb   :  { %v2132_v3 = vpop.f32.mrf.mxu0 }
 0xedc   :  { %v2137_v57 = vrot.slane %v2132_v3, 1  ;;  %v2140_v58 = vadd.f32 %v2132_v3, %v2116_v0 }
 0xede   :  { %v2141_v5 = vadd.f32 %v2137_v57, %v2117_v2  ;;  %3099 = vtanh.f32 %v2140_v58  ;;  %v2877_v28 = vmul.f32 -1.442695, %v2140_v58  ;;  %v2383_v58 = vsel %vm2341_vm7, 1, %v3280_v52 }
 0xee0   :  { %3101 = vtanh.f32 %v2141_v5  ;;  %v2878_v24 = vmul.f32 -1.442695, %v2141_v5 }
 0xee3   :  { %v2134_v6 = vpop.f32.mrf.mxu0 }
 0xee4   :  { %v3100_v60 = vpop.eup %3099 }
 0xee5   :  { %2221 = vrot.lane.b32.xlu0 %v3100_v60, %s3276_s13 }
 0xee6   :  { %v3102_v8 = vpop.eup %3101 }
 0xee7   :  { %2223 = vrot.lane.b32.xlu1 %v3102_v8, %s3276_s13 }
 0xeed   :  { %2296 = vrot.lane.b32.xlu0 %v2293_v43, %s3279_s4 }
 0xeef   :  { %v2158_v13 = vpop.f32.mrf.mxu1 }
 0xef0   :  { %v2163_v26 = vrot.slane %v2158_v13, 1  ;;  %v2166_v10 = vadd.f32 %v2158_v13, %v2142_v11 }
 0xef2   :  { %v2167_v27 = vadd.f32 %v2163_v26, %v2143_v12  ;;  %3103 = vtanh.f32 %v2166_v10  ;;  %v2879_v30 = vmul.f32 -1.442695, %v2166_v10  ;;  %v2362_v12 = vld [vmem:[#allocation2] sm:$0x3] }
 0xef4   :  { %3105 = vtanh.f32 %v2167_v27  ;;  %v2880_v22 = vmul.f32 -1.442695, %v2167_v27 }
 0xef5   :  { %2294 = vrot.lane.b32.xlu0 %v2251_v9, %s3279_s4 }
 0xef6   :  { %3107 = vpow2.f32 %v2880_v22  ;;  %v2410_v22 = vld [vmem:[#allocation4] sm:$0x3] }
 0xef7   :  { %v2160_v17 = vpop.f32.mrf.mxu1  ;;  %3109 = vpow2.f32 %v2878_v24 }
 0xef8   :  { %v3104_v18 = vpop.eup %3103  ;;  %v2364_v17 = vrot.slane %v2362_v12, 1 }
 0xef9   :  { %2304 = vrot.lane.b32.xlu1 %v3104_v18, %s3276_s13 }
 0xefa   :  { %v3106_v19 = vpop.eup %3105 }
 0xefb   :  { %2306 = vrot.lane.b32.xlu2 %v3106_v19, %s3276_s13 }
 0xefc   :  { %v3108_v25 = vpop.eup %3107 }
 0xefd   :  { %v2259_v14 = vadd.f32 1.0, %v3108_v25  ;;  %v3110_v29 = vpop.eup %3109  ;;  %v2335_v25 = vld [vmem:[%s4160_s2 + $0xe] sm:$0x1] }
 0xefe   :  { %v2176_v16 = vadd.f32 1.0, %v3110_v29  ;;  %v2334_v29 = vld [vmem:[%s4160_s2 + $0x6] sm:$0x1] }
 0xeff   :  { %3111 = vrcp.f32 %v2259_v14  ;;  %v2286_v46 = vand.u32 2147483648, %v2259_v14  ;;  %vm2280_vm15 = vweird.f32 %v2259_v14  ;;  %v2284_v47 = vand.u32 2147483647, %v2259_v14 }
 0xf00   :  { %3113 = vpow2.f32 %v2877_v28  ;;  %v2203_v42 = vand.u32 2147483648, %v2176_v16  ;;  %vm2197_vm5 = vweird.f32 %v2176_v16  ;;  %v2201_v51 = vand.u32 2147483647, %v2176_v16 }
 0xf01   :  { %2211 = vrot.lane.b32.xlu1 %v2168_v15, %s3279_s4  ;;  %3115 = vrcp.f32 %v2176_v16  ;;  %v2287_v53 = vor.u32 1.1754944e-38, %v2286_v46  ;;  %vm2285_vm3 = vcmp.eq.f32.partialorder %v2284_v47, 8.507059e+37 }
 0xf02   :  { %3117 = vpow2.f32 %v2879_v30  ;;  %v2204_v63 = vor.u32 1.1754944e-38, %v2203_v42  ;;  %vm2202_vm9 = vcmp.eq.f32.partialorder %v2201_v51, 8.507059e+37 }
 0xf03   :  { %2213 = vrot.lane.b32.xlu2 %v2210_v21, %s3279_s4 }
 0xf05   :  { %v3112_v31 = vpop.eup %3111 }
 0xf06   :  { %v3114_v34 = vpop.eup %3113  ;;  %v2276_v33 = vmul.f32 %v3112_v31, %v2259_v14  ;;  %vm2281_vm14 = vweird.f32 %v3112_v31  ;;  %v2412_v14 = vrot.slane %v2410_v22, 1 }
 0xf07   :  { %v2175_v37 = vadd.f32 1.0, %v3114_v34  ;;  %v3116_v38 = vpop.eup %3115  ;;  %vm2282_vm2 = vmor %vm2280_vm15, %vm2281_vm14 }
 0xf08   :  { %v2277_v40 = vsub.f32 1.0, %v2276_v33  ;;  %v3118_v1 = vpop.eup %3117  ;;  %v2193_v32 = vmul.f32 %v3116_v38, %v2176_v16  ;;  %vm2198_vm4 = vweird.f32 %v3116_v38 }
 0xf09   :  { %3119 = vrcp.f32 %v2175_v37  ;;  %v3984_v41 = vadd.f32 1.0, %v3118_v1  ;;  %vm2199_vm6 = vmor %vm2197_vm5, %vm2198_vm4  ;;  %v2188_v5 = vand.u32 2147483648, %v2175_v37  ;;  %vm2182_vm11 = vweird.f32 %v2175_v37 }
 0xf0a   :  { %v2278_v36 = vmul.f32 %v3112_v31, %v2277_v40  ;;  %v2194_v39 = vsub.f32 1.0, %v2193_v32  ;;  %v2186_v6 = vand.u32 2147483647, %v2175_v37  ;;  %vm2337_vm5 = vcmp.gt.f32.partialorder %v2335_v25, 0.0 }
 0xf0b   :  { %3121 = vrcp.f32 %v3984_v41  ;;  %v2189_v11 = vor.u32 1.1754944e-38, %v2188_v5  ;;  %v2271_v26 = vand.u32 2147483648, %v3984_v41  ;;  %v2269_v27 = vand.u32 2147483647, %v3984_v41 }
 0xf0c   :  { %v2279_v45 = vadd.f32 %v3112_v31, %v2278_v36  ;;  %v2195_v50 = vmul.f32 %v3116_v38, %v2194_v39  ;;  %vm2187_vm14 = vcmp.eq.f32.partialorder %v2186_v6, 8.507059e+37  ;;  %v2343_v28 = vsel %vm2337_vm5, 1, %v3280_v52 }
 0xf0d   :  { %v2272_v19 = vor.u32 1.1754944e-38, %v2271_v26  ;;  %vm2270_vm4 = vcmp.eq.f32.partialorder %v2269_v27, 8.507059e+37 }
 0xf0e   :  { %v2283_v35 = vsel %vm2282_vm2, %v3112_v31, %v2279_v45  ;;  %v2196_v23 = vadd.f32 %v3116_v38, %v2195_v50  ;;  %vm2265_vm2 = vweird.f32 %v3984_v41 }
 0xf0f   :  { %v3120_v44 = vpop.eup %3119  ;;  %v3987_v55 = vsel %vm2285_vm3, %v2287_v53, %v2283_v35 }
 0xf10   :  { %v2178_v48 = vmul.f32 %v3120_v44, %v2175_v37  ;;  %v2200_v62 = vsel %vm2199_vm6, %v3116_v38, %v2196_v23  ;;  %vm2183_vm10 = vweird.f32 %v3120_v44  ;;  %vm2336_vm6 = vcmp.gt.f32.partialorder %v2334_v29, 0.0 }
 0xf11   :  { %v3122_v54 = vpop.eup %3121  ;;  %v3995_v2 = vsel %vm2202_vm9, %v2204_v63, %v2200_v62  ;;  %vm2184_vm12 = vmor %vm2182_vm11, %vm2183_vm10  ;;  %v2342_v16 = vsel %vm2336_vm6, 1, %v3280_v52 }
 0xf12   :  { %v2179_v49 = vsub.f32 1.0, %v2178_v48  ;;  %v2261_v59 = vmul.f32 %v3122_v54, %v3984_v41  ;;  %vm2266_vm15 = vweird.f32 %v3122_v54  ;;  %v2338_v41 = vld [vmem:[%s4161_s3 + $0x1] sm:$0x1] }
 0xf13   :  { %vm2267_vm3 = vmor %vm2265_vm2, %vm2266_vm15  ;;  %vm2340_vm7 = vcmp.gt.f32.partialorder %v2338_v41, 0.0 }
 0xf14   :  { %v2180_v61 = vmul.f32 %v3120_v44, %v2179_v49  ;;  %v2262_v20 = vsub.f32 1.0, %v2261_v59  ;;  %v2382_v39 = vsel %vm2340_vm7, 1, %v3280_v52  ;;  %v2381_v59 = vld [vmem:[#allocation5] sm:$0x3] }
 0xf16   :  { %v2181_v3 = vadd.f32 %v3120_v44, %v2180_v61  ;;  %v2263_v60 = vmul.f32 %v3122_v54, %v2262_v20  ;;  %v2393_v61 = vrot.slane %v2381_v59, 1 }
 0xf18   :  { %v2185_v8 = vsel %vm2184_vm12, %v3120_v44, %v2181_v3  ;;  %v2264_v43 = vadd.f32 %v3122_v54, %v2263_v60 }
 0xf19   :  { %v4000_v13 = vsel %vm2187_vm14, %v2189_v11, %v2185_v8 }
 0xf1a   :  { %v2268_v18 = vsel %vm2267_vm3, %v3122_v54, %v2264_v43 }
 0xf1b   :  { %v4008_v15 = vsel %vm2270_vm4, %v2272_v19, %v2268_v18 }
 0xf55   :  { %v2307_v56 = vpop.permute.xlu2 %2306 }
 0xf56   :  { %v2311_v4 = vmul.f32 %v2307_v56, %v3987_v55 }
 0xf57   :  { %v2222_v9 = vpop.permute.xlu0 %2221 }
 0xf58   :  { %2316 = vrot.lane.b32.xlu1 %v2311_v4, %s3279_s4  ;;  %v2227_v10 = vmul.f32 %v2222_v9, %v4000_v13 }
 0xf59   :  { %v2224_v0 = vpop.permute.xlu1 %2223 }
 0xf5a   :  { %v2228_v57 = vmul.f32 %v2224_v0, %v3995_v2 }
 0xf5c   :  { %2233 = vrot.lane.b32.xlu2 %v2228_v57, %s3279_s4 }
 0xf5d   :  { %v2214_v30 = vpop.permute.xlu2 %2213 }
 0xf5e   :  { %v2218_v31 = vmul.f32 %v2214_v30, %v3995_v2 }
 0xf5f   :  { %v2297_v36 = vpop.permute.xlu0 %2296 }
 0xf60   :  { %2388 = vperm.xlu1 %2906, %v2383_v58   ;;  %v2301_v44 = vmul.f32 %v2297_v36, %v3987_v55 }
 0xf64   :  { %2231 = vrot.lane.b32.xlu2 %v2227_v10, %s3279_s4 }
 0xf67   :  { %v2295_v50 = vpop.permute.xlu0 %2294 }
 0xf68   :  { %2367 = vrot.lane.b32.xlu1 %v2364_v17, %s3281_s21  ;;  %v2300_v35 = vmul.f32 %v2295_v50, %v4008_v15 }
 0xf6b   :  { %v2305_v21 = vpop.permute.xlu1 %2304 }
 0xf6c   :  { %v2310_v24 = vmul.f32 %v2305_v21, %v4008_v15  ;;  %2415 = vrot.lane.b32.xlu2 %v2412_v14, %s3281_s21 }
 0xf6e   :  { %2314 = vrot.lane.b32.xlu0 %v2310_v24, %s3279_s4 }
 0xf73   :  { %v2212_v37 = vpop.permute.xlu1 %2211 }
 0xf74   :  { %v2217_v38 = vmul.f32 %v2212_v37, %v4000_v13 }
 0xf76   :  { %2348 = vperm.xlu0 %2905, %v2343_v28  }
 0xf7e   :  { %2345 = vperm.xlu0 %2905, %v2342_v16  }
 0xfb6   :  { %v2234_v34 = vpop.permute.xlu2 %2233 }
 0xfb7   :  { %v2238_v33 = vadd.f32 %v2234_v34, %v2218_v31 }
 0xfb9   :  { %3123 = vtanh.f32 %v2238_v33 }
 0xfbe   :  { %v2232_v40 = vpop.permute.xlu2 %2231 }
 0xfbf   :  { %v3124_v1 = vpop.eup %3123  ;;  %v2237_v32 = vadd.f32 %v2232_v40, %v2217_v38 }
 0xfc0   :  { %2245 = vrot.lane.b32.xlu1 %v3124_v1, %s3276_s13  ;;  %v2441_v1 = vld [vmem:[#allocation6 + $0x7] sm:$0x1] }
 0xfc1   :  { %3125 = vtanh.f32 %v2237_v32 }
 0xfc6   :  { %v2416_v62 = vpop.permute.xlu2 %2415 }
 0xfc7   :  { %v3126_v45 = vpop.eup %3125 }
 0xfc8   :  { %2243 = vrot.lane.b32.xlu2 %v3126_v45, %s3276_s13  ;;  %2385 = vperm.xlu1 %2906, %v2382_v39  }
 0xfca   :  { %v2317_v46 = vpop.permute.xlu1 %2316 }
 0xfcb   :  { %v2321_v47 = vadd.f32 %v2317_v46, %v2301_v44 }
 0xfcd   :  { %3127 = vtanh.f32 %v2321_v47 }
 0xfd2   :  { %v2389_v63 = vpop.permute.xlu1 %2388 }
 0xfd3   :  { %v3128_v48 = vpop.eup %3127  ;;  %vm2391_vm11 = vcmp.eq.s32.totalorder %v2389_v63, 1 }
 0xfd4   :  { %2328 = vrot.lane.b32.xlu2 %v3128_v48, %s3276_s13 }
 0xfda   :  { %v2368_v0 = vpop.permute.xlu1 %2367 }
 0xfdc   :  { %2365 = vrot.lane.b32.xlu2 %v2362_v12, %s3281_s21 }
 0xfe0   :  { %v2315_v53 = vpop.permute.xlu0 %2314 }
 0xfe1   :  { %v2320_v54 = vadd.f32 %v2315_v53, %v2300_v35  ;;  %v2467_v35 = vld [vmem:[#allocation7] sm:$0x1]  ;;  %v2468_v53 = vld [vmem:[#allocation7 + $0x8] sm:$0x1] }
 0xfe3   :  { %3129 = vtanh.f32 %v2320_v54 }
 0xfe8   :  { %v2349_v56 = vpop.permute.xlu0 %2348 }
 0xfe9   :  { %v3130_v49 = vpop.eup %3129  ;;  %vm2351_vm9 = vcmp.eq.s32.totalorder %v2349_v56, 1 }
 0xfea   :  { %2326 = vrot.lane.b32.xlu0 %v3130_v49, %s3276_s13  ;;  %v2353_v23 = vsel %vm2351_vm9, %v2238_v33, %v2214_v30 }
 0xfeb   :  { %v2356_v42 = vrot.slane %v2353_v23, 7 }
 0xff0   :  { %v2346_v4 = vpop.permute.xlu0 %2345 }
 0xff1   :  { %vm2350_vm10 = vcmp.eq.s32.totalorder %v2346_v4, 1 }
 0xff2   :  { %v2352_v51 = vsel %vm2350_vm10, %v2237_v32, %v2212_v37  ;;  %2413 = vrot.lane.b32.xlu0 %v2410_v22, %s3281_s21  ;;  %v2442_v32 = vld [vmem:[#allocation6 + $0xf] sm:$0x1] }
 0xff3   :  { %v2357_v7 = vsel %vm404_vm8, %v2356_v42, %v2352_v51 }
 0xffa   :  { %2396 = vrot.lane.b32.xlu0 %v2393_v61, %s3279_s4 }
0x1022   :  { %v2244_v20 = vpop.permute.xlu2 %2243 }
0x1023   :  { %v2249_v58 = vmul.f32 %v2244_v20, %v4000_v13 }
0x102e   :  { %v2329_v3 = vpop.permute.xlu2 %2328 }
0x102f   :  { %v2333_v12 = vmul.f32 %v2329_v3, %v3987_v55 }
0x1031   :  { %v2420_v26 = vsel %vm2391_vm11, %v2333_v12, %v2416_v62 }
0x1032   :  { %v2246_v57 = vpop.permute.xlu1 %2245  ;;  %v2423_v10 = vrot.slane %v2420_v26, 7 }
0x1033   :  { %v2250_v5 = vmul.f32 %v2246_v57, %v3995_v2 }
0x1035   :  { %v2372_v60 = vsel %vm2351_vm9, %v2250_v5, %v2368_v0 }
0x1036   :  { %v2366_v6 = vpop.permute.xlu2 %2365  ;;  %v2375_v9 = vrot.slane %v2372_v60, 7 }
0x1037   :  { %v2371_v8 = vsel %vm2350_vm10, %v2249_v58, %v2366_v6 }
0x1038   :  { %v2376_v11 = vsel %vm404_vm8, %v2375_v9, %v2371_v8 }
0x1039   :  { %2377 = vrot.lane.b32.xlu1 %v2376_v11, %s3279_s4 }
0x103a   :  { %v2386_v13 = vpop.permute.xlu1 %2385 }
0x103b   :  { %vm2390_vm12 = vcmp.eq.s32.totalorder %v2386_v13, 1 }
0x1041   :  { %2394 = vrot.lane.b32.xlu1 %v2381_v59, %s3279_s4 }
0x105c   :  { %v2327_v43 = vpop.permute.xlu0 %2326 }
0x105d   :  { %v2332_v2 = vmul.f32 %v2327_v43, %v4008_v15 }
0x1064   :  { %v2414_v27 = vpop.permute.xlu0 %2413 }
0x1065   :  { %v2419_v17 = vsel %vm2390_vm12, %v2332_v2, %v2414_v27 }
0x1066   :  { %v2424_v18 = vsel %vm404_vm8, %v2423_v10, %v2419_v17 }
0x1067   :  { %2425 = vrot.lane.b32.xlu2 %v2424_v18, %s3279_s4 }
0x106c   :  { %v2397_v21 = vpop.permute.xlu0 %2396 }
0x106d   :  { %v2401_v55 = vsel %vm2391_vm11, %v2321_v47, %v2397_v21 }
0x106e   :  { %v2404_v22 = vrot.slane %v2401_v55, 7 }
0x106f   :  { %2358 = vrot.lane.b32.xlu2 %v2357_v7, %s3281_s21 }
0x10ab   :  { %v2378_v19 = vpop.permute.xlu1 %2377 }
0x10ac   :  { %2380 = vst.msk [vmem:[#allocation2] sm:$0x3] %vm124_vm0, %v2378_v19 }
0x10b3   :  { %v2395_v24 = vpop.permute.xlu1 %2394  ;;  %v2443_v25 = vld [vmem:[#allocation2] sm:$0x3] }
0x10b4   :  { %v2429_v14 = vld [vmem:[#allocation2] sm:$0x3]  ;;  %v2400_v15 = vsel %vm2390_vm12, %v2320_v54, %v2395_v24  ;;  %v2444_v28 = vpack.c.bf16 %v2443_v25, %v2443_v25 }
0x10b5   :  { %v2431_v29 = vrot.slane %v2429_v14, 1  ;;  %2433 = vst.msk [vmem:[#allocation12 + $0x6] sm:$0x1] %vm482_vm13, %v2429_v14  ;;  %v2405_v16 = vsel %vm404_vm8, %v2404_v22, %v2400_v15 }
0x10b6   :  { %2881 = vmatmul.msk.bf16.vlgmr.msrb.gmra.mxu2 %vm154_vm1, %v2444_v28  ;;  %2406 = vrot.lane.b32.xlu0 %v2405_v16, %s3281_s21 }
0x10b7   :  { %2434 = vst.msk [vmem:[#allocation12 + $0xe] sm:$0x1] %vm482_vm13, %v2431_v29 }
0x10c1   :  { %v2426_v30 = vpop.permute.xlu2 %2425 }
0x10c2   :  { %2428 = vst.msk [vmem:[#allocation4] sm:$0x3] %vm124_vm0, %v2426_v30 }
0x10c9   :  { %v2359_v31 = vpop.permute.xlu2 %2358  ;;  %v2469_v34 = vld [vmem:[#allocation4] sm:$0x3] }
0x10ca   :  { %v2435_v33 = vld [vmem:[#allocation4] sm:$0x3]  ;;  %2361 = vst.msk [vmem:[#allocation3] sm:$0x3] %vm124_vm0, %v2359_v31  ;;  %v2470_v37 = vpack.c.bf16 %v2469_v34, %v2469_v34  ;;  %v2664_v31 = vld [vmem:[%s4161_s3 + $0x8] sm:$0x1] }
0x10cb   :  { %v2437_v38 = vrot.slane %v2435_v33, 1  ;;  %2439 = vst.msk [vmem:[#allocation13 + $0x1] sm:$0x1] %vm482_vm13, %v2435_v33  ;;  %vm2666_vm7 = vcmp.gt.f32.partialorder %v2664_v31, 0.0 }
0x10cc   :  { %2882 = vmatmul.msk.bf16.vlgmr.msrb.gmra.mxu3 %vm154_vm1, %v2470_v37 }
0x10cd   :  { %2440 = vst.msk [vmem:[#allocation13 + $0x9] sm:$0x1] %vm482_vm13, %v2437_v38 }
0x10d1   :  { %v2493_v7 = vld [vmem:[#allocation3] sm:$0x3] }
0x10d2   :  { %v2535_v59 = vrot.slane %v2493_v7, 1 }
0x1128   :  { %v2407_v40 = vpop.permute.xlu0 %2406 }
0x1129   :  { %2409 = vst.msk [vmem:[#allocation5] sm:$0x3] %vm124_vm0, %v2407_v40 }
0x1130   :  { %v2576_v48 = vld [vmem:[#allocation5] sm:$0x3] }
0x1131   :  { %v2618_v50 = vrot.slane %v2576_v48, 1 }
0x1139   :  { %v2457_v41 = vpop.f32.mrf.mxu2 }
0x113a   :  { %v2462_v36 = vrot.slane %v2457_v41, 1  ;;  %v2465_v39 = vadd.f32 %v2457_v41, %v2441_v1 }
0x113c   :  { %v2466_v44 = vadd.f32 %v2462_v36, %v2442_v32  ;;  %3131 = vtanh.f32 %v2465_v39  ;;  %v2883_v0 = vmul.f32 -1.442695, %v2465_v39 }
0x113e   :  { %3133 = vtanh.f32 %v2466_v44  ;;  %v2884_v62 = vmul.f32 -1.442695, %v2466_v44  ;;  %v2708_v44 = vsel %vm2666_vm7, 1, %v3280_v52 }
0x1141   :  { %v2459_v45 = vpop.f32.mrf.mxu2 }
0x1142   :  { %v3132_v46 = vpop.eup %3131 }
0x1143   :  { %2546 = vrot.lane.b32.xlu0 %v3132_v46, %s3276_s13 }
0x1144   :  { %v3134_v47 = vpop.eup %3133 }
0x1145   :  { %2548 = vrot.lane.b32.xlu1 %v3134_v47, %s3276_s13 }
0x114b   :  { %2621 = vrot.lane.b32.xlu0 %v2618_v50, %s3279_s4 }
0x114f   :  { %v2483_v54 = vpop.f32.mrf.mxu3 }
0x1150   :  { %v2488_v56 = vrot.slane %v2483_v54, 1  ;;  %v2491_v49 = vadd.f32 %v2483_v54, %v2467_v35  ;;  %v2687_v54 = vld [vmem:[#allocation2] sm:$0x3] }
0x1152   :  { %v2492_v23 = vadd.f32 %v2488_v56, %v2468_v53  ;;  %3135 = vtanh.f32 %v2491_v49  ;;  %v2885_v58 = vmul.f32 -1.442695, %v2491_v49 }
0x1153   :  { %2619 = vrot.lane.b32.xlu0 %v2576_v48, %s3279_s4 }
0x1154   :  { %3137 = vtanh.f32 %v2492_v23  ;;  %v2886_v61 = vmul.f32 -1.442695, %v2492_v23 }
0x1156   :  { %3139 = vpow2.f32 %v2886_v61 }
0x1157   :  { %v2485_v4 = vpop.f32.mrf.mxu3  ;;  %3141 = vpow2.f32 %v2884_v62 }
0x1158   :  { %v3136_v42 = vpop.eup %3135  ;;  %v2689_v4 = vrot.slane %v2687_v54, 1 }
0x1159   :  { %2629 = vrot.lane.b32.xlu1 %v3136_v42, %s3276_s13 }
0x115a   :  { %v3138_v51 = vpop.eup %3137 }
0x115b   :  { %2631 = vrot.lane.b32.xlu2 %v3138_v51, %s3276_s13 }
0x115c   :  { %v3140_v63 = vpop.eup %3139 }
0x115d   :  { %v2584_v20 = vadd.f32 1.0, %v3140_v63  ;;  %v3142_v3 = vpop.eup %3141 }
0x115e   :  { %v2501_v57 = vadd.f32 1.0, %v3142_v3  ;;  %v2659_v3 = vld [vmem:[%s4160_s2 + $0x7] sm:$0x1] }
0x115f   :  { %3143 = vrcp.f32 %v2584_v20  ;;  %v2611_v17 = vand.u32 2147483648, %v2584_v20  ;;  %vm2605_vm14 = vweird.f32 %v2584_v20  ;;  %v2609_v18 = vand.u32 2147483647, %v2584_v20 }
0x1160   :  { %3145 = vpow2.f32 %v2883_v0  ;;  %v2528_v29 = vand.u32 2147483648, %v2501_v57  ;;  %vm2522_vm4 = vweird.f32 %v2501_v57  ;;  %v2526_v30 = vand.u32 2147483647, %v2501_v57 }
0x1161   :  { %2536 = vrot.lane.b32.xlu1 %v2493_v7, %s3279_s4  ;;  %3147 = vrcp.f32 %v2501_v57  ;;  %v2612_v22 = vor.u32 1.1754944e-38, %v2611_v17  ;;  %vm2610_vm2 = vcmp.eq.f32.partialorder %v2609_v18, 8.507059e+37  ;;  %v2735_v7 = vld [vmem:[#allocation4] sm:$0x3] }
0x1162   :  { %3149 = vpow2.f32 %v2885_v58  ;;  %v2529_v38 = vor.u32 1.1754944e-38, %v2528_v29  ;;  %vm2527_vm6 = vcmp.eq.f32.partialorder %v2526_v30, 8.507059e+37  ;;  %v2737_v63 = vrot.slane %v2735_v7, 1 }
0x1163   :  { %2538 = vrot.lane.b32.xlu2 %v2535_v59, %s3279_s4 }
0x1165   :  { %v3144_v5 = vpop.eup %3143 }
0x1166   :  { %v3146_v6 = vpop.eup %3145  ;;  %v2601_v60 = vmul.f32 %v3144_v5, %v2584_v20  ;;  %vm2606_vm1 = vweird.f32 %v3144_v5  ;;  %v2660_v20 = vld [vmem:[%s4160_s2 + $0xf] sm:$0x1]  ;;  %s3282_s2 = smov [#allocation12]  }
0x1167   :  { %v2500_v8 = vadd.f32 1.0, %v3146_v6  ;;  %v3148_v9 = vpop.eup %3147  ;;  %vm2607_vm15 = vmor %vm2605_vm14, %vm2606_vm1 }
0x1168   :  { %v2602_v11 = vsub.f32 1.0, %v2601_v60  ;;  %v3150_v43 = vpop.eup %3149  ;;  %v2518_v12 = vmul.f32 %v3148_v9, %v2501_v57  ;;  %vm2523_vm3 = vweird.f32 %v3148_v9 }
0x1169   :  { %3151 = vrcp.f32 %v2500_v8  ;;  %v4071_v26 = vadd.f32 1.0, %v3150_v43  ;;  %vm2524_vm5 = vmor %vm2522_vm4, %vm2523_vm3  ;;  %v2513_v39 = vand.u32 2147483648, %v2500_v8  ;;  %vm2507_vm10 = vweird.f32 %v2500_v8 }
0x116a   :  { %v2603_v13 = vmul.f32 %v3144_v5, %v2602_v11  ;;  %v2519_v2 = vsub.f32 1.0, %v2518_v12  ;;  %v2511_v45 = vand.u32 2147483647, %v2500_v8  ;;  %vm2662_vm3 = vcmp.gt.f32.partialorder %v2660_v20, 0.0 }
0x116b   :  { %3153 = vrcp.f32 %v4071_v26  ;;  %v2514_v48 = vor.u32 1.1754944e-38, %v2513_v39  ;;  %v2596_v49 = vand.u32 2147483648, %v4071_v26  ;;  %vm2590_vm14 = vweird.f32 %v4071_v26 }
0x116c   :  { %v2604_v27 = vadd.f32 %v3144_v5, %v2603_v13  ;;  %v2520_v21 = vmul.f32 %v3148_v9, %v2519_v2  ;;  %vm2512_vm12 = vcmp.eq.f32.partialorder %v2511_v45, 8.507059e+37  ;;  %v2594_v23 = vand.u32 2147483647, %v4071_v26 }
0x116d   :  { %v2597_v51 = vor.u32 1.1754944e-38, %v2596_v49  ;;  %v2668_v0 = vsel %vm2662_vm3, 1, %v3280_v52  ;;  %vm2661_vm4 = vcmp.gt.f32.partialorder %v2659_v3, 0.0 }
0x116e   :  { %v2608_v55 = vsel %vm2607_vm15, %v3144_v5, %v2604_v27  ;;  %v2521_v14 = vadd.f32 %v3148_v9, %v2520_v21  ;;  %v2667_v57 = vsel %vm2661_vm4, 1, %v3280_v52 }
0x116f   :  { %v3152_v10 = vpop.eup %3151  ;;  %v4074_v15 = vsel %vm2610_vm2, %v2612_v22, %v2608_v55  ;;  %vm2595_vm2 = vcmp.eq.f32.partialorder %v2594_v23, 8.507059e+37 }
0x1170   :  { %v2503_v19 = vmul.f32 %v3152_v10, %v2500_v8  ;;  %v2525_v37 = vsel %vm2524_vm5, %v3148_v9, %v2521_v14  ;;  %vm2508_vm9 = vweird.f32 %v3152_v10 }
0x1171   :  { %v3154_v24 = vpop.eup %3153  ;;  %v4082_v40 = vsel %vm2527_vm6, %v2529_v38, %v2525_v37  ;;  %vm2509_vm11 = vmor %vm2507_vm10, %vm2508_vm9 }
0x1172   :  { %v2504_v25 = vsub.f32 1.0, %v2503_v19  ;;  %v2586_v34 = vmul.f32 %v3154_v24, %v4071_v26  ;;  %vm2591_vm1 = vweird.f32 %v3154_v24  ;;  %v2663_v26 = vld [vmem:[%s4161_s3] sm:$0x1]  ;;  %v2706_v19 = vld [vmem:[#allocation5] sm:$0x3]  ;;  %s2770_s3 = sshll.u32 %s3282_s2, 4  ;;  %s2771_s3 = int_to_ptr.vmem [resolvable:$true] %s2770_s3 }
0x1173   :  { %vm2592_vm15 = vmor %vm2590_vm14, %vm2591_vm1  ;;  %vm2665_vm5 = vcmp.gt.f32.partialorder %v2663_v26, 0.0  ;;  %v2718_v21 = vrot.slane %v2706_v19, 1 }
0x1174   :  { %v2505_v33 = vmul.f32 %v3152_v10, %v2504_v25  ;;  %v2587_v32 = vsub.f32 1.0, %v2586_v34  ;;  %v2707_v2 = vsel %vm2665_vm5, 1, %v3280_v52 }
0x1176   :  { %v2506_v41 = vadd.f32 %v3152_v10, %v2505_v33  ;;  %v2588_v46 = vmul.f32 %v3154_v24, %v2587_v32 }
0x1178   :  { %v2510_v47 = vsel %vm2509_vm11, %v3152_v10, %v2506_v41  ;;  %v2589_v53 = vadd.f32 %v3154_v24, %v2588_v46 }
0x1179   :  { %v4087_v35 = vsel %vm2512_vm12, %v2514_v48, %v2510_v47 }
0x117a   :  { %v2593_v42 = vsel %vm2592_vm15, %v3154_v24, %v2589_v53 }
0x117b   :  { %v4095_v59 = vsel %vm2595_vm2, %v2597_v51, %v2593_v42 }
0x11b5   :  { %v2632_v28 = vpop.permute.xlu2 %2631  ;;  %v2547_v50 = vpop.permute.xlu0 %2546 }
0x11b6   :  { %v2636_v16 = vmul.f32 %v2632_v28, %v4074_v15  ;;  %v2552_v56 = vmul.f32 %v2547_v50, %v4087_v35 }
0x11b7   :  { %v2549_v1 = vpop.permute.xlu1 %2548 }
0x11b8   :  { %2641 = vrot.lane.b32.xlu1 %v2636_v16, %s3279_s4  ;;  %v2553_v36 = vmul.f32 %v2549_v1, %v4082_v40 }
0x11ba   :  { %2558 = vrot.lane.b32.xlu2 %v2553_v36, %s3279_s4 }
0x11bd   :  { %v2539_v58 = vpop.permute.xlu2 %2538  ;;  %v2622_v13 = vpop.permute.xlu0 %2621 }
0x11be   :  { %v2543_v5 = vmul.f32 %v2539_v58, %v4082_v40  ;;  %v2626_v27 = vmul.f32 %v2622_v13, %v4074_v15 }
0x11c0   :  { %2713 = vperm.xlu1 %2906, %v2708_v44  }
0x11c2   :  { %2556 = vrot.lane.b32.xlu2 %v2552_v56, %s3279_s4 }
0x11c5   :  { %v2620_v22 = vpop.permute.xlu0 %2619 }
0x11c6   :  { %v2625_v52 = vmul.f32 %v2620_v22, %v4095_v59 }
0x11c8   :  { %2692 = vrot.lane.b32.xlu1 %v2689_v4, %s3281_s21 }
0x11ca   :  { %2740 = vrot.lane.b32.xlu2 %v2737_v63, %s3281_s21 }
0x11cb   :  { %v2630_v61 = vpop.permute.xlu1 %2629 }
0x11cc   :  { %v2635_v62 = vmul.f32 %v2630_v61, %v4095_v59 }
0x11ce   :  { %2639 = vrot.lane.b32.xlu0 %v2635_v62, %s3279_s4 }
0x11d3   :  { %v2537_v8 = vpop.permute.xlu1 %2536 }
0x11d4   :  { %v2542_v9 = vmul.f32 %v2537_v8, %v4087_v35 }
0x11d6   :  { %2673 = vperm.xlu0 %2905, %v2668_v0  }
0x11de   :  { %2670 = vperm.xlu0 %2905, %v2667_v57  }
0x1214   :  { %v2559_v6 = vpop.permute.xlu2 %2558 }
0x1215   :  { %v2563_v60 = vadd.f32 %v2559_v6, %v2543_v5 }
0x1217   :  { %3155 = vtanh.f32 %v2563_v60 }
0x121c   :  { %v2557_v11 = vpop.permute.xlu2 %2556 }
0x121d   :  { %v3156_v43 = vpop.eup %3155  ;;  %v2562_v12 = vadd.f32 %v2557_v11, %v2542_v9 }
0x121e   :  { %2570 = vrot.lane.b32.xlu1 %v3156_v43, %s3276_s13 }
0x121f   :  { %3157 = vtanh.f32 %v2562_v12 }
0x1224   :  { %v2741_v33 = vpop.permute.xlu2 %2740 }
0x1225   :  { %v3158_v10 = vpop.eup %3157 }
0x1226   :  { %2710 = vperm.xlu1 %2906, %v2707_v2   ;;  %2568 = vrot.lane.b32.xlu2 %v3158_v10, %s3276_s13 }
0x122a   :  { %v2642_v17 = vpop.permute.xlu1 %2641 }
0x122b   :  { %v2646_v18 = vadd.f32 %v2642_v17, %v2626_v27 }
0x122d   :  { %3159 = vtanh.f32 %v2646_v18 }
0x122e   :  { %2721 = vrot.lane.b32.xlu1 %v2718_v21, %s3279_s4 }
0x1232   :  { %v2714_v37 = vpop.permute.xlu1 %2713 }
0x1233   :  { %v3160_v55 = vpop.eup %3159  ;;  %vm2716_vm9 = vcmp.eq.s32.totalorder %v2714_v37, 1 }
0x1234   :  { %2653 = vrot.lane.b32.xlu2 %v3160_v55, %s3276_s13 }
0x123a   :  { %v2693_v1 = vpop.permute.xlu1 %2692 }
0x123c   :  { %2690 = vrot.lane.b32.xlu2 %v2687_v54, %s3281_s21 }
0x1240   :  { %v2640_v24 = vpop.permute.xlu0 %2639 }
0x1241   :  { %v2645_v25 = vadd.f32 %v2640_v24, %v2625_v52 }
0x1243   :  { %3161 = vtanh.f32 %v2645_v25 }
0x1244   :  { %2719 = vrot.lane.b32.xlu2 %v2706_v19, %s3279_s4 }
0x1248   :  { %v2674_v14 = vpop.permute.xlu0 %2673 }
0x1249   :  { %v3162_v28 = vpop.eup %3161  ;;  %vm2676_vm6 = vcmp.eq.s32.totalorder %v2674_v14, 1 }
0x124a   :  { %2651 = vrot.lane.b32.xlu0 %v3162_v28, %s3276_s13  ;;  %v2678_v29 = vsel %vm2676_vm6, %v2563_v60, %v2539_v58 }
0x124b   :  { %v2681_v30 = vrot.slane %v2678_v29, 7 }
0x1250   :  { %v2671_v16 = vpop.permute.xlu0 %2670 }
0x1251   :  { %vm2675_vm7 = vcmp.eq.s32.totalorder %v2671_v16, 1 }
0x1252   :  { %v2677_v31 = vsel %vm2675_vm7, %v2562_v12, %v2537_v8  ;;  %2738 = vrot.lane.b32.xlu0 %v2735_v7, %s3281_s21 }
0x1253   :  { %v2682_v34 = vsel %vm404_vm8, %v2681_v30, %v2677_v31 }
0x1254   :  { %2683 = vrot.lane.b32.xlu2 %v2682_v34, %s3281_s21 }
0x1280   :  { %v2569_v38 = vpop.permute.xlu2 %2568 }
0x1281   :  { %v2574_v36 = vmul.f32 %v2569_v38, %v4087_v35 }
0x128e   :  { %v2654_v32 = vpop.permute.xlu2 %2653 }
0x128f   :  { %v2658_v42 = vmul.f32 %v2654_v32, %v4074_v15 }
0x1290   :  { %v2571_v41 = vpop.permute.xlu1 %2570 }
0x1291   :  { %v2575_v39 = vmul.f32 %v2571_v41, %v4082_v40  ;;  %v2745_v51 = vsel %vm2716_vm9, %v2658_v42, %v2741_v33 }
0x1292   :  { %v2748_v61 = vrot.slane %v2745_v51, 7 }
0x1293   :  { %v2697_v45 = vsel %vm2676_vm6, %v2575_v39, %v2693_v1 }
0x1294   :  { %v2700_v47 = vrot.slane %v2697_v45, 7 }
0x1296   :  { %v2691_v44 = vpop.permute.xlu2 %2690 }
0x1297   :  { %v2696_v46 = vsel %vm2675_vm7, %v2574_v36, %v2691_v44 }
0x1298   :  { %v2701_v48 = vsel %vm404_vm8, %v2700_v47, %v2696_v46  ;;  %v2711_v50 = vpop.permute.xlu1 %2710 }
0x1299   :  { %2702 = vrot.lane.b32.xlu0 %v2701_v48, %s3279_s4  ;;  %vm2715_vm10 = vcmp.eq.s32.totalorder %v2711_v50, 1 }
0x129e   :  { %v2720_v53 = vpop.permute.xlu2 %2719 }
0x129f   :  { %v2725_v23 = vsel %vm2715_vm10, %v2645_v25, %v2720_v53 }
0x12a0   :  { %v2722_v54 = vpop.permute.xlu1 %2721 }
0x12a1   :  { %v2726_v56 = vsel %vm2716_vm9, %v2646_v18, %v2722_v54 }
0x12a2   :  { %v2729_v49 = vrot.slane %v2726_v56, 7 }
0x12a4   :  { %v2730_v35 = vsel %vm404_vm8, %v2729_v49, %v2725_v23 }
0x12a5   :  { %2731 = vrot.lane.b32.xlu0 %v2730_v35, %s3281_s21 }
0x12ae   :  { %v2684_v40 = vpop.permute.xlu2 %2683 }
0x12af   :  { %2686 = vst.msk [vmem:[#allocation3] sm:$0x3] %vm124_vm0, %v2684_v40 }
0x12bc   :  { %v2652_v4 = vpop.permute.xlu0 %2651 }
0x12bd   :  { %v2657_v7 = vmul.f32 %v2652_v4, %v4095_v59 }
0x12c4   :  { %v2739_v62 = vpop.permute.xlu0 %2738 }
0x12c5   :  { %v2744_v63 = vsel %vm2715_vm10, %v2657_v7, %v2739_v62 }
0x12c6   :  { %v2749_v20 = vsel %vm404_vm8, %v2748_v61, %v2744_v63 }
0x12c7   :  { %2750 = vrot.lane.b32.xlu1 %v2749_v20, %s3279_s4  ;;  %s3283_s4 = smov [#allocation13]  }
0x12c8   :  { %s2786_s5 = sshll.u32 %s3283_s4, 4  ;;  %s2787_s5 = int_to_ptr.vmem [resolvable:$true] %s2786_s5 }
0x130b   :  { %v2703_v0 = vpop.permute.xlu0 %2702 }
0x130c   :  { %2705 = vst.msk [vmem:[#allocation2] sm:$0x3] %vm124_vm0, %v2703_v0 }
0x1313   :  { %v2754_v15 = vld [vmem:[#allocation2] sm:$0x3] }
0x1314   :  { %v2756_v3 = vrot.slane %v2754_v15, 1  ;;  %2758 = vst.msk [vmem:[#allocation12 + $0x7] sm:$0x1] %vm482_vm13, %v2754_v15 }
0x1316   :  { %2759 = vst.msk [vmem:[#allocation12 + $0xf] sm:$0x1] %vm482_vm13, %v2756_v3 }
0x1317   :  { %2778 = dma.vmem_to_hbm [thread:$0]  %s2771_s3, 256, %s2773_s1, [#allocation9], %s3273_s11, %s3273_s11, %s3274_s12   ;;  %v2732_v59 = vpop.permute.xlu0 %2731 }
0x1318   :  { %2734 = vst.msk [vmem:[#allocation5] sm:$0x3] %vm124_vm0, %v2732_v59 }
0x1339   :  { %v2751_v57 = vpop.permute.xlu1 %2750 }
0x133a   :  { %2753 = vst.msk [vmem:[#allocation4] sm:$0x3] %vm124_vm0, %v2751_v57 }
0x1341   :  { %v2760_v58 = vld [vmem:[#allocation4] sm:$0x3] }
0x1342   :  { %v2762_v5 = vrot.slane %v2760_v58, 1  ;;  %2764 = vst.msk [vmem:[#allocation13] sm:$0x1] %vm482_vm13, %v2760_v58 }
0x1344   :  { %2765 = vst.msk [vmem:[#allocation13 + $0x8] sm:$0x1] %vm482_vm13, %v2762_v5 }
0x1345   :  { %2794 = dma.vmem_to_hbm [thread:$0]  %s2787_s5, 256, %s2789_s16, [#allocation14], %s3273_s11, %s3273_s11, %s3274_s12  }
0x1346   :  { %3267 = dma.done.wait [#allocation9], 256  }
0x1347   :  { %3268 = vsyncadd [#allocation9], 4294967040 }
0x1348   :  { %3269 = dma.done.wait [#allocation14], 256  }
0x1349   :  { %3270 = vsyncadd [#allocation14], 4294967040 }
0x134a   :  { %2803 = vsyncpa [#allocation8], 1 }
0x134b   :  { %2804 = vsyncpa [#allocation11], 1 }
0x134c   :  { %2805 = vsyncpa [#allocation9], 1 }
0x134d   :  { %2806 = vsyncpa [#allocation14], 1 }

</bundles_post_ra>
